<compile_context>
chip_gen: v7x
topology: tpu7x:2x2x1
jax: 0.10.0
libtpu: 0.0.40
codegen_flags: <defaults>
</compile_context>

<pallas_src>
import functools

import jax
import jax.numpy as jnp
from jax.experimental import pallas as pl
from jax.experimental.pallas import tpu as pltpu


# ----------------------------------------------------------------------------
# Fused kernel: single grid step handles the entire (B, V) batch.
#   patches_ref : (M, Kp)      bf16  im2col slab, M = B*V*H*W, Kp = pad(9*Cin)
#   wconv_ref   : (Kp, C0)     bf16  K-folded 3x3 conv weight (zero-padded rows)
#   bconv_ref   : (1, C0)      f32
#   pool_ref    : (B*V, M)     bf16  block-diagonal averaging matrix (GAP)
#   wfc_ref     : (C0, F1)     bf16
#   bfc_ref     : (1, F1)      f32
#   wcls_ref    : (F1, ncls)   bf16
#   bcls_ref    : (1, ncls)    f32
#   out_refs[0] : (B, ncls)    f32   logits
#   out_refs[1] : (B, F1)      f32   pooled global feature (only if with_ft)
# ----------------------------------------------------------------------------
def mvcnn_fused_kernel(patches_ref, wconv_ref, bconv_ref, pool_ref,
                       wfc_ref, bfc_ref, wcls_ref, bcls_ref, *out_refs,
                       B, V, with_ft):
    # ---- 3x3 conv as ONE K-folded matmul (bf16 operands, f32 accumulation) ----
    acc = jnp.dot(patches_ref[...], wconv_ref[...],
                  preferred_element_type=jnp.float32)           # (M, C0) f32
    acc = jnp.maximum(acc + bconv_ref[...], 0.0)                 # bias + ReLU

    # ---- global average pool per view, as a pooling matmul on the MXU ----
    feat = jnp.dot(pool_ref[...], acc.astype(jnp.bfloat16),
                   preferred_element_type=jnp.float32)           # (B*V, C0)

    # ---- per-view fc + ReLU ----
    h = jnp.dot(feat.astype(jnp.bfloat16), wfc_ref[...],
                preferred_element_type=jnp.float32)
    h = jnp.maximum(h + bfc_ref[...], 0.0)                       # (B*V, F1)

    # ---- view pooling: max over the V views of each batch element ----
    ft = jnp.concatenate(
        [jnp.max(h[b * V:(b + 1) * V, :], axis=0, keepdims=True)
         for b in range(B)], axis=0)                             # (B, F1)

    # ---- classifier ----
    out = jnp.dot(ft.astype(jnp.bfloat16), wcls_ref[...],
                  preferred_element_type=jnp.float32) + bcls_ref[...]

    out_refs[0][...] = out
    if with_ft:
        out_refs[1][...] = ft


@functools.partial(jax.jit, static_argnames=("global_ft",))
def image_forward(data, params, *, global_ft=False):
    """data: (B, V, C, H, W) float32, NCHW per view (PyTorch convention)."""
    B, V, C, H, W = data.shape
    BV, HW = B * V, H * W
    M = BV * HW
    K = 9 * C
    Kp = max(((K + 7) // 8) * 8, 8)                              # 27 -> 32

    C0 = params["w_conv"].shape[-1]
    F1 = params["w_fc"].shape[-1]
    n_class = params["w_cls"].shape[-1]

    # ---- preprocessing (fused XLA chain): NCHW->NHWC, pad=1, im2col, bf16 ----
    x = jnp.transpose(data.reshape(BV, C, H, W), (0, 2, 3, 1))   # (BV, H, W, C)
    xp = jnp.pad(x, ((0, 0), (1, 1), (1, 1), (0, 0)))
    patches = jnp.concatenate(
        [xp[:, dy:dy + H, dx:dx + W, :] for dy in range(3) for dx in range(3)],
        axis=-1).reshape(M, K)
    patches = jnp.pad(patches, ((0, 0), (0, Kp - K))).astype(jnp.bfloat16)

    # K-folded conv weight (tap = dy*3 + dx, channel innermost), zero-pad rows.
    w_conv = jnp.pad(params["w_conv"].reshape(K, C0),
                     ((0, Kp - K), (0, 0))).astype(jnp.bfloat16)
    w_fc = params["w_fc"].astype(jnp.bfloat16)
    w_cls = params["w_cls"].astype(jnp.bfloat16)

    # Block-diagonal averaging matrix for GAP (data independent -> XLA
    # constant-folds it once).
    pool = (jnp.repeat(jnp.arange(BV), HW)[None, :]
            == jnp.arange(BV)[:, None]).astype(jnp.float32) / HW
    pool = pool.astype(jnp.bfloat16)                             # (BV, M)

    kernel = functools.partial(mvcnn_fused_kernel, B=B, V=V, with_ft=global_ft)

    if global_ft:
        out_shape = (jax.ShapeDtypeStruct((B, n_class), jnp.float32),
                     jax.ShapeDtypeStruct((B, F1), jnp.float32))
        out_specs = (pl.BlockSpec((B, n_class), lambda i: (0, 0)),
                     pl.BlockSpec((B, F1), lambda i: (0, 0)))
    else:
        out_shape = jax.ShapeDtypeStruct((B, n_class), jnp.float32)
        out_specs = pl.BlockSpec((B, n_class), lambda i: (0, 0))

    return pl.pallas_call(
        kernel,
        out_shape=out_shape,
        grid_spec=pltpu.PrefetchScalarGridSpec(
            num_scalar_prefetch=0,
            grid=(1,),
            in_specs=[
                pl.BlockSpec((M, Kp), lambda i: (0, 0)),           # patches
                pl.BlockSpec((Kp, C0), lambda i: (0, 0)),          # w_conv
                pl.BlockSpec((1, C0), lambda i: (0, 0)),           # b_conv
                pl.BlockSpec((BV, M), lambda i: (0, 0)),           # pool
                pl.BlockSpec((C0, F1), lambda i: (0, 0)),          # w_fc
                pl.BlockSpec((1, F1), lambda i: (0, 0)),           # b_fc
                pl.BlockSpec((F1, n_class), lambda i: (0, 0)),     # w_cls
                pl.BlockSpec((1, n_class), lambda i: (0, 0)),      # b_cls
            ],
            out_specs=out_specs,
        ),
        compiler_params=pltpu.CompilerParams(
            dimension_semantics=("arbitrary",)),
    )(patches, w_conv, params["b_conv"], pool, w_fc, params["b_fc"],
      w_cls, params["b_cls"])


def init_params(key, *, Cin=3, C0=16, F1=32, n_class=10):
    k = jax.random.split(key, 5)
    return {
        # conv weight stored as (9, Cin, C0): 3x3 taps flattened, tap = dy*3+dx
        "w_conv": 0.1 * jax.random.normal(k[0], (9, Cin, C0), jnp.float32),
        "b_conv": 0.1 * jax.random.normal(k[1], (1, C0), jnp.float32),
        "w_fc":   0.1 * jax.random.normal(k[2], (C0, F1), jnp.float32),
        "b_fc":   0.1 * jax.random.normal(k[3], (1, F1), jnp.float32),
        "w_cls":  0.1 * jax.random.normal(k[4], (F1, n_class), jnp.float32),
        "b_cls":  jnp.zeros((1, n_class), jnp.float32),
    }


def reference_forward(data, params):
    """Pure-JAX reference mirroring the kernel math (bf16 matmul operands)."""
    B, V, C, H, W = data.shape
    BV, HW = B * V, H * W
    C0 = params["w_conv"].shape[-1]
    F1 = params["w_fc"].shape[-1]

    x = jnp.transpose(data.reshape(BV, C, H, W), (0, 2, 3, 1))
    xp = jnp.pad(x, ((0, 0), (1, 1), (1, 1), (0, 0)))
    patches = jnp.concatenate(
        [xp[:, dy:dy + H, dx:dx + W, :] for dy in range(3) for dx in range(3)],
        axis=-1).reshape(BV * HW, 9 * C)

    acc = jnp.dot(patches.astype(jnp.bfloat16),
                  params["w_conv"].reshape(9 * C, C0).astype(jnp.bfloat16),
                  preferred_element_type=jnp.float32)
    acc = jax.nn.relu(acc + params["b_conv"])

    pool = (jnp.repeat(jnp.arange(BV), HW)[None, :]
            == jnp.arange(BV)[:, None]).astype(jnp.float32) / HW
    feat = jnp.dot(pool.astype(jnp.bfloat16), acc.astype(jnp.bfloat16),
                   preferred_element_type=jnp.float32)           # (BV, C0)

    h = jax.nn.relu(jnp.dot(feat.astype(jnp.bfloat16),
                            params["w_fc"].astype(jnp.bfloat16),
                            preferred_element_type=jnp.float32)
                    + params["b_fc"])                            # (BV, F1)
    ft = h.reshape(B, V, F1).max(axis=1)                         # (B, F1)
    out = jnp.dot(ft.astype(jnp.bfloat16),
                  params["w_cls"].astype(jnp.bfloat16),
                  preferred_element_type=jnp.float32) + params["b_cls"]
    return out, ft


if __name__ == "__main__":
    key = jax.random.PRNGKey(0)
    B, V, C, H, W = 2, 24, 3, 8, 8      # n_view=24 as in MVCNN(n_class, n_view=24)
    n_class = 10

    kd, kp = jax.random.split(key)
    data = jax.random.normal(kd, (B, V, C, H, W), jnp.float32)
    params = init_params(kp, Cin=C, n_class=n_class)

    out_img = image_forward(data, params, global_ft=False)
    out_img = jax.block_until_ready(out_img)
    assert out_img.shape == (B, n_class), out_img.shape

    out2, ft = image_forward(data, params, global_ft=True)
    jax.block_until_ready((out2, ft))
    assert out2.shape == (B, n_class), out2.shape
    assert ft.shape == (B, 32), ft.shape

    ref_out, ref_ft = reference_forward(data, params)
    assert jnp.allclose(out2, ref_out, atol=5e-3, rtol=5e-3), \
        float(jnp.max(jnp.abs(out2 - ref_out)))
    assert jnp.allclose(ft, ref_ft, atol=5e-3, rtol=5e-3), \
        float(jnp.max(jnp.abs(ft - ref_ft)))
    assert jnp.allclose(out_img, out2, atol=1e-5, rtol=1e-5)

    print("KERNEL_OK")
</pallas_src>

<mosaic_0001>
module attributes {stable_mosaic.version = 11 : i64} {
  func.func @mvcnn_fused_kernel(%arg0: i32, %arg1: memref<3072x32xbf16, #tpu.memory_space<vmem>>, %arg2: memref<32x16xbf16, #tpu.memory_space<vmem>>, %arg3: memref<1x16xf32, #tpu.memory_space<vmem>>, %arg4: memref<48x3072xbf16, #tpu.memory_space<vmem>>, %arg5: memref<16x32xbf16, #tpu.memory_space<vmem>>, %arg6: memref<1x32xf32, #tpu.memory_space<vmem>>, %arg7: memref<32x10xbf16, #tpu.memory_space<vmem>>, %arg8: memref<1x10xf32, #tpu.memory_space<vmem>>, %arg9: memref<2x10xf32, #tpu.memory_space<vmem>>) attributes {dimension_semantics = [#tpu.dimension_semantics<arbitrary>], iteration_bounds = array<i64: 1>, scalar_prefetch = 0 : i64, scratch_operands = 0 : i64, tpu.core_type = #tpu.core_type<tc>, window_params = [{pipeline_mode = #tpu.pipeline_mode<synchronous>, transform_indices = @transform_0, window_bounds = array<i64: 3072, 32>}, {pipeline_mode = #tpu.pipeline_mode<synchronous>, transform_indices = @transform_1, window_bounds = array<i64: 32, 16>}, {pipeline_mode = #tpu.pipeline_mode<synchronous>, transform_indices = @transform_2, window_bounds = array<i64: 1, 16>}, {pipeline_mode = #tpu.pipeline_mode<synchronous>, transform_indices = @transform_3, window_bounds = array<i64: 48, 3072>}, {pipeline_mode = #tpu.pipeline_mode<synchronous>, transform_indices = @transform_4, window_bounds = array<i64: 16, 32>}, {pipeline_mode = #tpu.pipeline_mode<synchronous>, transform_indices = @transform_5, window_bounds = array<i64: 1, 32>}, {pipeline_mode = #tpu.pipeline_mode<synchronous>, transform_indices = @transform_6, window_bounds = array<i64: 32, 10>}, {pipeline_mode = #tpu.pipeline_mode<synchronous>, transform_indices = @transform_7, window_bounds = array<i64: 1, 10>}, {pipeline_mode = #tpu.pipeline_mode<synchronous>, transform_indices = @transform_8, window_bounds = array<i64: 2, 10>}]} {
    %c0 = arith.constant 0 : index
    %c0_0 = arith.constant 0 : index
    %0 = vector.load %arg1[%c0, %c0_0] : memref<3072x32xbf16, #tpu.memory_space<vmem>>, vector<3072x32xbf16>
    %c0_1 = arith.constant 0 : index
    %c0_2 = arith.constant 0 : index
    %1 = vector.load %arg2[%c0_1, %c0_2] : memref<32x16xbf16, #tpu.memory_space<vmem>>, vector<32x16xbf16>
    %cst = arith.constant dense<0.000000e+00> : vector<3072x16xf32>
    %2 = tpu.matmul %0, %1, %cst {dimension_numbers = #tpu.dot_dimension_numbers<[1], [0], [0], [1], [0, 0, 1, 1], [], []>} : vector<3072x32xbf16>, vector<32x16xbf16>, vector<3072x16xf32> -> vector<3072x16xf32>
    %c0_3 = arith.constant 0 : index
    %c0_4 = arith.constant 0 : index
    %3 = vector.load %arg3[%c0_3, %c0_4] : memref<1x16xf32, #tpu.memory_space<vmem>>, vector<1x16xf32>
    %4 = vector.broadcast %3 : vector<1x16xf32> to vector<3072x16xf32>
    %5 = arith.addf %2, %4 : vector<3072x16xf32>
    %cst_5 = arith.constant 0.000000e+00 : f32
    %6 = vector.broadcast %cst_5 : f32 to vector<3072x16xf32>
    %7 = arith.maximumf %5, %6 : vector<3072x16xf32>
    %c0_6 = arith.constant 0 : index
    %c0_7 = arith.constant 0 : index
    %8 = vector.load %arg4[%c0_6, %c0_7] : memref<48x3072xbf16, #tpu.memory_space<vmem>>, vector<48x3072xbf16>
    %9 = arith.truncf %7 : vector<3072x16xf32> to vector<3072x16xbf16>
    %cst_8 = arith.constant dense<0.000000e+00> : vector<48x16xf32>
    %10 = tpu.matmul %8, %9, %cst_8 {dimension_numbers = #tpu.dot_dimension_numbers<[1], [0], [0], [1], [0, 0, 1, 1], [], []>} : vector<48x3072xbf16>, vector<3072x16xbf16>, vector<48x16xf32> -> vector<48x16xf32>
    %11 = arith.truncf %10 : vector<48x16xf32> to vector<48x16xbf16>
    %c0_9 = arith.constant 0 : index
    %c0_10 = arith.constant 0 : index
    %12 = vector.load %arg5[%c0_9, %c0_10] : memref<16x32xbf16, #tpu.memory_space<vmem>>, vector<16x32xbf16>
    %cst_11 = arith.constant dense<0.000000e+00> : vector<48x32xf32>
    %13 = tpu.matmul %11, %12, %cst_11 {dimension_numbers = #tpu.dot_dimension_numbers<[1], [0], [0], [1], [0, 0, 1, 1], [], []>} : vector<48x16xbf16>, vector<16x32xbf16>, vector<48x32xf32> -> vector<48x32xf32>
    %c0_12 = arith.constant 0 : index
    %c0_13 = arith.constant 0 : index
    %14 = vector.load %arg6[%c0_12, %c0_13] : memref<1x32xf32, #tpu.memory_space<vmem>>, vector<1x32xf32>
    %15 = vector.broadcast %14 : vector<1x32xf32> to vector<48x32xf32>
    %16 = arith.addf %13, %15 : vector<48x32xf32>
    %cst_14 = arith.constant 0.000000e+00 : f32
    %17 = vector.broadcast %cst_14 : f32 to vector<48x32xf32>
    %18 = arith.maximumf %16, %17 : vector<48x32xf32>
    %19 = vector.extract_strided_slice %18 {offsets = [0, 0], sizes = [24, 32], strides = [1, 1]} : vector<48x32xf32> to vector<24x32xf32>
    %cst_15 = arith.constant dense<0xFF800000> : vector<32xf32>
    %20 = vector.multi_reduction <maximumf>, %19, %cst_15 [0] : vector<24x32xf32> to vector<32xf32>
    %21 = vector.shape_cast %20 : vector<32xf32> to vector<1x32xf32>
    %22 = vector.extract_strided_slice %18 {offsets = [24, 0], sizes = [24, 32], strides = [1, 1]} : vector<48x32xf32> to vector<24x32xf32>
    %cst_16 = arith.constant dense<0xFF800000> : vector<32xf32>
    %23 = vector.multi_reduction <maximumf>, %22, %cst_16 [0] : vector<24x32xf32> to vector<32xf32>
    %24 = vector.shape_cast %23 : vector<32xf32> to vector<1x32xf32>
    %25 = tpu.concatenate %21, %24 in 0 : vector<1x32xf32>, vector<1x32xf32> -> vector<2x32xf32>
    %26 = arith.truncf %25 : vector<2x32xf32> to vector<2x32xbf16>
    %c0_17 = arith.constant 0 : index
    %c0_18 = arith.constant 0 : index
    %27 = vector.load %arg7[%c0_17, %c0_18] : memref<32x10xbf16, #tpu.memory_space<vmem>>, vector<32x10xbf16>
    %cst_19 = arith.constant dense<0.000000e+00> : vector<2x10xf32>
    %28 = tpu.matmul %26, %27, %cst_19 {dimension_numbers = #tpu.dot_dimension_numbers<[1], [0], [0], [1], [0, 0, 1, 1], [], []>} : vector<2x32xbf16>, vector<32x10xbf16>, vector<2x10xf32> -> vector<2x10xf32>
    %c0_20 = arith.constant 0 : index
    %c0_21 = arith.constant 0 : index
    %29 = vector.load %arg8[%c0_20, %c0_21] : memref<1x10xf32, #tpu.memory_space<vmem>>, vector<1x10xf32>
    %30 = vector.broadcast %29 : vector<1x10xf32> to vector<2x10xf32>
    %31 = arith.addf %28, %30 : vector<2x10xf32>
    %c0_22 = arith.constant 0 : index
    %c0_23 = arith.constant 0 : index
    %32 = vector.load %arg9[%c0_22, %c0_23] : memref<2x10xf32, #tpu.memory_space<vmem>>, vector<2x10xf32>
    tpu.vector_store %arg9[%c0_22, %c0_23], %31 {strides = array<i32>} : memref<2x10xf32, #tpu.memory_space<vmem>>, vector<2x10xf32>,
    return
  }
  func.func @transform_0(%arg0: i32) -> (i32, i32) {
    %c0_i32 = arith.constant 0 : i32
    %c0_i32_0 = arith.constant 0 : i32
    %c0_i32_1 = arith.constant 0 : i32
    return %c0_i32, %c0_i32_0 : i32, i32
  }
  func.func @transform_1(%arg0: i32) -> (i32, i32) {
    %c0_i32 = arith.constant 0 : i32
    %c0_i32_0 = arith.constant 0 : i32
    %c0_i32_1 = arith.constant 0 : i32
    return %c0_i32, %c0_i32_0 : i32, i32
  }
  func.func @transform_2(%arg0: i32) -> (i32, i32) {
    %c0_i32 = arith.constant 0 : i32
    %c0_i32_0 = arith.constant 0 : i32
    %c0_i32_1 = arith.constant 0 : i32
    return %c0_i32, %c0_i32_0 : i32, i32
  }
  func.func @transform_3(%arg0: i32) -> (i32, i32) {
    %c0_i32 = arith.constant 0 : i32
    %c0_i32_0 = arith.constant 0 : i32
    %c0_i32_1 = arith.constant 0 : i32
    return %c0_i32, %c0_i32_0 : i32, i32
  }
  func.func @transform_4(%arg0: i32) -> (i32, i32) {
    %c0_i32 = arith.constant 0 : i32
    %c0_i32_0 = arith.constant 0 : i32
    %c0_i32_1 = arith.constant 0 : i32
    return %c0_i32, %c0_i32_0 : i32, i32
  }
  func.func @transform_5(%arg0: i32) -> (i32, i32) {
    %c0_i32 = arith.constant 0 : i32
    %c0_i32_0 = arith.constant 0 : i32
    %c0_i32_1 = arith.constant 0 : i32
    return %c0_i32, %c0_i32_0 : i32, i32
  }
  func.func @transform_6(%arg0: i32) -> (i32, i32) {
    %c0_i32 = arith.constant 0 : i32
    %c0_i32_0 = arith.constant 0 : i32
    %c0_i32_1 = arith.constant 0 : i32
    return %c0_i32, %c0_i32_0 : i32, i32
  }
  func.func @transform_7(%arg0: i32) -> (i32, i32) {
    %c0_i32 = arith.constant 0 : i32
    %c0_i32_0 = arith.constant 0 : i32
    %c0_i32_1 = arith.constant 0 : i32
    return %c0_i32, %c0_i32_0 : i32, i32
  }
  func.func @transform_8(%arg0: i32) -> (i32, i32) {
    %c0_i32 = arith.constant 0 : i32
    %c0_i32_0 = arith.constant 0 : i32
    %c0_i32_1 = arith.constant 0 : i32
    return %c0_i32, %c0_i32_0 : i32, i32
  }
}

</mosaic_0001>

<bundles_post_ra>
// kernel: eq.8
= control target key start
LH: loop header
LB: loop body
LE: loop exit
PB: predicated region body
PF: predicated region fallthrough
CT: control target
= control target key end

     0   :  { %vm3_vm0 = vcmask 523264   ;;  %s45_s10 = smov 64   ;;  %vm19_vm1 = vcmask 1048064   ;;  %s92_s0 = inlined_call_operand.vmem [shape: s32[48,64], index: 0, kind: input, shape index: {}]   ;;  %s93_s1 = inlined_call_operand.vmem [shape: s32[3072], index: 1, kind: output, shape index: {}]  }
   0x1   :  { %v39_v0 = vld [vmem:[%s92_s0 + $0x1] ss:$2 sm:$0xff]   ;;  %v2_v2 = vld [vmem:[%s92_s0] ss:$2 sm:$0xff]   ;;  %v40_v4 = vld [vmem:[%s92_s0 + $0x11] ss:$2 sm:$0xff]  }
   0x2   :  { %v42_v1 = vld [vmem:[%s92_s0 + $0x21] ss:$2 sm:$0xff]   ;;  %17 = vrot.lane.b32.xlu0 %v39_v0, %s45_s10  ;;  %v37_v3 = vld [vmem:[%s92_s0 + $0x20] ss:$2 sm:$0xff]   ;;  %4 = vst.msk [vmem:[%s93_s1] sm:$0xff] %vm3_vm0, %v2_v2  }
   0x3   :  { %30 = vrot.lane.b32.xlu1 %v42_v1, %s45_s10  ;;  %38 = vst.msk [vmem:[%s93_s1 + $0x10] sm:$0xff] %vm3_vm0, %v37_v3   ;;  %v35_v5 = vld [vmem:[%s92_s0 + $0x10] ss:$2 sm:$0xff]  }
   0x4   :  { %36 = vst.msk [vmem:[%s93_s1 + $0x8] sm:$0xff] %vm3_vm0, %v35_v5  }
   0x6   :  { %23 = vrot.lane.b32.xlu0 %v40_v4, %s45_s10 }
  0x74   :  { %v18_v6 = vpop.permute.xlu0 %17  }
  0x75   :  { %v31_v7 = vpop.permute.xlu1 %30   ;;  %20 = vst.msk [vmem:[%s93_s1] sm:$0xff] %vm19_vm1, %v18_v6  }
  0x76   :  { %43 = vst.msk [vmem:[%s93_s1 + $0x10] sm:$0xff] %vm19_vm1, %v31_v7  }
  0x78   :  { %v24_v8 = vpop.permute.xlu0 %23  }
  0x79   :  { %41 = vst.msk [vmem:[%s93_s1 + $0x8] sm:$0xff] %vm19_vm1, %v24_v8  }

// kernel: image_forward.1
= control target key start
LH: loop header
LB: loop body
LE: loop exit
PB: predicated region body
PF: predicated region fallthrough
CT: control target
= control target key end

     0   :  { %vm1398_vm0 = vcmask 261120   ;;  %s9190_s0 = inlined_call_operand.vmem [shape: bf16[3072,32], index: 0, kind: input, shape index: {}]   ;;  %s9191_s1 = inlined_call_operand.vmem [shape: bf16[32,16], index: 1, kind: input, shape index: {}]   ;;  %s9192_s2 = inlined_call_operand.vmem [shape: f32[1,16], index: 2, kind: input, shape index: {}]   ;;  %s9193_s3 = inlined_call_operand.vmem [shape: bf16[48,3072], index: 3, kind: input, shape index: {}]   ;;  %s9194_s4 = inlined_call_operand.vmem [shape: bf16[16,32], index: 4, kind: input, shape index: {}]   ;;  %s9195_s5 = inlined_call_operand.vmem [shape: f32[1,32], index: 5, kind: input, shape index: {}]   ;;  %s9196_s6 = inlined_call_operand.vmem [shape: bf16[32,10], index: 6, kind: input, shape index: {}]   ;;  %s9197_s7 = inlined_call_operand.vmem [shape: f32[1,10], index: 7, kind: input, shape index: {}]   ;;  %s9198_s8 = inlined_call_operand.hbm [shape: f32[2,10], index: 8, kind: output, shape index: {}]  }
   0x1   :  { %v6928_v0 = vld [vmem:[%s9191_s1] sm:$0xff]   ;;  %v6929_v1 = vld [vmem:[%s9191_s1 + $0x8] sm:$0xff]   ;;  %v6932_v4 = vld [vmem:[%s9190_s0 + $0x10] sm:$0xff]  }
   0x2   :  { %6511 = vmatprep.subr.bf16.mxu0 %v6928_v0  ;;  %v6930_v2 = vld [vmem:[%s9190_s0] sm:$0xff]   ;;  %6921 = vmatprep.subr.bf16.mxu1 %v6928_v0  ;;  %v6931_v3 = vld [vmem:[%s9190_s0 + $0x8] sm:$0xff]   ;;  %v6933_v5 = vld [vmem:[%s9190_s0 + $0x18] sm:$0xff]  }
   0x3   :  { %6512 = vmatpush3.bf16.msra.mxu0 %v6928_v0  ;;  %6923 = vmatpush3.bf16.msra.mxu1 %v6928_v0  ;;  %v6934_v6 = vld [vmem:[%s9190_s0 + $0x20] sm:$0xff]   ;;  %v6935_v7 = vld [vmem:[%s9190_s0 + $0x28] sm:$0xff]   ;;  %v6936_v8 = vld [vmem:[%s9190_s0 + $0x30] sm:$0xff]  }
   0x4   :  { %6513 = vmatprep.subr.bf16.mxu0 %v6929_v1  ;;  %6515 = vmatprep.mubr.msk.bf16.mxu0 %vm1398_vm0, %v6930_v2  ;;  %v6937_v9 = vld [vmem:[%s9190_s0 + $0x38] sm:$0xff]   ;;  %v6938_v10 = vld [vmem:[%s9190_s0 + $0x40] sm:$0xff]   ;;  %v6939_v11 = vld [vmem:[%s9190_s0 + $0x48] sm:$0xff]  }
   0x5   :  { %6922 = vmatprep.subr.bf16.mxu1 %v6929_v1  ;;  %v6940_v12 = vld [vmem:[%s9190_s0 + $0x50] sm:$0xff]   ;;  %v6966_v13 = vld [vmem:[%s9190_s0 + $0x4a0] sm:$0xff]   ;;  %v6967_v14 = vld [vmem:[%s9190_s0 + $0x4a8] sm:$0xff]  }
   0x6   :  { %6811 = vmatprep.mubr.msk.bf16.mxu1 %vm1398_vm0, %v6966_v13  ;;  %v6970_v15 = vld [vmem:[%s9190_s0 + $0x4b0] sm:$0xff]   ;;  %v6941_v16 = vld [vmem:[%s9190_s0 + $0x58] sm:$0xff]   ;;  %v6974_v18 = vld [vmem:[%s9190_s0 + $0x4c0] sm:$0xff]  }
   0x7   :  { %6514 = vmatpush3.bf16.msra.mxu0 %v6929_v1  ;;  %6924 = vmatpush3.bf16.msra.mxu1 %v6929_v1  ;;  %v6971_v17 = vld [vmem:[%s9190_s0 + $0x4b8] sm:$0xff]   ;;  %v6942_v19 = vld [vmem:[%s9190_s0 + $0x60] sm:$0xff]   ;;  %v6943_v20 = vld [vmem:[%s9190_s0 + $0x68] sm:$0xff]  }
   0x8   :  { %v6975_v21 = vld [vmem:[%s9190_s0 + $0x4c8] sm:$0xff]   ;;  %v6978_v22 = vld [vmem:[%s9190_s0 + $0x4d0] sm:$0xff]   ;;  %v6945_v24 = vld [vmem:[%s9190_s0 + $0x78] sm:$0xff]  }
   0x9   :  { %v6944_v23 = vld [vmem:[%s9190_s0 + $0x70] sm:$0xff]   ;;  %v6979_v25 = vld [vmem:[%s9190_s0 + $0x4d8] sm:$0xff]   ;;  %v6946_v26 = vld [vmem:[%s9190_s0 + $0x80] sm:$0xff]  }
   0xa   :  { %6516 = vmatmul.mubr.msk.bf16.vlgmr.msra.gmra.mrb[0].mxu0 %vm1398_vm0, %v6931_v3  ;;  %6812 = vmatmul.mubr.msk.bf16.vlgmr.msra.gmra.mrb[0].mxu1 %vm1398_vm0, %v6967_v14  ;;  %v6982_v27 = vld [vmem:[%s9190_s0 + $0x4e0] sm:$0xff]   ;;  %v6983_v28 = vld [vmem:[%s9190_s0 + $0x4e8] sm:$0xff]   ;;  %v6986_v30 = vld [vmem:[%s9190_s0 + $0x4f0] sm:$0xff]  }
   0xb   :  { %6519 = vmatprep.mubr.msk.bf16.mxu0 %vm1398_vm0, %v6932_v4  ;;  %6815 = vmatprep.mubr.msk.bf16.mxu1 %vm1398_vm0, %v6970_v15  ;;  %v6947_v29 = vld [vmem:[%s9190_s0 + $0x88] sm:$0xff]   ;;  %v6948_v31 = vld [vmem:[%s9190_s0 + $0x90] sm:$0xff]   ;;  %v6987_v32 = vld [vmem:[%s9190_s0 + $0x4f8] sm:$0xff]  }
   0xc   :  { %v6949_v33 = vld [vmem:[%s9190_s0 + $0x98] sm:$0xff]   ;;  %v6990_v34 = vld [vmem:[%s9190_s0 + $0x500] sm:$0xff]   ;;  %v6991_v36 = vld [vmem:[%s9190_s0 + $0x508] sm:$0xff]  }
   0xd   :  { %v6950_v35 = vld [vmem:[%s9190_s0 + $0xa0] sm:$0xff]   ;;  %v6951_v37 = vld [vmem:[%s9190_s0 + $0xa8] sm:$0xff]   ;;  %v6994_v38 = vld [vmem:[%s9190_s0 + $0x510] sm:$0xff]  }
   0xe   :  { %v6952_v39 = vld [vmem:[%s9190_s0 + $0xb0] sm:$0xff]   ;;  %v6953_v40 = vld [vmem:[%s9190_s0 + $0xb8] sm:$0xff]   ;;  %v6998_v42 = vld [vmem:[%s9190_s0 + $0x520] sm:$0xff]  }
   0xf   :  { %v6995_v41 = vld [vmem:[%s9190_s0 + $0x518] sm:$0xff]   ;;  %v6954_v43 = vld [vmem:[%s9190_s0 + $0xc0] sm:$0xff]   ;;  %v6955_v44 = vld [vmem:[%s9190_s0 + $0xc8] sm:$0xff]  }
  0x10   :  { %v6999_v45 = vld [vmem:[%s9190_s0 + $0x528] sm:$0xff]   ;;  %v7002_v46 = vld [vmem:[%s9190_s0 + $0x530] sm:$0xff]   ;;  %v6957_v48 = vld [vmem:[%s9190_s0 + $0xd8] sm:$0xff]  }
  0x11   :  { %v6956_v47 = vld [vmem:[%s9190_s0 + $0xd0] sm:$0xff]   ;;  %v7003_v49 = vld [vmem:[%s9190_s0 + $0x538] sm:$0xff]   ;;  %v7006_v50 = vld [vmem:[%s9190_s0 + $0x540] sm:$0xff]  }
  0x12   :  { %6520 = vmatmul.mubr.msk.bf16.gmra.mrb[4].mxu0 %vm1398_vm0, %v6933_v5  ;;  %6816 = vmatmul.mubr.msk.bf16.gmra.mrb[4].mxu1 %vm1398_vm0, %v6971_v17  ;;  %v6958_v51 = vld [vmem:[%s9190_s0 + $0xe0] sm:$0xff]   ;;  %v6959_v52 = vld [vmem:[%s9190_s0 + $0xe8] sm:$0xff]   ;;  %v7010_v54 = vld [vmem:[%s9190_s0 + $0x550] sm:$0xff]  }
  0x13   :  { %6523 = vmatprep.mubr.msk.bf16.mxu0 %vm1398_vm0, %v6934_v6  ;;  %6819 = vmatprep.mubr.msk.bf16.mxu1 %vm1398_vm0, %v6974_v18  ;;  %v7007_v53 = vld [vmem:[%s9190_s0 + $0x548] sm:$0xff]   ;;  %v6960_v55 = vld [vmem:[%s9190_s0 + $0xf0] sm:$0xff]   ;;  %v6961_v56 = vld [vmem:[%s9190_s0 + $0xf8] sm:$0xff]  }
  0x14   :  { %v7011_v57 = vld [vmem:[%s9190_s0 + $0x558] sm:$0xff]   ;;  %v7014_v58 = vld [vmem:[%s9190_s0 + $0x560] sm:$0xff]   ;;  %v6963_v60 = vld [vmem:[%s9190_s0 + $0x108] sm:$0xff]  }
  0x15   :  { %v6962_v59 = vld [vmem:[%s9190_s0 + $0x100] sm:$0xff]   ;;  %v7015_v61 = vld [vmem:[%s9190_s0 + $0x568] sm:$0xff]   ;;  %v7018_v62 = vld [vmem:[%s9190_s0 + $0x570] sm:$0xff]  }
  0x16   :  { %v6964_v63 = vld [vmem:[%s9190_s0 + $0x110] sm:$0xff]   ;;  %v6965_v0 = vld [vmem:[%s9190_s0 + $0x118] sm:$0xff]   ;;  %v7022_v2 = vld [vmem:[%s9190_s0 + $0x580] sm:$0xff]  }
  0x17   :  { %v7019_v1 = vld [vmem:[%s9190_s0 + $0x578] sm:$0xff]   ;;  %v6968_v3 = vld [vmem:[%s9190_s0 + $0x120] sm:$0xff]   ;;  %v6969_v4 = vld [vmem:[%s9190_s0 + $0x128] sm:$0xff]  }
  0x18   :  { %v7023_v5 = vld [vmem:[%s9190_s0 + $0x588] sm:$0xff]   ;;  %v7026_v6 = vld [vmem:[%s9190_s0 + $0x590] sm:$0xff]  }
  0x19   :  { %v7031_v13 = vld [vmem:[%s9190_s0 + $0x5a8] sm:$0xff]   ;;  %v7034_v14 = vld [vmem:[%s9190_s0 + $0x5b0] sm:$0xff]  }
  0x1a   :  { %6524 = vmatmul.mubr.msk.bf16.gmra.mrb[8].mxu0 %vm1398_vm0, %v6935_v7  ;;  %6820 = vmatmul.mubr.msk.bf16.gmra.mrb[8].mxu1 %vm1398_vm0, %v6975_v21  ;;  %v6972_v7 = vld [vmem:[%s9190_s0 + $0x130] sm:$0xff]  }
  0x1b   :  { %6527 = vmatprep.mubr.msk.bf16.mxu0 %vm1398_vm0, %v6936_v8  ;;  %6823 = vmatprep.mubr.msk.bf16.mxu1 %vm1398_vm0, %v6978_v22  ;;  %v6973_v8 = vld [vmem:[%s9190_s0 + $0x138] sm:$0xff]   ;;  %v6980_v15 = vld [vmem:[%s9190_s0 + $0x150] sm:$0xff]  }
  0x22   :  { %6528 = vmatmul.mubr.msk.bf16.gmra.mrb[12].mxu0 %vm1398_vm0, %v6937_v9  ;;  %6824 = vmatmul.mubr.msk.bf16.gmra.mrb[12].mxu1 %vm1398_vm0, %v6979_v25  ;;  %v7027_v9 = vld [vmem:[%s9190_s0 + $0x598] sm:$0xff]  }
  0x23   :  { %6531 = vmatprep.mubr.msk.bf16.mxu0 %vm1398_vm0, %v6938_v10  ;;  %6827 = vmatprep.mubr.msk.bf16.mxu1 %vm1398_vm0, %v6982_v27  ;;  %v7030_v10 = vld [vmem:[%s9190_s0 + $0x5a0] sm:$0xff]  }
  0x2a   :  { %6532 = vmatmul.mubr.msk.bf16.gmra.mrb[16].mxu0 %vm1398_vm0, %v6939_v11  ;;  %6828 = vmatmul.mubr.msk.bf16.gmra.mrb[16].mxu1 %vm1398_vm0, %v6983_v28  ;;  %v6976_v11 = vld [vmem:[%s9190_s0 + $0x140] sm:$0xff]  }
  0x2b   :  { %6535 = vmatprep.mubr.msk.bf16.mxu0 %vm1398_vm0, %v6940_v12  ;;  %6831 = vmatprep.mubr.msk.bf16.mxu1 %vm1398_vm0, %v6986_v30  ;;  %v6977_v12 = vld [vmem:[%s9190_s0 + $0x148] sm:$0xff]  }
  0x32   :  { %6536 = vmatmul.mubr.msk.bf16.gmra.mrb[20].mxu0 %vm1398_vm0, %v6941_v16  ;;  %6832 = vmatmul.mubr.msk.bf16.gmra.mrb[20].mxu1 %vm1398_vm0, %v6987_v32 }
  0x33   :  { %6539 = vmatprep.mubr.msk.bf16.mxu0 %vm1398_vm0, %v6942_v19  ;;  %6835 = vmatprep.mubr.msk.bf16.mxu1 %vm1398_vm0, %v6990_v34 }
  0x3a   :  { %6540 = vmatmul.mubr.msk.bf16.gmra.mrb[24].mxu0 %vm1398_vm0, %v6943_v20  ;;  %6836 = vmatmul.mubr.msk.bf16.gmra.mrb[24].mxu1 %vm1398_vm0, %v6991_v36 }
  0x3b   :  { %6543 = vmatprep.mubr.msk.bf16.mxu0 %vm1398_vm0, %v6944_v23  ;;  %6839 = vmatprep.mubr.msk.bf16.mxu1 %vm1398_vm0, %v6994_v38 }
  0x42   :  { %6544 = vmatmul.mubr.msk.bf16.gmra.mrb[28].mxu0 %vm1398_vm0, %v6945_v24  ;;  %6840 = vmatmul.mubr.msk.bf16.gmra.mrb[28].mxu1 %vm1398_vm0, %v6995_v41 }
  0x43   :  { %6547 = vmatprep.mubr.msk.bf16.mxu0 %vm1398_vm0, %v6946_v26  ;;  %6843 = vmatprep.mubr.msk.bf16.mxu1 %vm1398_vm0, %v6998_v42 }
  0x4a   :  { %6548 = vmatmul.mubr.msk.bf16.gmra.mrb[32].mxu0 %vm1398_vm0, %v6947_v29  ;;  %6844 = vmatmul.mubr.msk.bf16.gmra.mrb[32].mxu1 %vm1398_vm0, %v6999_v45 }
  0x4b   :  { %6551 = vmatprep.mubr.msk.bf16.mxu0 %vm1398_vm0, %v6948_v31  ;;  %6847 = vmatprep.mubr.msk.bf16.mxu1 %vm1398_vm0, %v7002_v46 }
  0x52   :  { %6552 = vmatmul.mubr.msk.bf16.gmra.mrb[36].mxu0 %vm1398_vm0, %v6949_v33  ;;  %6848 = vmatmul.mubr.msk.bf16.gmra.mrb[36].mxu1 %vm1398_vm0, %v7003_v49 }
  0x53   :  { %6555 = vmatprep.mubr.msk.bf16.mxu0 %vm1398_vm0, %v6950_v35  ;;  %6851 = vmatprep.mubr.msk.bf16.mxu1 %vm1398_vm0, %v7006_v50 }
  0x5a   :  { %6556 = vmatmul.mubr.msk.bf16.gmra.mrb[40].mxu0 %vm1398_vm0, %v6951_v37  ;;  %6852 = vmatmul.mubr.msk.bf16.gmra.mrb[40].mxu1 %vm1398_vm0, %v7007_v53 }
  0x5b   :  { %6559 = vmatprep.mubr.msk.bf16.mxu0 %vm1398_vm0, %v6952_v39  ;;  %6855 = vmatprep.mubr.msk.bf16.mxu1 %vm1398_vm0, %v7010_v54 }
  0x62   :  { %6560 = vmatmul.mubr.msk.bf16.gmra.mrb[44].mxu0 %vm1398_vm0, %v6953_v40  ;;  %6856 = vmatmul.mubr.msk.bf16.gmra.mrb[44].mxu1 %vm1398_vm0, %v7011_v57 }
  0x63   :  { %6563 = vmatprep.mubr.msk.bf16.mxu0 %vm1398_vm0, %v6954_v43  ;;  %6859 = vmatprep.mubr.msk.bf16.mxu1 %vm1398_vm0, %v7014_v58 }
  0x6a   :  { %6564 = vmatmul.mubr.msk.bf16.gmra.mrb[48].mxu0 %vm1398_vm0, %v6955_v44  ;;  %6860 = vmatmul.mubr.msk.bf16.gmra.mrb[48].mxu1 %vm1398_vm0, %v7015_v61 }
  0x6b   :  { %6567 = vmatprep.mubr.msk.bf16.mxu0 %vm1398_vm0, %v6956_v47  ;;  %6863 = vmatprep.mubr.msk.bf16.mxu1 %vm1398_vm0, %v7018_v62 }
  0x72   :  { %6568 = vmatmul.mubr.msk.bf16.gmra.mrb[52].mxu0 %vm1398_vm0, %v6957_v48  ;;  %6864 = vmatmul.mubr.msk.bf16.gmra.mrb[52].mxu1 %vm1398_vm0, %v7019_v1 }
  0x73   :  { %6571 = vmatprep.mubr.msk.bf16.mxu0 %vm1398_vm0, %v6958_v51  ;;  %6867 = vmatprep.mubr.msk.bf16.mxu1 %vm1398_vm0, %v7022_v2 }
  0x7a   :  { %6572 = vmatmul.mubr.msk.bf16.gmra.mrb[56].mxu0 %vm1398_vm0, %v6959_v52  ;;  %6868 = vmatmul.mubr.msk.bf16.gmra.mrb[56].mxu1 %vm1398_vm0, %v7023_v5 }
  0x7b   :  { %6575 = vmatprep.mubr.msk.bf16.mxu0 %vm1398_vm0, %v6960_v55  ;;  %6871 = vmatprep.mubr.msk.bf16.mxu1 %vm1398_vm0, %v7026_v6 }
  0x82   :  { %6576 = vmatmul.mubr.msk.bf16.gmra.mrb[60].mxu0 %vm1398_vm0, %v6961_v56  ;;  %6872 = vmatmul.mubr.msk.bf16.gmra.mrb[60].mxu1 %vm1398_vm0, %v7027_v9 }
  0x83   :  { %6579 = vmatprep.mubr.msk.bf16.mxu0 %vm1398_vm0, %v6962_v59  ;;  %6875 = vmatprep.mubr.msk.bf16.mxu1 %vm1398_vm0, %v7030_v10 }
  0x8a   :  { %6580 = vmatmul.mubr.msk.bf16.gmra.mrb[64].mxu0 %vm1398_vm0, %v6963_v60  ;;  %6876 = vmatmul.mubr.msk.bf16.gmra.mrb[64].mxu1 %vm1398_vm0, %v7031_v13 }
  0x8b   :  { %6583 = vmatprep.mubr.msk.bf16.mxu0 %vm1398_vm0, %v6964_v63 }
  0x92   :  { %6584 = vmatmul.mubr.msk.bf16.gmra.mrb[68].mxu0 %vm1398_vm0, %v6965_v0 }
  0x93   :  { %6587 = vmatprep.mubr.msk.bf16.mxu0 %vm1398_vm0, %v6968_v3 }
  0x9a   :  { %6588 = vmatmul.mubr.msk.bf16.gmra.mrb[72].mxu0 %vm1398_vm0, %v6969_v4 }
  0x9b   :  { %6591 = vmatprep.mubr.msk.bf16.mxu0 %vm1398_vm0, %v6972_v7 }
  0xa2   :  { %6592 = vmatmul.mubr.msk.bf16.gmra.mrb[76].mxu0 %vm1398_vm0, %v6973_v8 }
  0xa3   :  { %6595 = vmatprep.mubr.msk.bf16.mxu0 %vm1398_vm0, %v6976_v11 }
  0xa4   :  { %13 = vsyncpa [#allocation3], 0  ;;  %6879 = vmatprep.mubr.msk.bf16.mxu1 %vm1398_vm0, %v7034_v14  ;;  %v7035_v16 = vld [vmem:[%s9190_s0 + $0x5b8] sm:$0xff]   ;;  %v7038_v18 = vld [vmem:[%s9190_s0 + $0x5c0] sm:$0xff]   ;;  %vm7153_vm1 = vmmov 0   ;;  %vm5254_vm2 = vcmask 130048  }
  0xa5   :  { %v6981_v17 = vld [vmem:[%s9190_s0 + $0x158] sm:$0xff]   ;;  %v6984_v19 = vld [vmem:[%s9190_s0 + $0x160] sm:$0xff]   ;;  %6880 = vmatmul.mubr.msk.bf16.gmra.mrb[68].mxu1 %vm1398_vm0, %v7035_v16  ;;  %v7039_v20 = vld [vmem:[%s9190_s0 + $0x5c8] sm:$0xff]   ;;  %vm5349_vm3 = vcmask 1040384   ;;  %s7154_s14 = smov [#allocation2]   ;;  %vm5418_vm4 = vcmask 74752  }
  0xa6   :  { %6883 = vmatprep.mubr.msk.bf16.mxu1 %vm1398_vm0, %v7038_v18  ;;  %v6985_v21 = vld [vmem:[%s9190_s0 + $0x168] sm:$0xff]   ;;  %v7042_v22 = vld [vmem:[%s9190_s0 + $0x5d0] sm:$0xff]   ;;  %v7043_v24 = vld [vmem:[%s9190_s0 + $0x5d8] sm:$0xff]  }
  0xa7   :  { %v6988_v23 = vld [vmem:[%s9190_s0 + $0x170] sm:$0xff]   ;;  %v6989_v25 = vld [vmem:[%s9190_s0 + $0x178] sm:$0xff]   ;;  %v7046_v26 = vld [vmem:[%s9190_s0 + $0x5e0] sm:$0xff]  }
  0xa8   :  { %v6992_v27 = vld [vmem:[%s9190_s0 + $0x180] sm:$0xff]   ;;  %v7047_v30 = vld [vmem:[%s9190_s0 + $0x5e8] sm:$0xff]   ;;  %v7050_v32 = vld [vmem:[%s9190_s0 + $0x5f0] sm:$0xff]  }
  0xa9   :  { %v7569_v28 = vld [vmem:[%s9193_s3] sm:$0xff]  ;;  %v6993_v31 = vld [vmem:[%s9190_s0 + $0x188] sm:$0xff]   ;;  %v6996_v34 = vld [vmem:[%s9190_s0 + $0x190] sm:$0xff]  }
  0xaa   :  { %6596 = vmatmul.mubr.msk.bf16.gmra.mrb[80].mxu0 %vm1398_vm0, %v6977_v12  ;;  %v7574_v29 = vld [vmem:[%s9193_s3 + $0x60] sm:$0xff]  ;;  %v7051_v35 = vld [vmem:[%s9190_s0 + $0x5f8] sm:$0xff]   ;;  %v7001_v39 = vld [vmem:[%s9190_s0 + $0x1a8] sm:$0xff]  }
  0xab   :  { %6599 = vmatprep.mubr.msk.bf16.mxu0 %vm1398_vm0, %v6980_v15  ;;  %v5821_v33 = vcombine.low %v7569_v28, %v7574_v29  ;;  %v6997_v36 = vld [vmem:[%s9190_s0 + $0x198] sm:$0xff]   ;;  %v5822_v37 = vcombine.high %v7569_v28, %v7574_v29  ;;  %v7000_v38 = vld [vmem:[%s9190_s0 + $0x1a0] sm:$0xff]   ;;  %v7004_v40 = vld [vmem:[%s9190_s0 + $0x1b0] sm:$0xff]  }
  0xac   :  { %v7618_v41 = vld [vmem:[%s9192_s2] ss:$0 sm:$0xff]  ;;  %v7005_v45 = vld [vmem:[%s9190_s0 + $0x1b8] sm:$0xff]   ;;  %v7009_v61 = vld [vmem:[%s9190_s0 + $0x1c8] sm:$0xff]  }
  0xad   :  { %6884 = vmatmul.mubr.msk.bf16.gmra.mrb[72].mxu1 %vm1398_vm0, %v7039_v20  ;;  %v7008_v48 = vld [vmem:[%s9190_s0 + $0x1c0] sm:$0xff]   ;;  %v7012_v0 = vld [vmem:[%s9190_s0 + $0x1d0] sm:$0xff]   ;;  %v7013_v13 = vld [vmem:[%s9190_s0 + $0x1d8] sm:$0xff]  }
  0xae   :  { %6887 = vmatprep.mubr.msk.bf16.mxu1 %vm1398_vm0, %v7042_v22  ;;  %v7016_v16 = vld [vmem:[%s9190_s0 + $0x1e0] sm:$0xff]  }
  0xb2   :  { %6600 = vmatmul.mubr.msk.bf16.gmra.mrb[84].mxu0 %vm1398_vm0, %v6981_v17 }
  0xb3   :  { %6603 = vmatprep.mubr.msk.bf16.mxu0 %vm1398_vm0, %v6984_v19 }
  0xb5   :  { %6888 = vmatmul.mubr.msk.bf16.gmra.mrb[76].mxu1 %vm1398_vm0, %v7043_v24 }
  0xb6   :  { %6891 = vmatprep.mubr.msk.bf16.mxu1 %vm1398_vm0, %v7046_v26 }
  0xba   :  { %6604 = vmatmul.mubr.msk.bf16.gmra.mrb[88].mxu0 %vm1398_vm0, %v6985_v21 }
  0xbb   :  { %6607 = vmatprep.mubr.msk.bf16.mxu0 %vm1398_vm0, %v6988_v23 }
  0xbd   :  { %6892 = vmatmul.mubr.msk.bf16.gmra.mrb[80].mxu1 %vm1398_vm0, %v7047_v30 }
  0xbe   :  { %6895 = vmatprep.mubr.msk.bf16.mxu1 %vm1398_vm0, %v7050_v32 }
  0xc2   :  { %6608 = vmatmul.mubr.msk.bf16.gmra.mrb[92].mxu0 %vm1398_vm0, %v6989_v25 }
  0xc3   :  { %6611 = vmatprep.mubr.msk.bf16.mxu0 %vm1398_vm0, %v6992_v27 }
  0xc5   :  { %6896 = vmatmul.mubr.msk.bf16.gmra.mrb[84].mxu1 %vm1398_vm0, %v7051_v35  ;;  %v7020_v35 = vld [vmem:[%s9190_s0 + $0x1f0] sm:$0xff]  }
  0xc6   :  { %4584 = vmatprep.mubr.bf16.mxu1 %v5822_v37 }
  0xca   :  { %6612 = vmatmul.mubr.msk.bf16.gmra.mrb[96].mxu0 %vm1398_vm0, %v6993_v31  ;;  %v7017_v31 = vld [vmem:[%s9190_s0 + $0x1e8] sm:$0xff]  }
  0xcb   :  { %6615 = vmatprep.mubr.msk.bf16.mxu0 %vm1398_vm0, %v6996_v34 }
  0xd2   :  { %6616 = vmatmul.mubr.msk.bf16.gmra.mrb[100].mxu0 %vm1398_vm0, %v6997_v36 }
  0xd3   :  { %6619 = vmatprep.mubr.msk.bf16.mxu0 %vm1398_vm0, %v7000_v38 }
  0xda   :  { %6620 = vmatmul.mubr.msk.bf16.gmra.mrb[104].mxu0 %vm1398_vm0, %v7001_v39 }
  0xdb   :  { %6623 = vmatprep.mubr.msk.bf16.mxu0 %vm1398_vm0, %v7004_v40 }
  0xdd   :  { %v6517_v42 = vpop.f32.mrb[0].mxu0 }
  0xde   :  { %v2018_v43 = vadd.f32 %v6517_v42, %v7618_v41  ;;  %v2009_v44 = vpop.f32.mrb[1].mxu0 }
  0xdf   :  { %v2010_v46 = vadd.f32 %v7618_v41, %v2009_v44  ;;  %v6518_v47 = vpop.f32.mrb[2].mxu0 }
  0xe0   :  { %v2021_v49 = vadd.f32 %v6518_v47, %v7618_v41  ;;  %v2012_v50 = vpop.f32.mrb[3].mxu0  ;;  %v3546_v52 = vmax.f32 %v2018_v43, 0.0 }
  0xe1   :  { %v2013_v51 = vadd.f32 %v7618_v41, %v2012_v50  ;;  %v3544_v54 = vmax.f32 %v2010_v46, 0.0 }
  0xe2   :  { %v3547_v53 = vmax.f32 %v2021_v49, 0.0  ;;  %6624 = vmatmul.mubr.msk.bf16.gmra.mrb[108].mxu0 %vm1398_vm0, %v7005_v45  ;;  %v7021_v49 = vld [vmem:[%s9190_s0 + $0x1f8] sm:$0xff]  }
  0xe3   :  { %v3545_v55 = vmax.f32 %v2013_v51, 0.0  ;;  %6627 = vmatprep.mubr.msk.bf16.mxu0 %vm1398_vm0, %v7008_v48 }
  0xe4   :  { %v7633_v56 = vpack.c.bf16 %v3547_v53, %v3546_v52  ;;  %v7024_v52 = vld [vmem:[%s9190_s0 + $0x200] sm:$0xff]  }
  0xe5   :  { %v7635_v57 = vpack.c.bf16 %v3545_v55, %v3544_v54  ;;  %v6521_v58 = vpop.f32.mrb[4].mxu0 }
  0xe6   :  { %v2034_v59 = vadd.f32 %v6521_v58, %v7618_v41  ;;  %v2025_v60 = vpop.f32.mrb[5].mxu0 }
  0xe7   :  { %v2026_v62 = vadd.f32 %v7618_v41, %v2025_v60  ;;  %v6522_v63 = vpop.f32.mrb[6].mxu0 }
  0xe8   :  { %v2037_v1 = vadd.f32 %v6522_v63, %v7618_v41  ;;  %v2028_v2 = vpop.f32.mrb[7].mxu0  ;;  %v3550_v4 = vmax.f32 %v2034_v59, 0.0 }
  0xe9   :  { %v2029_v3 = vadd.f32 %v7618_v41, %v2028_v2  ;;  %v3548_v6 = vmax.f32 %v2026_v62, 0.0 }
  0xea   :  { %v3551_v5 = vmax.f32 %v2037_v1, 0.0  ;;  %6628 = vmatmul.mubr.msk.bf16.gmra.mrb[112].mxu0 %vm1398_vm0, %v7009_v61 }
  0xeb   :  { %v3549_v7 = vmax.f32 %v2029_v3, 0.0  ;;  %6631 = vmatprep.mubr.msk.bf16.mxu0 %vm1398_vm0, %v7012_v0  ;;  %v7025_v3 = vld [vmem:[%s9190_s0 + $0x208] sm:$0xff]  }
  0xec   :  { %v7649_v8 = vpack.c.bf16 %v3551_v5, %v3550_v4 }
  0xed   :  { %v7651_v9 = vpack.c.bf16 %v3549_v7, %v3548_v6  ;;  %v6525_v10 = vpop.f32.mrb[8].mxu0  ;;  %v7028_v6 = vld [vmem:[%s9190_s0 + $0x210] sm:$0xff]  }
  0xee   :  { %v2050_v11 = vadd.f32 %v6525_v10, %v7618_v41  ;;  %v2041_v12 = vpop.f32.mrb[9].mxu0 }
  0xef   :  { %v2042_v14 = vadd.f32 %v7618_v41, %v2041_v12  ;;  %v6526_v15 = vpop.f32.mrb[10].mxu0 }
  0xf0   :  { %v2053_v17 = vadd.f32 %v6526_v15, %v7618_v41  ;;  %v2044_v18 = vpop.f32.mrb[11].mxu0  ;;  %v3554_v20 = vmax.f32 %v2050_v11, 0.0 }
  0xf1   :  { %v2045_v19 = vadd.f32 %v7618_v41, %v2044_v18  ;;  %v3552_v22 = vmax.f32 %v2042_v14, 0.0 }
  0xf2   :  { %v3555_v21 = vmax.f32 %v2053_v17, 0.0  ;;  %6632 = vmatmul.mubr.msk.bf16.gmra.mrb[116].mxu0 %vm1398_vm0, %v7013_v13 }
  0xf3   :  { %v3553_v23 = vmax.f32 %v2045_v19, 0.0  ;;  %6635 = vmatprep.mubr.msk.bf16.mxu0 %vm1398_vm0, %v7016_v16 }
  0xf4   :  { %v7665_v24 = vpack.c.bf16 %v3555_v21, %v3554_v20 }
  0xf5   :  { %v7667_v25 = vpack.c.bf16 %v3553_v23, %v3552_v22  ;;  %v6529_v26 = vpop.f32.mrb[12].mxu0  ;;  %v7032_v23 = vld [vmem:[%s9190_s0 + $0x220] sm:$0xff]  }
  0xf6   :  { %v2066_v27 = vadd.f32 %v6529_v26, %v7618_v41  ;;  %v2057_v30 = vpop.f32.mrb[13].mxu0 }
  0xf7   :  { %v2058_v32 = vadd.f32 %v7618_v41, %v2057_v30  ;;  %v6530_v34 = vpop.f32.mrb[14].mxu0 }
  0xf8   :  { %v2069_v36 = vadd.f32 %v6530_v34, %v7618_v41  ;;  %v2060_v37 = vpop.f32.mrb[15].mxu0  ;;  %v3558_v39 = vmax.f32 %v2066_v27, 0.0 }
  0xf9   :  { %v2061_v38 = vadd.f32 %v7618_v41, %v2060_v37  ;;  %v3556_v42 = vmax.f32 %v2058_v32, 0.0 }
  0xfa   :  { %v3559_v40 = vmax.f32 %v2069_v36, 0.0  ;;  %6636 = vmatmul.mubr.msk.bf16.gmra.mrb[120].mxu0 %vm1398_vm0, %v7017_v31 }
  0xfb   :  { %v3557_v43 = vmax.f32 %v2061_v38, 0.0  ;;  %6639 = vmatprep.mubr.msk.bf16.mxu0 %vm1398_vm0, %v7020_v35 }
  0xfc   :  { %v7681_v44 = vpack.c.bf16 %v3559_v40, %v3558_v39 }
  0xfd   :  { %v7683_v45 = vpack.c.bf16 %v3557_v43, %v3556_v42  ;;  %v6533_v46 = vpop.f32.mrb[16].mxu0  ;;  %v7036_v43 = vld [vmem:[%s9190_s0 + $0x230] sm:$0xff]  }
  0xfe   :  { %v2082_v47 = vadd.f32 %v6533_v46, %v7618_v41  ;;  %v2073_v48 = vpop.f32.mrb[17].mxu0 }
  0xff   :  { %v2074_v50 = vadd.f32 %v7618_v41, %v2073_v48  ;;  %v6534_v51 = vpop.f32.mrb[18].mxu0 }
 0x100   :  { %v2085_v53 = vadd.f32 %v6534_v51, %v7618_v41  ;;  %v2076_v54 = vpop.f32.mrb[19].mxu0  ;;  %v3562_v58 = vmax.f32 %v2082_v47, 0.0 }
 0x101   :  { %v2077_v55 = vadd.f32 %v7618_v41, %v2076_v54  ;;  %v3560_v60 = vmax.f32 %v2074_v50, 0.0 }
 0x102   :  { %v3563_v59 = vmax.f32 %v2085_v53, 0.0  ;;  %6640 = vmatmul.mubr.msk.bf16.gmra.mrb[124].mxu0 %vm1398_vm0, %v7021_v49 }
 0x103   :  { %v3561_v61 = vmax.f32 %v2077_v55, 0.0  ;;  %6643 = vmatprep.mubr.msk.bf16.mxu0 %vm1398_vm0, %v7024_v52 }
 0x104   :  { %v4009_v62 = vpack.c.bf16 %v3563_v59, %v3562_v58 }
 0x105   :  { %v6537_v63 = vpop.f32.mrb[20].mxu0  ;;  %v4008_v0 = vpack.c.bf16 %v3561_v61, %v3560_v60  ;;  %v7040_v61 = vld [vmem:[%s9190_s0 + $0x240] sm:$0xff]  }
 0x106   :  { %v2098_v1 = vadd.f32 %v6537_v63, %v7618_v41  ;;  %v2089_v2 = vpop.f32.mrb[21].mxu0 }
 0x107   :  { %v2090_v4 = vadd.f32 %v7618_v41, %v2089_v2  ;;  %v6538_v5 = vpop.f32.mrb[22].mxu0  ;;  %6096 = vmatprep.subr.bf16.mxu1 %v4008_v0  ;;  %v3952_v0 = vld [vmem:[%s9193_s3 + $0xc0] sm:$0xff] }
 0x108   :  { %v2101_v7 = vadd.f32 %v6538_v5, %v7618_v41  ;;  %v2092_v10 = vpop.f32.mrb[23].mxu0  ;;  %6097 = vmatpush3.bf16.msra.mxu1 %v7635_v57  ;;  %v3566_v12 = vmax.f32 %v2098_v1, 0.0  ;;  %v7029_v57 = vld [vmem:[%s9190_s0 + $0x218] sm:$0xff]   ;;  %v3964_v1 = vld [vmem:[%s9193_s3 + $0x120] sm:$0xff] }
 0x109   :  { %v2093_v11 = vadd.f32 %v7618_v41, %v2092_v10  ;;  %6098 = vmatprep.subr.bf16.mxu1 %v4009_v62  ;;  %v3564_v14 = vmax.f32 %v2090_v4, 0.0 }
 0x10a   :  { %v3567_v13 = vmax.f32 %v2101_v7, 0.0  ;;  %6644 = vmatmul.mubr.msk.bf16.gmra.mrb[128].mxu0 %vm1398_vm0, %v7025_v3 }
 0x10b   :  { %v3565_v15 = vmax.f32 %v2093_v11, 0.0  ;;  %6647 = vmatprep.mubr.msk.bf16.mxu0 %vm1398_vm0, %v7028_v6  ;;  %v5846_v6 = vcombine.high %v3952_v0, %v3964_v1 }
 0x10c   :  { %6099 = vmatpush3.bf16.msra.mxu1 %v7633_v56  ;;  %v4011_v16 = vpack.c.bf16 %v3567_v13, %v3566_v12  ;;  %v7041_v13 = vld [vmem:[%s9190_s0 + $0x248] sm:$0xff]  }
 0x10d   :  { %v6541_v17 = vpop.f32.mrb[24].mxu0  ;;  %v4010_v18 = vpack.c.bf16 %v3565_v15, %v3564_v14 }
 0x10e   :  { %v2114_v19 = vadd.f32 %v6541_v17, %v7618_v41  ;;  %v2105_v20 = vpop.f32.mrb[25].mxu0 }
 0x10f   :  { %v2106_v21 = vadd.f32 %v7618_v41, %v2105_v20  ;;  %v6542_v22 = vpop.f32.mrb[26].mxu0  ;;  %6100 = vmatprep.subr.bf16.mxu1 %v4010_v18  ;;  %v3988_v20 = vld [vmem:[%s9193_s3 + $0x1e0] sm:$0xff] }
 0x110   :  { %v2117_v56 = vadd.f32 %v6542_v22, %v7618_v41  ;;  %v2108_v26 = vpop.f32.mrb[27].mxu0  ;;  %6101 = vmatpush3.bf16.msra.mxu1 %v7651_v9  ;;  %v3570_v30 = vmax.f32 %v2114_v19, 0.0  ;;  %v7033_v9 = vld [vmem:[%s9190_s0 + $0x228] sm:$0xff]   ;;  %v3976_v19 = vld [vmem:[%s9193_s3 + $0x180] sm:$0xff] }
 0x111   :  { %v2109_v27 = vadd.f32 %v7618_v41, %v2108_v26  ;;  %6102 = vmatprep.subr.bf16.mxu1 %v4011_v16  ;;  %v3568_v32 = vmax.f32 %v2106_v21, 0.0  ;;  %v7044_v16 = vld [vmem:[%s9190_s0 + $0x250] sm:$0xff]  }
 0x112   :  { %v3571_v31 = vmax.f32 %v2117_v56, 0.0  ;;  %6648 = vmatmul.mubr.msk.bf16.gmra.mrb[132].mxu0 %vm1398_vm0, %v7029_v57 }
 0x113   :  { %v3569_v34 = vmax.f32 %v2109_v27, 0.0  ;;  %6651 = vmatprep.mubr.msk.bf16.mxu0 %vm1398_vm0, %v7032_v23  ;;  %v5870_v23 = vcombine.high %v3976_v19, %v3988_v20 }
 0x114   :  { %6103 = vmatpush3.bf16.msra.mxu1 %v7649_v8  ;;  %v4013_v35 = vpack.c.bf16 %v3571_v31, %v3570_v30  ;;  %v7045_v31 = vld [vmem:[%s9190_s0 + $0x258] sm:$0xff]  }
 0x115   :  { %v6545_v36 = vpop.f32.mrb[28].mxu0  ;;  %v4012_v37 = vpack.c.bf16 %v3569_v34, %v3568_v32 }
 0x116   :  { %v2130_v38 = vadd.f32 %v6545_v36, %v7618_v41  ;;  %v2121_v39 = vpop.f32.mrb[29].mxu0 }
 0x117   :  { %v2122_v40 = vadd.f32 %v7618_v41, %v2121_v39  ;;  %v6546_v42 = vpop.f32.mrb[30].mxu0  ;;  %6104 = vmatprep.subr.bf16.mxu1 %v4012_v37  ;;  %v7801_v39 = vld [vmem:[%s9193_s3 + $0x8] sm:$0xff] }
 0x118   :  { %v2133_v8 = vadd.f32 %v6546_v42, %v7618_v41  ;;  %v2124_v46 = vpop.f32.mrb[31].mxu0  ;;  %6105 = vmatpush3.bf16.msra.mxu1 %v7667_v25  ;;  %v3574_v48 = vmax.f32 %v2130_v38, 0.0  ;;  %v7037_v25 = vld [vmem:[%s9190_s0 + $0x238] sm:$0xff]  }
 0x119   :  { %v2125_v47 = vadd.f32 %v7618_v41, %v2124_v46  ;;  %6106 = vmatprep.subr.bf16.mxu1 %v4013_v35  ;;  %v3572_v50 = vmax.f32 %v2122_v40, 0.0  ;;  %v7048_v35 = vld [vmem:[%s9190_s0 + $0x260] sm:$0xff]   ;;  %v5869_v46 = vcombine.low %v3976_v19, %v3988_v20 }
 0x11a   :  { %v3575_v49 = vmax.f32 %v2133_v8, 0.0  ;;  %6652 = vmatmul.mubr.msk.bf16.gmra.mrb[136].mxu0 %vm1398_vm0, %v7033_v9  ;;  %v7806_v9 = vld [vmem:[%s9193_s3 + $0x68] sm:$0xff] }
 0x11b   :  { %v3573_v51 = vmax.f32 %v2125_v47, 0.0  ;;  %6655 = vmatprep.mubr.msk.bf16.mxu0 %vm1398_vm0, %v7036_v43 }
 0x11c   :  { %6107 = vmatpush3.bf16.msra.mxu1 %v7665_v24  ;;  %v4015_v52 = vpack.c.bf16 %v3575_v49, %v3574_v48  ;;  %v5824_v48 = vcombine.high %v7801_v39, %v7806_v9 }
 0x11d   :  { %v6549_v53 = vpop.f32.mrb[32].mxu0  ;;  %v4014_v54 = vpack.c.bf16 %v3573_v51, %v3572_v50 }
 0x11e   :  { %v2146_v55 = vadd.f32 %v6549_v53, %v7618_v41  ;;  %v2137_v58 = vpop.f32.mrb[33].mxu0  ;;  %v7049_v53 = vld [vmem:[%s9190_s0 + $0x268] sm:$0xff]  }
 0x11f   :  { %v2138_v59 = vadd.f32 %v7618_v41, %v2137_v58  ;;  %v6550_v60 = vpop.f32.mrb[34].mxu0  ;;  %6108 = vmatprep.subr.bf16.mxu1 %v4014_v54  ;;  %v7052_v58 = vld [vmem:[%s9190_s0 + $0x270] sm:$0xff]  }
 0x120   :  { %v2149_v24 = vadd.f32 %v6550_v60, %v7618_v41  ;;  %v2140_v62 = vpop.f32.mrb[35].mxu0  ;;  %6109 = vmatpush3.bf16.msra.mxu1 %v7683_v45  ;;  %v3578_v2 = vmax.f32 %v2146_v55, 0.0 }
 0x121   :  { %v2141_v63 = vadd.f32 %v7618_v41, %v2140_v62  ;;  %6110 = vmatprep.subr.bf16.mxu1 %v4015_v52  ;;  %v3576_v4 = vmax.f32 %v2138_v59, 0.0 }
 0x122   :  { %v3579_v3 = vmax.f32 %v2149_v24, 0.0  ;;  %6656 = vmatmul.mubr.msk.bf16.gmra.mrb[140].mxu0 %vm1398_vm0, %v7037_v25 }
 0x123   :  { %v3577_v5 = vmax.f32 %v2141_v63, 0.0  ;;  %6659 = vmatprep.mubr.msk.bf16.mxu0 %vm1398_vm0, %v7040_v61 }
 0x124   :  { %v7758_v45 = vpack.c.bf16 %v3579_v3, %v3578_v2  ;;  %6111 = vmatpush3.bf16.msra.mxu1 %v7681_v44 }
 0x125   :  { %v7761_v7 = vpack.c.bf16 %v3577_v5, %v3576_v4  ;;  %v6553_v10 = vpop.f32.mrb[36].mxu0  ;;  %v7053_v5 = vld [vmem:[%s9190_s0 + $0x278] sm:$0xff]  }
 0x126   :  { %v2162_v11 = vadd.f32 %v6553_v10, %v7618_v41  ;;  %v2153_v12 = vpop.f32.mrb[37].mxu0 }
 0x127   :  { %v2154_v14 = vadd.f32 %v7618_v41, %v2153_v12  ;;  %v6554_v15 = vpop.f32.mrb[38].mxu0  ;;  %4585 = vmatmul.mubr.bf16.vlgmr.msra.gmra.mrb[88].mxu1 %v5821_v33  ;;  %v5845_v33 = vcombine.low %v3952_v0, %v3964_v1 }
 0x128   :  { %v2165_v44 = vadd.f32 %v6554_v15, %v7618_v41  ;;  %v2156_v17 = vpop.f32.mrb[39].mxu0  ;;  %4592 = vmatprep.mubr.bf16.mxu1 %v5846_v6  ;;  %v3582_v57 = vmax.f32 %v2162_v11, 0.0  ;;  %v7054_v11 = vld [vmem:[%s9190_s0 + $0x280] sm:$0xff]  }
 0x129   :  { %v2157_v18 = vadd.f32 %v7618_v41, %v2156_v17  ;;  %v3580_v28 = vmax.f32 %v2154_v14, 0.0 }
 0x12a   :  { %v3583_v21 = vmax.f32 %v2165_v44, 0.0  ;;  %6660 = vmatmul.mubr.msk.bf16.gmra.mrb[144].mxu0 %vm1398_vm0, %v7041_v13 }
 0x12b   :  { %v3581_v29 = vmax.f32 %v2157_v18, 0.0  ;;  %6663 = vmatprep.mubr.msk.bf16.mxu0 %vm1398_vm0, %v7044_v16 }
 0x12c   :  { %v7784_v22 = vpack.c.bf16 %v3583_v21, %v3582_v57 }
 0x12d   :  { %v7786_v56 = vpack.c.bf16 %v3581_v29, %v3580_v28  ;;  %v6557_v26 = vpop.f32.mrb[40].mxu0  ;;  %v7055_v28 = vld [vmem:[%s9190_s0 + $0x288] sm:$0xff]  }
 0x12e   :  { %v2178_v27 = vadd.f32 %v6557_v26, %v7618_v41  ;;  %v2169_v30 = vpop.f32.mrb[41].mxu0 }
 0x12f   :  { %v2170_v32 = vadd.f32 %v7618_v41, %v2169_v30  ;;  %v6558_v34 = vpop.f32.mrb[42].mxu0  ;;  %4593 = vmatmul.mubr.bf16.gmra.mrb[92].mxu1 %v5845_v33 }
 0x130   :  { %v2181_v36 = vadd.f32 %v6558_v34, %v7618_v41  ;;  %v2172_v37 = vpop.f32.mrb[43].mxu0  ;;  %4600 = vmatprep.mubr.bf16.mxu1 %v5870_v23  ;;  %v3586_v40 = vmax.f32 %v2178_v27, 0.0  ;;  %v7056_v23 = vld [vmem:[%s9190_s0 + $0x290] sm:$0xff]  }
 0x131   :  { %v2173_v38 = vadd.f32 %v7618_v41, %v2172_v37  ;;  %v3584_v43 = vmax.f32 %v2170_v32, 0.0 }
 0x132   :  { %v3587_v42 = vmax.f32 %v2181_v36, 0.0  ;;  %6664 = vmatmul.mubr.msk.bf16.gmra.mrb[148].mxu0 %vm1398_vm0, %v7045_v31 }
 0x133   :  { %v3585_v8 = vmax.f32 %v2173_v38, 0.0  ;;  %6667 = vmatprep.mubr.msk.bf16.mxu0 %vm1398_vm0, %v7048_v35 }
 0x134   :  { %v7810_v47 = vpack.c.bf16 %v3587_v42, %v3586_v40 }
 0x135   :  { %v7814_v49 = vpack.c.bf16 %v3585_v8, %v3584_v43  ;;  %v6561_v50 = vpop.f32.mrb[44].mxu0 }
 0x136   :  { %v2194_v51 = vadd.f32 %v6561_v50, %v7618_v41  ;;  %v2185_v52 = vpop.f32.mrb[45].mxu0 }
 0x137   :  { %v2186_v54 = vadd.f32 %v7618_v41, %v2185_v52  ;;  %v6562_v55 = vpop.f32.mrb[46].mxu0  ;;  %4601 = vmatmul.mubr.bf16.gmra.mrb[96].mxu1 %v5869_v46  ;;  %v7058_v46 = vld [vmem:[%s9190_s0 + $0x2a0] sm:$0xff]  }
 0x138   :  { %v2197_v25 = vadd.f32 %v6562_v55, %v7618_v41  ;;  %v2188_v59 = vpop.f32.mrb[47].mxu0  ;;  %4641 = vmatprep.mubr.bf16.mxu1 %v5824_v48  ;;  %v3590_v61 = vmax.f32 %v2194_v51, 0.0 }
 0x139   :  { %v2189_v60 = vadd.f32 %v7618_v41, %v2188_v59  ;;  %v3588_v62 = vmax.f32 %v2186_v54, 0.0 }
 0x13a   :  { %v3591_v24 = vmax.f32 %v2197_v25, 0.0  ;;  %6668 = vmatmul.mubr.msk.bf16.gmra.mrb[152].mxu0 %vm1398_vm0, %v7049_v53 }
 0x13b   :  { %v3589_v63 = vmax.f32 %v2189_v60, 0.0  ;;  %6671 = vmatprep.mubr.msk.bf16.mxu0 %vm1398_vm0, %v7052_v58 }
 0x13c   :  { %v7828_v0 = vpack.c.bf16 %v3591_v24, %v3590_v61 }
 0x13d   :  { %v7830_v1 = vpack.c.bf16 %v3589_v63, %v3588_v62  ;;  %v6565_v2 = vpop.f32.mrb[48].mxu0  ;;  %v7060_v62 = vld [vmem:[%s9190_s0 + $0x2b0] sm:$0xff]  }
 0x13e   :  { %v2210_v3 = vadd.f32 %v6565_v2, %v7618_v41  ;;  %v2201_v4 = vpop.f32.mrb[49].mxu0 }
 0x13f   :  { %v2202_v6 = vadd.f32 %v7618_v41, %v2201_v4  ;;  %v6566_v10 = vpop.f32.mrb[50].mxu0 }
 0x140   :  { %v2213_v12 = vadd.f32 %v6566_v10, %v7618_v41  ;;  %v2204_v13 = vpop.f32.mrb[51].mxu0  ;;  %v3594_v15 = vmax.f32 %v2210_v3, 0.0 }
 0x141   :  { %v2205_v14 = vadd.f32 %v7618_v41, %v2204_v13  ;;  %v3592_v44 = vmax.f32 %v2202_v6, 0.0 }
 0x142   :  { %v3595_v16 = vmax.f32 %v2213_v12, 0.0  ;;  %6672 = vmatmul.mubr.msk.bf16.gmra.mrb[156].mxu0 %vm1398_vm0, %v7053_v5 }
 0x143   :  { %v3593_v17 = vmax.f32 %v2205_v14, 0.0  ;;  %6675 = vmatprep.mubr.msk.bf16.mxu0 %vm1398_vm0, %v7054_v11 }
 0x144   :  { %v4025_v18 = vpack.c.bf16 %v3595_v16, %v3594_v15 }
 0x145   :  { %v4024_v19 = vpack.c.bf16 %v3593_v17, %v3592_v44  ;;  %v6569_v20 = vpop.f32.mrb[52].mxu0  ;;  %v7062_v44 = vld [vmem:[%s9190_s0 + $0x2c0] sm:$0xff]  }
 0x146   :  { %v2226_v57 = vadd.f32 %v6569_v20, %v7618_v41  ;;  %v2217_v21 = vpop.f32.mrb[53].mxu0  ;;  %v3965_v20 = vld [vmem:[%s9193_s3 + $0x128] sm:$0xff] }
 0x147   :  { %v2218_v29 = vadd.f32 %v7618_v41, %v2217_v21  ;;  %v6570_v33 = vpop.f32.mrb[54].mxu0  ;;  %6130 = vmatprep.subr.bf16.mxu1 %v4024_v19  ;;  %v3953_v19 = vld [vmem:[%s9193_s3 + $0xc8] sm:$0xff] }
 0x148   :  { %v2229_v26 = vadd.f32 %v6570_v33, %v7618_v41  ;;  %v2220_v27 = vpop.f32.mrb[55].mxu0  ;;  %6131 = vmatpush3.bf16.msra.mxu1 %v7761_v7  ;;  %v3598_v31 = vmax.f32 %v2226_v57, 0.0  ;;  %v7057_v7 = vld [vmem:[%s9190_s0 + $0x298] sm:$0xff]  }
 0x149   :  { %v2221_v30 = vadd.f32 %v7618_v41, %v2220_v27  ;;  %6132 = vmatprep.subr.bf16.mxu1 %v4025_v18  ;;  %v3596_v34 = vmax.f32 %v2218_v29, 0.0 }
 0x14a   :  { %v3599_v32 = vmax.f32 %v2229_v26, 0.0  ;;  %6676 = vmatmul.mubr.msk.bf16.gmra.mrb[160].mxu0 %vm1398_vm0, %v7055_v28 }
 0x14b   :  { %v3597_v35 = vmax.f32 %v2221_v30, 0.0  ;;  %6679 = vmatprep.mubr.msk.bf16.mxu0 %vm1398_vm0, %v7056_v23  ;;  %v5848_v23 = vcombine.high %v3953_v19, %v3965_v20 }
 0x14c   :  { %v4027_v36 = vpack.c.bf16 %v3599_v32, %v3598_v31  ;;  %6133 = vmatpush3.bf16.msra.mxu1 %v7758_v45  ;;  %v7063_v32 = vld [vmem:[%s9190_s0 + $0x2c8] sm:$0xff]  }
 0x14d   :  { %v4026_v37 = vpack.c.bf16 %v3597_v35, %v3596_v34  ;;  %v6573_v38 = vpop.f32.mrb[56].mxu0 }
 0x14e   :  { %v2242_v40 = vadd.f32 %v6573_v38, %v7618_v41  ;;  %v2233_v42 = vpop.f32.mrb[57].mxu0  ;;  %v3989_v38 = vld [vmem:[%s9193_s3 + $0x1e8] sm:$0xff] }
 0x14f   :  { %v2234_v43 = vadd.f32 %v7618_v41, %v2233_v42  ;;  %v6574_v8 = vpop.f32.mrb[58].mxu0  ;;  %6134 = vmatprep.subr.bf16.mxu1 %v4026_v37  ;;  %v3977_v37 = vld [vmem:[%s9193_s3 + $0x188] sm:$0xff] }
 0x150   :  { %v2245_v48 = vadd.f32 %v6574_v8, %v7618_v41  ;;  %v2236_v45 = vpop.f32.mrb[59].mxu0  ;;  %6135 = vmatpush3.bf16.msra.mxu1 %v7786_v56  ;;  %v3602_v51 = vmax.f32 %v2242_v40, 0.0  ;;  %v7059_v56 = vld [vmem:[%s9190_s0 + $0x2a8] sm:$0xff]   ;;  %v5847_v8 = vcombine.low %v3953_v19, %v3965_v20 }
 0x151   :  { %v2237_v50 = vadd.f32 %v7618_v41, %v2236_v45  ;;  %6136 = vmatprep.subr.bf16.mxu1 %v4027_v36  ;;  %v3600_v53 = vmax.f32 %v2234_v43, 0.0 }
 0x152   :  { %v3603_v52 = vmax.f32 %v2245_v48, 0.0  ;;  %6680 = vmatmul.mubr.msk.bf16.gmra.mrb[164].mxu0 %vm1398_vm0, %v7057_v7  ;;  %v5872_v48 = vcombine.high %v3977_v37, %v3989_v38 }
 0x153   :  { %v3601_v54 = vmax.f32 %v2237_v50, 0.0  ;;  %6683 = vmatprep.mubr.msk.bf16.mxu0 %vm1398_vm0, %v7058_v46 }
 0x154   :  { %v4029_v55 = vpack.c.bf16 %v3603_v52, %v3602_v51  ;;  %6137 = vmatpush3.bf16.msra.mxu1 %v7784_v22 }
 0x155   :  { %v4028_v58 = vpack.c.bf16 %v3601_v54, %v3600_v53  ;;  %v6577_v25 = vpop.f32.mrb[60].mxu0  ;;  %v7065_v53 = vld [vmem:[%s9190_s0 + $0x2d8] sm:$0xff]  }
 0x156   :  { %v2258_v59 = vadd.f32 %v6577_v25, %v7618_v41  ;;  %v2249_v60 = vpop.f32.mrb[61].mxu0 }
 0x157   :  { %v2250_v61 = vadd.f32 %v7618_v41, %v2249_v60  ;;  %v6578_v24 = vpop.f32.mrb[62].mxu0  ;;  %6138 = vmatprep.subr.bf16.mxu1 %v4028_v58  ;;  %v7066_v58 = vld [vmem:[%s9190_s0 + $0x2e0] sm:$0xff]  }
 0x158   :  { %v2261_v63 = vadd.f32 %v6578_v24, %v7618_v41  ;;  %v2252_v22 = vpop.f32.mrb[63].mxu0  ;;  %6139 = vmatpush3.bf16.msra.mxu1 %v7814_v49  ;;  %v3606_v3 = vmax.f32 %v2258_v59, 0.0  ;;  %v7061_v49 = vld [vmem:[%s9190_s0 + $0x2b8] sm:$0xff]  }
 0x159   :  { %v2253_v2 = vadd.f32 %v7618_v41, %v2252_v22  ;;  %6140 = vmatprep.subr.bf16.mxu1 %v4029_v55  ;;  %v3604_v5 = vmax.f32 %v2250_v61, 0.0  ;;  %v7952_v61 = vld [vmem:[%s9193_s3 + $0x70] sm:$0xff] }
 0x15a   :  { %v3607_v4 = vmax.f32 %v2261_v63, 0.0  ;;  %6684 = vmatmul.mubr.msk.bf16.gmra.mrb[168].mxu0 %vm1398_vm0, %v7059_v56  ;;  %v7947_v56 = vld [vmem:[%s9193_s3 + $0x10] sm:$0xff] }
 0x15b   :  { %v3605_v6 = vmax.f32 %v2253_v2, 0.0  ;;  %6687 = vmatprep.mubr.msk.bf16.mxu0 %vm1398_vm0, %v7060_v62  ;;  %v5871_v2 = vcombine.low %v3977_v37, %v3989_v38 }
 0x15c   :  { %v4031_v10 = vpack.c.bf16 %v3607_v4, %v3606_v3  ;;  %6141 = vmatpush3.bf16.msra.mxu1 %v7810_v47  ;;  %v5826_v4 = vcombine.high %v7947_v56, %v7952_v61 }
 0x15d   :  { %v4030_v11 = vpack.c.bf16 %v3605_v6, %v3604_v5  ;;  %v6581_v12 = vpop.f32.mrb[64].mxu0 }
 0x15e   :  { %v2274_v13 = vadd.f32 %v6581_v12, %v7618_v41  ;;  %v2265_v14 = vpop.f32.mrb[65].mxu0  ;;  %v7067_v12 = vld [vmem:[%s9190_s0 + $0x2e8] sm:$0xff]  }
 0x15f   :  { %v2266_v15 = vadd.f32 %v7618_v41, %v2265_v14  ;;  %v6582_v16 = vpop.f32.mrb[66].mxu0  ;;  %6142 = vmatprep.subr.bf16.mxu1 %v4030_v11 }
 0x160   :  { %v2277_v17 = vadd.f32 %v6582_v16, %v7618_v41  ;;  %v2268_v47 = vpop.f32.mrb[67].mxu0  ;;  %6143 = vmatpush3.bf16.msra.mxu1 %v7830_v1  ;;  %v3610_v57 = vmax.f32 %v2274_v13, 0.0  ;;  %v5823_v1 = vcombine.low %v7801_v39, %v7806_v9  ;;  %v7064_v39 = vld [vmem:[%s9190_s0 + $0x2d0] sm:$0xff]  }
 0x161   :  { %v2269_v18 = vadd.f32 %v7618_v41, %v2268_v47  ;;  %6144 = vmatprep.subr.bf16.mxu1 %v4031_v10  ;;  %v3608_v28 = vmax.f32 %v2266_v15, 0.0 }
 0x162   :  { %v3611_v21 = vmax.f32 %v2277_v17, 0.0  ;;  %6688 = vmatmul.mubr.msk.bf16.gmra.mrb[172].mxu0 %vm1398_vm0, %v7061_v49  ;;  %v7068_v49 = vld [vmem:[%s9190_s0 + $0x2f0] sm:$0xff]  }
 0x163   :  { %v3609_v29 = vmax.f32 %v2269_v18, 0.0  ;;  %6691 = vmatprep.mubr.msk.bf16.mxu0 %vm1398_vm0, %v7062_v44 }
 0x164   :  { %v7907_v33 = vpack.c.bf16 %v3611_v21, %v3610_v57  ;;  %6145 = vmatpush3.bf16.msra.mxu1 %v7828_v0 }
 0x165   :  { %v7910_v26 = vpack.c.bf16 %v3609_v29, %v3608_v28  ;;  %v6585_v27 = vpop.f32.mrb[68].mxu0 }
 0x166   :  { %v2290_v30 = vadd.f32 %v6585_v27, %v7618_v41  ;;  %v2281_v31 = vpop.f32.mrb[69].mxu0 }
 0x167   :  { %v2282_v34 = vadd.f32 %v7618_v41, %v2281_v31  ;;  %v6586_v35 = vpop.f32.mrb[70].mxu0  ;;  %4642 = vmatmul.mubr.bf16.vlgmr.msra.gmra.mrb[100].mxu1 %v5823_v1  ;;  %v7069_v1 = vld [vmem:[%s9190_s0 + $0x2f8] sm:$0xff]  }
 0x168   :  { %v2293_v9 = vadd.f32 %v6586_v35, %v7618_v41  ;;  %v2284_v0 = vpop.f32.mrb[71].mxu0  ;;  %4649 = vmatprep.mubr.bf16.mxu1 %v5848_v23  ;;  %v3614_v40 = vmax.f32 %v2290_v30, 0.0  ;;  %v7070_v30 = vld [vmem:[%s9190_s0 + $0x300] sm:$0xff]  }
 0x169   :  { %v2285_v36 = vadd.f32 %v7618_v41, %v2284_v0  ;;  %v3612_v7 = vmax.f32 %v2282_v34, 0.0 }
 0x16a   :  { %v3615_v42 = vmax.f32 %v2293_v9, 0.0  ;;  %6692 = vmatmul.mubr.msk.bf16.gmra.mrb[176].mxu0 %vm1398_vm0, %v7063_v32 }
 0x16b   :  { %v3613_v43 = vmax.f32 %v2285_v36, 0.0  ;;  %6695 = vmatprep.mubr.msk.bf16.mxu0 %vm1398_vm0, %v7064_v39 }
 0x16c   :  { %v7930_v46 = vpack.c.bf16 %v3615_v42, %v3614_v40 }
 0x16d   :  { %v7932_v45 = vpack.c.bf16 %v3613_v43, %v3612_v7  ;;  %v6589_v50 = vpop.f32.mrb[72].mxu0  ;;  %v7071_v7 = vld [vmem:[%s9190_s0 + $0x308] sm:$0xff]  }
 0x16e   :  { %v2306_v51 = vadd.f32 %v6589_v50, %v7618_v41  ;;  %v2297_v52 = vpop.f32.mrb[73].mxu0 }
 0x16f   :  { %v2298_v54 = vadd.f32 %v7618_v41, %v2297_v52  ;;  %v6590_v55 = vpop.f32.mrb[74].mxu0  ;;  %4650 = vmatmul.mubr.bf16.gmra.mrb[104].mxu1 %v5847_v8 }
 0x170   :  { %v2309_v25 = vadd.f32 %v6590_v55, %v7618_v41  ;;  %v2300_v59 = vpop.f32.mrb[75].mxu0  ;;  %4657 = vmatprep.mubr.bf16.mxu1 %v5872_v48  ;;  %v3618_v24 = vmax.f32 %v2306_v51, 0.0  ;;  %v7072_v48 = vld [vmem:[%s9190_s0 + $0x310] sm:$0xff]  }
 0x171   :  { %v2301_v60 = vadd.f32 %v7618_v41, %v2300_v59  ;;  %v3616_v63 = vmax.f32 %v2298_v54, 0.0 }
 0x172   :  { %v3619_v62 = vmax.f32 %v2309_v25, 0.0  ;;  %6696 = vmatmul.mubr.msk.bf16.gmra.mrb[180].mxu0 %vm1398_vm0, %v7065_v53 }
 0x173   :  { %v3617_v22 = vmax.f32 %v2301_v60, 0.0  ;;  %6699 = vmatprep.mubr.msk.bf16.mxu0 %vm1398_vm0, %v7066_v58 }
 0x174   :  { %v7956_v3 = vpack.c.bf16 %v3619_v62, %v3618_v24 }
 0x175   :  { %v7960_v5 = vpack.c.bf16 %v3617_v22, %v3616_v63  ;;  %v6593_v6 = vpop.f32.mrb[76].mxu0 }
 0x176   :  { %v2322_v10 = vadd.f32 %v6593_v6, %v7618_v41  ;;  %v2313_v11 = vpop.f32.mrb[77].mxu0 }
 0x177   :  { %v2314_v13 = vadd.f32 %v7618_v41, %v2313_v11  ;;  %v6594_v14 = vpop.f32.mrb[78].mxu0  ;;  %4658 = vmatmul.mubr.bf16.gmra.mrb[108].mxu1 %v5871_v2  ;;  %v7074_v2 = vld [vmem:[%s9190_s0 + $0x320] sm:$0xff]  }
 0x178   :  { %v2325_v15 = vadd.f32 %v6594_v14, %v7618_v41  ;;  %v2316_v16 = vpop.f32.mrb[79].mxu0  ;;  %4698 = vmatprep.mubr.bf16.mxu1 %v5826_v4  ;;  %v3622_v17 = vmax.f32 %v2322_v10, 0.0 }
 0x179   :  { %v2317_v44 = vadd.f32 %v7618_v41, %v2316_v16  ;;  %v3620_v18 = vmax.f32 %v2314_v13, 0.0 }
 0x17a   :  { %v3623_v47 = vmax.f32 %v2325_v15, 0.0  ;;  %6700 = vmatmul.mubr.msk.bf16.gmra.mrb[184].mxu0 %vm1398_vm0, %v7067_v12 }
 0x17b   :  { %v3621_v19 = vmax.f32 %v2317_v44, 0.0  ;;  %6703 = vmatprep.mubr.msk.bf16.mxu0 %vm1398_vm0, %v7068_v49 }
 0x17c   :  { %v7974_v20 = vpack.c.bf16 %v3623_v47, %v3622_v17 }
 0x17d   :  { %v7976_v57 = vpack.c.bf16 %v3621_v19, %v3620_v18  ;;  %v6597_v21 = vpop.f32.mrb[80].mxu0  ;;  %v7076_v18 = vld [vmem:[%s9190_s0 + $0x330] sm:$0xff]  }
 0x17e   :  { %v2338_v28 = vadd.f32 %v6597_v21, %v7618_v41  ;;  %v2329_v29 = vpop.f32.mrb[81].mxu0 }
 0x17f   :  { %v2330_v23 = vadd.f32 %v7618_v41, %v2329_v29  ;;  %v6598_v27 = vpop.f32.mrb[82].mxu0 }
 0x180   :  { %v2341_v31 = vadd.f32 %v6598_v27, %v7618_v41  ;;  %v2332_v32 = vpop.f32.mrb[83].mxu0  ;;  %v3626_v35 = vmax.f32 %v2338_v28, 0.0 }
 0x181   :  { %v2333_v34 = vadd.f32 %v7618_v41, %v2332_v32  ;;  %v3624_v9 = vmax.f32 %v2330_v23, 0.0 }
 0x182   :  { %v3627_v39 = vmax.f32 %v2341_v31, 0.0  ;;  %6704 = vmatmul.mubr.msk.bf16.gmra.mrb[188].mxu0 %vm1398_vm0, %v7069_v1 }
 0x183   :  { %v3625_v0 = vmax.f32 %v2333_v34, 0.0  ;;  %6707 = vmatprep.mubr.msk.bf16.mxu0 %vm1398_vm0, %v7070_v30  ;;  %v7077_v34 = vld [vmem:[%s9190_s0 + $0x338] sm:$0xff]  }
 0x184   :  { %v4041_v36 = vpack.c.bf16 %v3627_v39, %v3626_v35 }
 0x185   :  { %v4040_v37 = vpack.c.bf16 %v3625_v0, %v3624_v9  ;;  %v6601_v38 = vpop.f32.mrb[84].mxu0 }
 0x186   :  { %v2354_v40 = vadd.f32 %v6601_v38, %v7618_v41  ;;  %v2345_v42 = vpop.f32.mrb[85].mxu0  ;;  %v3966_v38 = vld [vmem:[%s9193_s3 + $0x130] sm:$0xff] }
 0x187   :  { %v2346_v43 = vadd.f32 %v7618_v41, %v2345_v42  ;;  %v6602_v8 = vpop.f32.mrb[86].mxu0  ;;  %6164 = vmatprep.subr.bf16.mxu1 %v4040_v37  ;;  %v3954_v37 = vld [vmem:[%s9193_s3 + $0xd0] sm:$0xff] }
 0x188   :  { %v2357_v50 = vadd.f32 %v6602_v8, %v7618_v41  ;;  %v2348_v51 = vpop.f32.mrb[87].mxu0  ;;  %6165 = vmatpush3.bf16.msra.mxu1 %v7910_v26  ;;  %v3630_v53 = vmax.f32 %v2354_v40, 0.0  ;;  %v7073_v26 = vld [vmem:[%s9190_s0 + $0x318] sm:$0xff]  }
 0x189   :  { %v2349_v52 = vadd.f32 %v7618_v41, %v2348_v51  ;;  %6166 = vmatprep.subr.bf16.mxu1 %v4041_v36  ;;  %v3628_v55 = vmax.f32 %v2346_v43, 0.0 }
 0x18a   :  { %v3631_v54 = vmax.f32 %v2357_v50, 0.0  ;;  %6708 = vmatmul.mubr.msk.bf16.gmra.mrb[192].mxu0 %vm1398_vm0, %v7071_v7 }
 0x18b   :  { %v3629_v58 = vmax.f32 %v2349_v52, 0.0  ;;  %6711 = vmatprep.mubr.msk.bf16.mxu0 %vm1398_vm0, %v7072_v48  ;;  %v5850_v48 = vcombine.high %v3954_v37, %v3966_v38 }
 0x18c   :  { %v4043_v25 = vpack.c.bf16 %v3631_v54, %v3630_v53  ;;  %6167 = vmatpush3.bf16.msra.mxu1 %v7907_v33  ;;  %v7079_v54 = vld [vmem:[%s9190_s0 + $0x348] sm:$0xff]  }
 0x18d   :  { %v4042_v59 = vpack.c.bf16 %v3629_v58, %v3628_v55  ;;  %v6605_v60 = vpop.f32.mrb[88].mxu0 }
 0x18e   :  { %v2370_v24 = vadd.f32 %v6605_v60, %v7618_v41  ;;  %v2361_v62 = vpop.f32.mrb[89].mxu0  ;;  %v3990_v60 = vld [vmem:[%s9193_s3 + $0x1f0] sm:$0xff] }
 0x18f   :  { %v2362_v63 = vadd.f32 %v7618_v41, %v2361_v62  ;;  %v6606_v22 = vpop.f32.mrb[90].mxu0  ;;  %6168 = vmatprep.subr.bf16.mxu1 %v4042_v59  ;;  %v3978_v59 = vld [vmem:[%s9193_s3 + $0x190] sm:$0xff] }
 0x190   :  { %v2373_v4 = vadd.f32 %v6606_v22, %v7618_v41  ;;  %v2364_v33 = vpop.f32.mrb[91].mxu0  ;;  %6169 = vmatpush3.bf16.msra.mxu1 %v7932_v45  ;;  %v3634_v10 = vmax.f32 %v2370_v24, 0.0  ;;  %v7075_v45 = vld [vmem:[%s9190_s0 + $0x328] sm:$0xff]   ;;  %v5849_v22 = vcombine.low %v3954_v37, %v3966_v38 }
 0x191   :  { %v2365_v6 = vadd.f32 %v7618_v41, %v2364_v33  ;;  %6170 = vmatprep.subr.bf16.mxu1 %v4043_v25  ;;  %v3632_v12 = vmax.f32 %v2362_v63, 0.0 }
 0x192   :  { %v3635_v11 = vmax.f32 %v2373_v4, 0.0  ;;  %6712 = vmatmul.mubr.msk.bf16.gmra.mrb[196].mxu0 %vm1398_vm0, %v7073_v26  ;;  %v5874_v4 = vcombine.high %v3978_v59, %v3990_v60 }
 0x193   :  { %v3633_v13 = vmax.f32 %v2365_v6, 0.0  ;;  %6715 = vmatprep.mubr.msk.bf16.mxu0 %vm1398_vm0, %v7074_v2 }
 0x194   :  { %v4045_v14 = vpack.c.bf16 %v3635_v11, %v3634_v10  ;;  %6171 = vmatpush3.bf16.msra.mxu1 %v7930_v46 }
 0x195   :  { %v4044_v49 = vpack.c.bf16 %v3633_v13, %v3632_v12  ;;  %v6609_v15 = vpop.f32.mrb[92].mxu0  ;;  %v7081_v12 = vld [vmem:[%s9190_s0 + $0x358] sm:$0xff]  }
 0x196   :  { %v2386_v16 = vadd.f32 %v6609_v15, %v7618_v41  ;;  %v2377_v44 = vpop.f32.mrb[93].mxu0 }
 0x197   :  { %v2378_v17 = vadd.f32 %v7618_v41, %v2377_v44  ;;  %v6610_v47 = vpop.f32.mrb[94].mxu0  ;;  %6172 = vmatprep.subr.bf16.mxu1 %v4044_v49  ;;  %v7082_v49 = vld [vmem:[%s9190_s0 + $0x360] sm:$0xff]  }
 0x198   :  { %v2389_v19 = vadd.f32 %v6610_v47, %v7618_v41  ;;  %v2380_v46 = vpop.f32.mrb[95].mxu0  ;;  %6173 = vmatpush3.bf16.msra.mxu1 %v7960_v5  ;;  %v3638_v28 = vmax.f32 %v2386_v16, 0.0  ;;  %v8035_v5 = vld [vmem:[%s9192_s2] ss:$0 sm:$0xff] }
 0x199   :  { %v2381_v21 = vadd.f32 %v7618_v41, %v2380_v46  ;;  %6174 = vmatprep.subr.bf16.mxu1 %v4045_v14  ;;  %v3636_v1 = vmax.f32 %v2378_v17, 0.0  ;;  %v8103_v17 = vld [vmem:[%s9193_s3 + $0x78] sm:$0xff] }
 0x19a   :  { %v3639_v29 = vmax.f32 %v2389_v19, 0.0  ;;  %6716 = vmatmul.mubr.msk.bf16.gmra.mrb[200].mxu0 %vm1398_vm0, %v7075_v45  ;;  %v8098_v45 = vld [vmem:[%s9193_s3 + $0x18] sm:$0xff] }
 0x19b   :  { %v3637_v23 = vmax.f32 %v2381_v21, 0.0  ;;  %6719 = vmatprep.mubr.msk.bf16.mxu0 %vm1398_vm0, %v7076_v18  ;;  %v5873_v21 = vcombine.low %v3978_v59, %v3990_v60 }
 0x19c   :  { %v4047_v27 = vpack.c.bf16 %v3639_v29, %v3638_v28  ;;  %6175 = vmatpush3.bf16.msra.mxu1 %v7956_v3  ;;  %v7078_v3 = vld [vmem:[%s9190_s0 + $0x340] sm:$0xff]   ;;  %v5828_v29 = vcombine.high %v8098_v45, %v8103_v17 }
 0x19d   :  { %v4046_v30 = vpack.c.bf16 %v3637_v23, %v3636_v1  ;;  %v6613_v31 = vpop.f32.mrb[96].mxu0 }
 0x19e   :  { %v2402_v41 = vadd.f32 %v8035_v5, %v6613_v31  ;;  %v2393_v32 = vpop.f32.mrb[97].mxu0  ;;  %v7083_v31 = vld [vmem:[%s9190_s0 + $0x368] sm:$0xff]  }
 0x19f   :  { %v2394_v35 = vadd.f32 %v8035_v5, %v2393_v32  ;;  %v6614_v39 = vpop.f32.mrb[98].mxu0  ;;  %6176 = vmatprep.subr.bf16.mxu1 %v4046_v30 }
 0x1a0   :  { %v2405_v9 = vadd.f32 %v8035_v5, %v6614_v39  ;;  %v2396_v0 = vpop.f32.mrb[99].mxu0  ;;  %6177 = vmatpush3.bf16.msra.mxu1 %v7976_v57  ;;  %v3642_v40 = vmax.f32 %v2402_v41, 0.0  ;;  %v5825_v57 = vcombine.low %v7947_v56, %v7952_v61  ;;  %v7080_v56 = vld [vmem:[%s9190_s0 + $0x350] sm:$0xff]  }
 0x1a1   :  { %v2397_v36 = vadd.f32 %v8035_v5, %v2396_v0  ;;  %6178 = vmatprep.subr.bf16.mxu1 %v4047_v27  ;;  %v3640_v7 = vmax.f32 %v2394_v35, 0.0 }
 0x1a2   :  { %v3643_v42 = vmax.f32 %v2405_v9, 0.0  ;;  %6720 = vmatmul.mubr.msk.bf16.gmra.mrb[204].mxu0 %vm1398_vm0, %v7077_v34  ;;  %v7084_v34 = vld [vmem:[%s9190_s0 + $0x370] sm:$0xff]  }
 0x1a3   :  { %v3641_v43 = vmax.f32 %v2397_v36, 0.0  ;;  %6723 = vmatprep.mubr.msk.bf16.mxu0 %vm1398_vm0, %v7078_v3 }
 0x1a4   :  { %v8058_v8 = vpack.c.bf16 %v3643_v42, %v3642_v40  ;;  %6179 = vmatpush3.bf16.msra.mxu1 %v7974_v20 }
 0x1a5   :  { %v8061_v50 = vpack.c.bf16 %v3641_v43, %v3640_v7  ;;  %v6617_v51 = vpop.f32.mrb[100].mxu0 }
 0x1a6   :  { %v2418_v52 = vadd.f32 %v8035_v5, %v6617_v51  ;;  %v2409_v53 = vpop.f32.mrb[101].mxu0 }
 0x1a7   :  { %v2410_v55 = vadd.f32 %v8035_v5, %v2409_v53  ;;  %v6618_v58 = vpop.f32.mrb[102].mxu0  ;;  %4699 = vmatmul.mubr.bf16.vlgmr.msra.gmra.mrb[112].mxu1 %v5825_v57  ;;  %v7085_v57 = vld [vmem:[%s9190_s0 + $0x378] sm:$0xff]  }
 0x1a8   :  { %v2421_v61 = vadd.f32 %v8035_v5, %v6618_v58  ;;  %v2412_v20 = vpop.f32.mrb[103].mxu0  ;;  %4706 = vmatprep.mubr.bf16.mxu1 %v5850_v48  ;;  %v3646_v24 = vmax.f32 %v2418_v52, 0.0  ;;  %v7086_v52 = vld [vmem:[%s9190_s0 + $0x380] sm:$0xff]  }
 0x1a9   :  { %v2413_v25 = vadd.f32 %v8035_v5, %v2412_v20  ;;  %v3644_v26 = vmax.f32 %v2410_v55, 0.0 }
 0x1aa   :  { %v3647_v62 = vmax.f32 %v2421_v61, 0.0  ;;  %6724 = vmatmul.mubr.msk.bf16.gmra.mrb[208].mxu0 %vm1398_vm0, %v7079_v54 }
 0x1ab   :  { %v3645_v63 = vmax.f32 %v2413_v25, 0.0  ;;  %6727 = vmatprep.mubr.msk.bf16.mxu0 %vm1398_vm0, %v7080_v56 }
 0x1ac   :  { %v8081_v2 = vpack.c.bf16 %v3647_v62, %v3646_v24 }
 0x1ad   :  { %v8083_v33 = vpack.c.bf16 %v3645_v63, %v3644_v26  ;;  %v6621_v6 = vpop.f32.mrb[104].mxu0  ;;  %v7087_v26 = vld [vmem:[%s9190_s0 + $0x388] sm:$0xff]  }
 0x1ae   :  { %v2434_v10 = vadd.f32 %v8035_v5, %v6621_v6  ;;  %v2425_v11 = vpop.f32.mrb[105].mxu0 }
 0x1af   :  { %v2426_v13 = vadd.f32 %v8035_v5, %v2425_v11  ;;  %v6622_v14 = vpop.f32.mrb[106].mxu0  ;;  %4707 = vmatmul.mubr.bf16.gmra.mrb[116].mxu1 %v5849_v22  ;;  %v6813_v11 = vpop.f32.mrb[0].mxu1 }
 0x1b0   :  { %v2437_v15 = vadd.f32 %v8035_v5, %v6622_v14  ;;  %v2428_v16 = vpop.f32.mrb[107].mxu0  ;;  %4714 = vmatprep.mubr.bf16.mxu1 %v5874_v4  ;;  %v3650_v47 = vmax.f32 %v2434_v10, 0.0  ;;  %v7088_v4 = vld [vmem:[%s9190_s0 + $0x390] sm:$0xff]  }
 0x1b1   :  { %v2429_v44 = vadd.f32 %v8035_v5, %v2428_v16  ;;  %v3648_v19 = vmax.f32 %v2426_v13, 0.0  ;;  %v3193_v13 = vpop.f32.mrb[1].mxu1 }
 0x1b2   :  { %v3651_v18 = vmax.f32 %v2437_v15, 0.0  ;;  %6728 = vmatmul.mubr.msk.bf16.gmra.mrb[212].mxu0 %vm1398_vm0, %v7081_v12  ;;  %v6814_v15 = vpop.f32.mrb[2].mxu1 }
 0x1b3   :  { %v3649_v46 = vmax.f32 %v2429_v44, 0.0  ;;  %6731 = vmatprep.mubr.msk.bf16.mxu0 %vm1398_vm0, %v7082_v49 }
 0x1b4   :  { %v8107_v28 = vpack.c.bf16 %v3651_v18, %v3650_v47  ;;  %v3196_v47 = vpop.f32.mrb[3].mxu1 }
 0x1b5   :  { %v8111_v1 = vpack.c.bf16 %v3649_v46, %v3648_v19  ;;  %v6625_v23 = vpop.f32.mrb[108].mxu0  ;;  %v3194_v19 = vadd.f32 %v8035_v5, %v3193_v13  ;;  %v3205_v46 = vadd.f32 %v8035_v5, %v6814_v15 }
 0x1b6   :  { %v2450_v27 = vadd.f32 %v8035_v5, %v6625_v23  ;;  %v2441_v30 = vpop.f32.mrb[109].mxu0  ;;  %v3197_v23 = vadd.f32 %v8035_v5, %v3196_v47 }
 0x1b7   :  { %v2442_v41 = vadd.f32 %v8035_v5, %v2441_v30  ;;  %v6626_v32 = vpop.f32.mrb[110].mxu0  ;;  %4715 = vmatmul.mubr.bf16.gmra.mrb[120].mxu1 %v5873_v21 }
 0x1b8   :  { %v2453_v35 = vadd.f32 %v8035_v5, %v6626_v32  ;;  %v2444_v39 = vpop.f32.mrb[111].mxu0  ;;  %4755 = vmatprep.mubr.bf16.mxu1 %v5828_v29  ;;  %v3654_v9 = vmax.f32 %v2450_v27, 0.0  ;;  %v3840_v32 = vmax.f32 %v3194_v19, 0.0 }
 0x1b9   :  { %v2445_v3 = vadd.f32 %v8035_v5, %v2444_v39  ;;  %v3652_v36 = vmax.f32 %v2442_v41, 0.0  ;;  %v7090_v39 = vld [vmem:[%s9190_s0 + $0x3a0] sm:$0xff]  }
 0x1ba   :  { %v3655_v0 = vmax.f32 %v2453_v35, 0.0  ;;  %6732 = vmatmul.mubr.msk.bf16.gmra.mrb[216].mxu0 %vm1398_vm0, %v7083_v31  ;;  %v7089_v31 = vld [vmem:[%s9190_s0 + $0x398] sm:$0xff]  }
 0x1bb   :  { %v3653_v37 = vmax.f32 %v2445_v3, 0.0  ;;  %6735 = vmatprep.mubr.msk.bf16.mxu0 %vm1398_vm0, %v7084_v34  ;;  %v3841_v3 = vmax.f32 %v3197_v23, 0.0 }
 0x1bc   :  { %v8125_v38 = vpack.c.bf16 %v3655_v0, %v3654_v9 }
 0x1bd   :  { %v8127_v40 = vpack.c.bf16 %v3653_v37, %v3652_v36  ;;  %v6629_v42 = vpop.f32.mrb[112].mxu0  ;;  %v6817_v37 = vpop.f32.mrb[4].mxu1 }
 0x1be   :  { %v2466_v7 = vadd.f32 %v8035_v5, %v6629_v42  ;;  %v2457_v43 = vpop.f32.mrb[113].mxu0 }
 0x1bf   :  { %v2458_v48 = vadd.f32 %v8035_v5, %v2457_v43  ;;  %v6630_v51 = vpop.f32.mrb[114].mxu0  ;;  %v3209_v43 = vpop.f32.mrb[5].mxu1 }
 0x1c0   :  { %v2469_v53 = vadd.f32 %v8035_v5, %v6630_v51  ;;  %v2460_v54 = vpop.f32.mrb[115].mxu0  ;;  %v3658_v58 = vmax.f32 %v2466_v7, 0.0  ;;  %v8172_v7 = vpack.c.bf16 %v3841_v3, %v3840_v32  ;;  %v6818_v51 = vpop.f32.mrb[6].mxu1  ;;  %v7093_v32 = vld [vmem:[%s9190_s0 + $0x3b8] sm:$0xff]   ;;  %v7094_v3 = vld [vmem:[%s9190_s0 + $0x3c0] sm:$0xff]  }
 0x1c1   :  { %v2461_v55 = vadd.f32 %v8035_v5, %v2460_v54  ;;  %v3656_v61 = vmax.f32 %v2458_v48, 0.0  ;;  %v3212_v54 = vpop.f32.mrb[7].mxu1 }
 0x1c2   :  { %v3659_v56 = vmax.f32 %v2469_v53, 0.0  ;;  %6736 = vmatmul.mubr.msk.bf16.gmra.mrb[220].mxu0 %vm1398_vm0, %v7085_v57  ;;  %v6821_v13 = vpop.f32.mrb[8].mxu1 }
 0x1c3   :  { %v3657_v20 = vmax.f32 %v2461_v55, 0.0  ;;  %6739 = vmatprep.mubr.msk.bf16.mxu0 %vm1398_vm0, %v7086_v52  ;;  %v3218_v55 = vadd.f32 %v8035_v5, %v6817_v37  ;;  %v3225_v15 = vpop.f32.mrb[9].mxu1 }
 0x1c4   :  { %v4057_v25 = vpack.c.bf16 %v3659_v56, %v3658_v58  ;;  %v3210_v58 = vadd.f32 %v8035_v5, %v3209_v43  ;;  %v3221_v56 = vadd.f32 %v8035_v5, %v6818_v51  ;;  %v6822_v47 = vpop.f32.mrb[10].mxu1  ;;  %v8221_v43 = vld [vmem:[%s9193_s3 + $0x138] sm:$0xff] }
 0x1c5   :  { %v4056_v59 = vpack.c.bf16 %v3657_v20, %v3656_v61  ;;  %v6633_v60 = vpop.f32.mrb[116].mxu0  ;;  %v3228_v19 = vpop.f32.mrb[11].mxu1 }
 0x1c6   :  { %v2482_v24 = vadd.f32 %v8035_v5, %v6633_v60  ;;  %v2473_v62 = vpop.f32.mrb[117].mxu0 }
 0x1c7   :  { %v2474_v63 = vadd.f32 %v8035_v5, %v2473_v62  ;;  %v6634_v22 = vpop.f32.mrb[118].mxu0  ;;  %6198 = vmatprep.subr.bf16.mxu1 %v4056_v59  ;;  %v3846_v62 = vmax.f32 %v3218_v55, 0.0 }
 0x1c8   :  { %v2485_v6 = vadd.f32 %v8035_v5, %v6634_v22  ;;  %v2476_v10 = vpop.f32.mrb[119].mxu0  ;;  %6199 = vmatpush3.bf16.msra.mxu1 %v8061_v50  ;;  %v3662_v14 = vmax.f32 %v2482_v24, 0.0  ;;  %v3202_v50 = vadd.f32 %v8035_v5, %v6813_v11  ;;  %v7091_v24 = vld [vmem:[%s9190_s0 + $0x3a8] sm:$0xff]  }
 0x1c9   :  { %v2477_v12 = vadd.f32 %v8035_v5, %v2476_v10  ;;  %6200 = vmatprep.subr.bf16.mxu1 %v4057_v25  ;;  %v3660_v16 = vmax.f32 %v2474_v63, 0.0  ;;  %v3213_v25 = vadd.f32 %v8035_v5, %v3212_v54 }
 0x1ca   :  { %v3663_v49 = vmax.f32 %v2485_v6, 0.0  ;;  %6740 = vmatmul.mubr.msk.bf16.gmra.mrb[224].mxu0 %vm1398_vm0, %v7087_v26  ;;  %v3842_v41 = vmax.f32 %v3202_v50, 0.0  ;;  %v3844_v26 = vmax.f32 %v3210_v58, 0.0 }
 0x1cb   :  { %v3661_v44 = vmax.f32 %v2477_v12, 0.0  ;;  %6743 = vmatprep.mubr.msk.bf16.mxu0 %vm1398_vm0, %v7088_v4  ;;  %v7092_v4 = vld [vmem:[%s9190_s0 + $0x3b0] sm:$0xff]   ;;  %v3845_v6 = vmax.f32 %v3213_v25, 0.0 }
 0x1cc   :  { %v4059_v18 = vpack.c.bf16 %v3663_v49, %v3662_v14  ;;  %6201 = vmatpush3.bf16.msra.mxu1 %v8058_v8  ;;  %v3843_v8 = vmax.f32 %v3205_v46, 0.0  ;;  %v3234_v46 = vadd.f32 %v8035_v5, %v6821_v13 }
 0x1cd   :  { %v4058_v21 = vpack.c.bf16 %v3661_v44, %v3660_v16  ;;  %v6637_v29 = vpop.f32.mrb[120].mxu0  ;;  %v8194_v49 = vpack.c.bf16 %v3845_v6, %v3844_v26 }
 0x1ce   :  { %v2498_v27 = vadd.f32 %v8035_v5, %v6637_v29  ;;  %v2489_v30 = vpop.f32.mrb[121].mxu0  ;;  %v8169_v36 = vpack.c.bf16 %v3843_v8, %v3842_v41  ;;  %v3237_v29 = vadd.f32 %v8035_v5, %v6822_v47  ;;  %v3850_v8 = vmax.f32 %v3234_v46, 0.0 }
 0x1cf   :  { %v2490_v34 = vadd.f32 %v8035_v5, %v2489_v30  ;;  %v6638_v35 = vpop.f32.mrb[122].mxu0  ;;  %6202 = vmatprep.subr.bf16.mxu1 %v4058_v21  ;;  %v3226_v21 = vadd.f32 %v8035_v5, %v3225_v15  ;;  %v3229_v30 = vadd.f32 %v8035_v5, %v3228_v19 }
 0x1d0   :  { %v2501_v9 = vadd.f32 %v8035_v5, %v6638_v35  ;;  %v2492_v0 = vpop.f32.mrb[123].mxu0  ;;  %6203 = vmatpush3.bf16.msra.mxu1 %v8083_v33  ;;  %v3666_v57 = vmax.f32 %v2498_v27, 0.0 }
 0x1d1   :  { %v2493_v42 = vadd.f32 %v8035_v5, %v2492_v0  ;;  %6204 = vmatprep.subr.bf16.mxu1 %v4059_v18  ;;  %v3664_v52 = vmax.f32 %v2490_v34, 0.0  ;;  %v3848_v34 = vmax.f32 %v3226_v21, 0.0 }
 0x1d2   :  { %v3667_v48 = vmax.f32 %v2501_v9, 0.0  ;;  %6744 = vmatmul.mubr.msk.bf16.gmra.mrb[228].mxu0 %vm1398_vm0, %v7089_v31  ;;  %v3849_v9 = vmax.f32 %v3229_v30, 0.0 }
 0x1d3   :  { %v3665_v53 = vmax.f32 %v2493_v42, 0.0  ;;  %6747 = vmatprep.mubr.msk.bf16.mxu0 %vm1398_vm0, %v7090_v39  ;;  %v8216_v42 = vld [vmem:[%s9193_s3 + $0xd8] sm:$0xff] }
 0x1d4   :  { %v4061_v33 = vpack.c.bf16 %v3667_v48, %v3666_v57  ;;  %6205 = vmatpush3.bf16.msra.mxu1 %v8081_v2  ;;  %v3847_v2 = vmax.f32 %v3221_v56, 0.0  ;;  %v6825_v48 = vpop.f32.mrb[12].mxu1  ;;  %v5827_v56 = vcombine.low %v8098_v45, %v8103_v17  ;;  %v5851_v30 = vcombine.low %v8216_v42, %v8221_v43 }
 0x1d5   :  { %v4060_v61 = vpack.c.bf16 %v3665_v53, %v3664_v52  ;;  %v6641_v20 = vpop.f32.mrb[124].mxu0  ;;  %v8226_v52 = vpack.c.bf16 %v3849_v9, %v3848_v34  ;;  %v3241_v53 = vpop.f32.mrb[13].mxu1 }
 0x1d6   :  { %v2514_v59 = vadd.f32 %v8035_v5, %v6641_v20  ;;  %v2505_v60 = vpop.f32.mrb[125].mxu0  ;;  %v8191_v12 = vpack.c.bf16 %v3847_v2, %v3846_v62 }
 0x1d7   :  { %v2506_v63 = vadd.f32 %v8035_v5, %v2505_v60  ;;  %v6642_v22 = vpop.f32.mrb[126].mxu0  ;;  %6206 = vmatprep.subr.bf16.mxu1 %v4060_v61  ;;  %v5852_v61 = vcombine.high %v8216_v42, %v8221_v43  ;;  %v3242_v60 = vadd.f32 %v8035_v5, %v3241_v53 }
 0x1d8   :  { %v2517_v10 = vadd.f32 %v8035_v5, %v6642_v22  ;;  %v2508_v11 = vpop.f32.mrb[127].mxu0  ;;  %6207 = vmatpush3.bf16.msra.mxu1 %v8111_v1  ;;  %v3670_v16 = vmax.f32 %v2514_v59, 0.0  ;;  %v3250_v59 = vadd.f32 %v8035_v5, %v6825_v48 }
 0x1d9   :  { %v2509_v14 = vadd.f32 %v8035_v5, %v2508_v11  ;;  %6208 = vmatprep.subr.bf16.mxu1 %v4061_v33  ;;  %v3668_v18 = vmax.f32 %v2506_v63, 0.0  ;;  %v6826_v33 = vpop.f32.mrb[14].mxu1  ;;  %v7095_v63 = vld [vmem:[%s9190_s0 + $0x3c8] sm:$0xff]   ;;  %v7096_v11 = vld [vmem:[%s9190_s0 + $0x3d0] sm:$0xff]  }
 0x1da   :  { %v3671_v44 = vmax.f32 %v2517_v10, 0.0  ;;  %6748 = vmatmul.mubr.msk.bf16.gmra.mrb[232].mxu0 %vm1398_vm0, %v7091_v24  ;;  %v3244_v20 = vpop.f32.mrb[15].mxu1  ;;  %v3253_v24 = vadd.f32 %v8035_v5, %v6826_v33  ;;  %v3854_v22 = vmax.f32 %v3250_v59, 0.0 }
 0x1db   :  { %v3669_v50 = vmax.f32 %v2509_v14, 0.0  ;;  %6751 = vmatprep.mubr.msk.bf16.mxu0 %vm1398_vm0, %v7092_v4  ;;  %v3245_v2 = vadd.f32 %v8035_v5, %v3244_v20 }
 0x1dc   :  { %v4063_v1 = vpack.c.bf16 %v3671_v44, %v3670_v16  ;;  %6209 = vmatpush3.bf16.msra.mxu1 %v8107_v28  ;;  %v3851_v28 = vmax.f32 %v3237_v29, 0.0  ;;  %v3855_v4 = vmax.f32 %v3253_v24, 0.0  ;;  %v8255_v16 = vld [vmem:[%s9193_s3 + $0x198] sm:$0xff] }
 0x1dd   :  { %v4062_v23 = vpack.c.bf16 %v3669_v50, %v3668_v18  ;;  %v6645_v27 = vpop.f32.mrb[128].mxu0  ;;  %v3853_v13 = vmax.f32 %v3245_v2, 0.0  ;;  %v8260_v44 = vld [vmem:[%s9193_s3 + $0x1f8] sm:$0xff]  ;;  %v6829_v18 = vpop.f32.mrb[16].mxu1 }
 0x1de   :  { %v2530_v31 = vadd.f32 %v8035_v5, %v6645_v27  ;;  %v2521_v41 = vpop.f32.mrb[129].mxu0  ;;  %v8223_v57 = vpack.c.bf16 %v3851_v28, %v3850_v8  ;;  %v8262_v47 = vpack.c.bf16 %v3855_v4, %v3854_v22  ;;  %v3266_v8 = vadd.f32 %v8035_v5, %v6829_v18 }
 0x1df   :  { %v2522_v35 = vadd.f32 %v8035_v5, %v2521_v41  ;;  %v6646_v39 = vpop.f32.mrb[130].mxu0  ;;  %6210 = vmatprep.subr.bf16.mxu1 %v4062_v23  ;;  %v5875_v22 = vcombine.low %v8255_v16, %v8260_v44 }
 0x1e0   :  { %v2533_v0 = vadd.f32 %v8035_v5, %v6646_v39  ;;  %v2524_v37 = vpop.f32.mrb[131].mxu0  ;;  %6211 = vmatpush3.bf16.msra.mxu1 %v8127_v40  ;;  %v3674_v40 = vmax.f32 %v2530_v31, 0.0  ;;  %v5876_v31 = vcombine.high %v8255_v16, %v8260_v44  ;;  %v3858_v42 = vmax.f32 %v3266_v8, 0.0  ;;  %v7099_v44 = vld [vmem:[%s9190_s0 + $0x3e8] sm:$0xff]  }
 0x1e1   :  { %v2525_v51 = vadd.f32 %v8035_v5, %v2524_v37  ;;  %6212 = vmatprep.subr.bf16.mxu1 %v4063_v1  ;;  %v3672_v55 = vmax.f32 %v2522_v35, 0.0  ;;  %v3257_v1 = vpop.f32.mrb[17].mxu1  ;;  %v7097_v37 = vld [vmem:[%s9190_s0 + $0x3d8] sm:$0xff]  }
 0x1e2   :  { %v3675_v54 = vmax.f32 %v2533_v0, 0.0  ;;  %6752 = vmatmul.mubr.msk.bf16.gmra.mrb[236].mxu0 %vm1398_vm0, %v7093_v32  ;;  %v6830_v29 = vpop.f32.mrb[18].mxu1  ;;  %v3258_v34 = vadd.f32 %v8035_v5, %v3257_v1 }
 0x1e3   :  { %v3673_v58 = vmax.f32 %v2525_v51, 0.0  ;;  %6755 = vmatprep.mubr.msk.bf16.mxu0 %vm1398_vm0, %v7094_v3  ;;  %v3260_v41 = vpop.f32.mrb[19].mxu1  ;;  %v3269_v28 = vadd.f32 %v8035_v5, %v6830_v29 }
 0x1e4   :  { %v8234_v25 = vpack.c.bf16 %v3675_v54, %v3674_v40  ;;  %6213 = vmatpush3.bf16.msra.mxu1 %v8125_v38  ;;  %v3852_v38 = vmax.f32 %v3242_v60, 0.0  ;;  %v3261_v3 = vadd.f32 %v8035_v5, %v3260_v41  ;;  %v3856_v43 = vmax.f32 %v3258_v34, 0.0  ;;  %v7098_v40 = vld [vmem:[%s9190_s0 + $0x3e0] sm:$0xff]   ;;  %v6833_v20 = vpop.f32.mrb[20].mxu1 }
 0x1e5   :  { %v8240_v62 = vpack.c.bf16 %v3673_v58, %v3672_v55  ;;  %v6649_v26 = vpop.f32.mrb[132].mxu0  ;;  %v3859_v48 = vmax.f32 %v3269_v28, 0.0  ;;  %v8293_v58 = vld [vmem:[%s9193_s3 + $0x20] sm:$0xff]  ;;  %v3273_v24 = vpop.f32.mrb[21].mxu1 }
 0x1e6   :  { %v2546_v45 = vadd.f32 %v8035_v5, %v6649_v26  ;;  %v2537_v17 = vpop.f32.mrb[133].mxu0  ;;  %v8265_v19 = vpack.c.bf16 %v3853_v13, %v3852_v38  ;;  %v3857_v54 = vmax.f32 %v3261_v3, 0.0 }
 0x1e7   :  { %v2538_v6 = vadd.f32 %v8035_v5, %v2537_v17  ;;  %v6650_v10 = vpop.f32.mrb[134].mxu0  ;;  %4756 = vmatmul.mubr.bf16.vlgmr.msra.gmra.mrb[124].mxu1 %v5827_v56  ;;  %v8298_v56 = vld [vmem:[%s9193_s3 + $0x80] sm:$0xff] }
 0x1e8   :  { %v2549_v14 = vadd.f32 %v8035_v5, %v6650_v10  ;;  %v2540_v15 = vpop.f32.mrb[135].mxu0  ;;  %4763 = vmatprep.mubr.bf16.mxu1 %v5852_v61  ;;  %v3678_v46 = vmax.f32 %v2546_v45, 0.0  ;;  %v8300_v61 = vpack.c.bf16 %v3859_v48, %v3858_v42  ;;  %v8303_v60 = vpack.c.bf16 %v3857_v54, %v3856_v43  ;;  %v6834_v45 = vpop.f32.mrb[22].mxu1 }
 0x1e9   :  { %v2541_v50 = vadd.f32 %v8035_v5, %v2540_v15  ;;  %v3676_v23 = vmax.f32 %v2538_v6, 0.0  ;;  %v5830_v38 = vcombine.high %v8293_v58, %v8298_v56  ;;  %v3276_v4 = vpop.f32.mrb[23].mxu1  ;;  %v3282_v10 = vadd.f32 %v8035_v5, %v6833_v20 }
 0x1ea   :  { %v3679_v21 = vmax.f32 %v2549_v14, 0.0  ;;  %6756 = vmatmul.mubr.msk.bf16.gmra.mrb[240].mxu0 %vm1398_vm0, %v7095_v63  ;;  %v3285_v13 = vadd.f32 %v8035_v5, %v6834_v45  ;;  %v3277_v18 = vadd.f32 %v8035_v5, %v3276_v4  ;;  %v6837_v34 = vpop.f32.mrb[24].mxu1 }
 0x1eb   :  { %v3677_v27 = vmax.f32 %v2541_v50, 0.0  ;;  %6759 = vmatprep.mubr.msk.bf16.mxu0 %vm1398_vm0, %v7096_v11  ;;  %v3274_v11 = vadd.f32 %v8035_v5, %v3273_v24  ;;  %v3862_v1 = vmax.f32 %v3282_v10, 0.0  ;;  %v3289_v3 = vpop.f32.mrb[25].mxu1 }
 0x1ec   :  { %v8273_v32 = vpack.c.bf16 %v3679_v21, %v3678_v46  ;;  %v3863_v21 = vmax.f32 %v3285_v13, 0.0 }
 0x1ed   :  { %v8278_v35 = vpack.c.bf16 %v3677_v27, %v3676_v23  ;;  %v6653_v39 = vpop.f32.mrb[136].mxu0  ;;  %v3860_v46 = vmax.f32 %v3274_v11, 0.0  ;;  %v7100_v27 = vld [vmem:[%s9190_s0 + $0x3f0] sm:$0xff]  }
 0x1ee   :  { %v2562_v9 = vadd.f32 %v8035_v5, %v6653_v39  ;;  %v2553_v0 = vpop.f32.mrb[137].mxu0  ;;  %v8328_v8 = vpack.c.bf16 %v3863_v21, %v3862_v1 }
 0x1ef   :  { %v2554_v51 = vadd.f32 %v8035_v5, %v2553_v0  ;;  %v6654_v53 = vpop.f32.mrb[138].mxu0  ;;  %4764 = vmatmul.mubr.bf16.gmra.mrb[128].mxu1 %v5851_v30  ;;  %v3861_v30 = vmax.f32 %v3277_v18, 0.0 }
 0x1f0   :  { %v2565_v33 = vadd.f32 %v8035_v5, %v6654_v53  ;;  %v2556_v55 = vpop.f32.mrb[139].mxu0  ;;  %4771 = vmatprep.mubr.bf16.mxu1 %v5876_v31  ;;  %v3682_v26 = vmax.f32 %v2562_v9, 0.0  ;;  %v3298_v53 = vadd.f32 %v8035_v5, %v6837_v34 }
 0x1f1   :  { %v2557_v59 = vadd.f32 %v8035_v5, %v2556_v55  ;;  %v3680_v17 = vmax.f32 %v2554_v51, 0.0  ;;  %v8331_v39 = vpack.c.bf16 %v3861_v30, %v3860_v46 }
 0x1f2   :  { %v3683_v2 = vmax.f32 %v2565_v33, 0.0  ;;  %6760 = vmatmul.mubr.msk.bf16.gmra.mrb[244].mxu0 %vm1398_vm0, %v7097_v37  ;;  %v6838_v37 = vpop.f32.mrb[26].mxu1 }
 0x1f3   :  { %v3681_v63 = vmax.f32 %v2557_v59, 0.0  ;;  %6763 = vmatprep.mubr.msk.bf16.mxu0 %vm1398_vm0, %v7098_v40  ;;  %v3292_v48 = vpop.f32.mrb[27].mxu1  ;;  %v3290_v40 = vadd.f32 %v8035_v5, %v3289_v3  ;;  %v3301_v54 = vadd.f32 %v8035_v5, %v6838_v37  ;;  %v7103_v37 = vld [vmem:[%s9190_s0 + $0x408] sm:$0xff]  }
 0x1f4   :  { %v8311_v6 = vpack.c.bf16 %v3683_v2, %v3682_v26  ;;  %v3293_v20 = vadd.f32 %v8035_v5, %v3292_v48  ;;  %v7101_v26 = vld [vmem:[%s9190_s0 + $0x3f8] sm:$0xff]   ;;  %v3866_v2 = vmax.f32 %v3298_v53, 0.0 }
 0x1f5   :  { %v8316_v14 = vpack.c.bf16 %v3681_v63, %v3680_v17  ;;  %v6657_v15 = vpop.f32.mrb[140].mxu0  ;;  %v3864_v45 = vmax.f32 %v3290_v40, 0.0  ;;  %v3867_v17 = vmax.f32 %v3301_v54, 0.0  ;;  %v7104_v54 = vld [vmem:[%s9190_s0 + $0x410] sm:$0xff]  }
 0x1f6   :  { %v2578_v50 = vadd.f32 %v8035_v5, %v6657_v15  ;;  %v2569_v16 = vpop.f32.mrb[141].mxu0  ;;  %v3865_v4 = vmax.f32 %v3293_v20, 0.0  ;;  %v6841_v15 = vpop.f32.mrb[28].mxu1 }
 0x1f7   :  { %v2570_v29 = vadd.f32 %v8035_v5, %v2569_v16  ;;  %v6658_v23 = vpop.f32.mrb[142].mxu0  ;;  %4772 = vmatmul.mubr.bf16.gmra.mrb[132].mxu1 %v5875_v22  ;;  %v8352_v13 = vpack.c.bf16 %v3867_v17, %v3866_v2  ;;  %v3305_v16 = vpop.f32.mrb[29].mxu1  ;;  %v3314_v30 = vadd.f32 %v8035_v5, %v6841_v15 }
 0x1f8   :  { %v2581_v31 = vadd.f32 %v8035_v5, %v6658_v23  ;;  %v2572_v41 = vpop.f32.mrb[143].mxu0  ;;  %4812 = vmatprep.mubr.bf16.mxu1 %v5830_v38  ;;  %v3686_v9 = vmax.f32 %v2578_v50, 0.0  ;;  %v7102_v38 = vld [vmem:[%s9190_s0 + $0x400] sm:$0xff]   ;;  %v8355_v50 = vpack.c.bf16 %v3865_v4, %v3864_v45  ;;  %v6842_v46 = vpop.f32.mrb[30].mxu1 }
 0x1f9   :  { %v2573_v28 = vadd.f32 %v8035_v5, %v2572_v41  ;;  %v3684_v42 = vmax.f32 %v2570_v29, 0.0  ;;  %v3308_v23 = vpop.f32.mrb[31].mxu1  ;;  %v3317_v41 = vadd.f32 %v8035_v5, %v6842_v46 }
 0x1fa   :  { %v3687_v0 = vmax.f32 %v2581_v31, 0.0  ;;  %6764 = vmatmul.mubr.msk.bf16.gmra.mrb[248].mxu0 %vm1398_vm0, %v7099_v44  ;;  %v3306_v31 = vadd.f32 %v8035_v5, %v3305_v16  ;;  %v3309_v3 = vadd.f32 %v8035_v5, %v3308_v23  ;;  %v7105_v23 = vld [vmem:[%s9190_s0 + $0x418] sm:$0xff]  }
 0x1fb   :  { %v3685_v43 = vmax.f32 %v2573_v28, 0.0  ;;  %6767 = vmatprep.mubr.msk.bf16.mxu0 %vm1398_vm0, %v7100_v27  ;;  %v3871_v48 = vmax.f32 %v3317_v41, 0.0 }
 0x1fc   :  { %v8335_v51 = vpack.c.bf16 %v3687_v0, %v3686_v9 }
 0x1fd   :  { %v8340_v33 = vpack.c.bf16 %v3685_v43, %v3684_v42  ;;  %v6661_v55 = vpop.f32.mrb[144].mxu0  ;;  %v3870_v42 = vmax.f32 %v3314_v30, 0.0  ;;  %v3868_v43 = vmax.f32 %v3306_v31, 0.0 }
 0x1fe   :  { %v2594_v59 = vadd.f32 %v8035_v5, %v6661_v55  ;;  %v2585_v24 = vpop.f32.mrb[145].mxu0  ;;  %v3869_v55 = vmax.f32 %v3309_v3, 0.0 }
 0x1ff   :  { %v2586_v63 = vadd.f32 %v8035_v5, %v2585_v24  ;;  %v6662_v22 = vpop.f32.mrb[146].mxu0  ;;  %v8373_v24 = vpack.c.bf16 %v3871_v48, %v3870_v42 }
 0x200   :  { %v2597_v10 = vadd.f32 %v8035_v5, %v6662_v22  ;;  %v2588_v11 = vpop.f32.mrb[147].mxu0  ;;  %v3690_v44 = vmax.f32 %v2594_v59, 0.0  ;;  %v8376_v45 = vpack.c.bf16 %v3869_v55, %v3868_v43 }
 0x201   :  { %v2589_v18 = vadd.f32 %v8035_v5, %v2588_v11  ;;  %v3688_v21 = vmax.f32 %v2586_v63, 0.0 }
 0x202   :  { %v3691_v1 = vmax.f32 %v2597_v10, 0.0  ;;  %6768 = vmatmul.mubr.msk.bf16.gmra.mrb[252].mxu0 %vm1398_vm0, %v7101_v26  ;;  %v6845_v26 = vpop.f32.mrb[32].mxu1 }
 0x203   :  { %v3689_v29 = vmax.f32 %v2589_v18, 0.0  ;;  %6771 = vmatprep.mubr.msk.bf16.mxu0 %vm1398_vm0, %v7102_v38  ;;  %v3321_v17 = vpop.f32.mrb[33].mxu1  ;;  %v3330_v15 = vadd.f32 %v8035_v5, %v6845_v26 }
 0x204   :  { %v4073_v27 = vpack.c.bf16 %v3691_v1, %v3690_v44  ;;  %v6846_v38 = vpop.f32.mrb[34].mxu1  ;;  %v3322_v18 = vadd.f32 %v8035_v5, %v3321_v17 }
 0x205   :  { %v4072_v34 = vpack.c.bf16 %v3689_v29, %v3688_v21  ;;  %v6665_v28 = vpop.f32.mrb[148].mxu0  ;;  %v3324_v11 = vpop.f32.mrb[35].mxu1  ;;  %v3333_v16 = vadd.f32 %v8035_v5, %v6846_v38 }
 0x206   :  { %v2610_v9 = vadd.f32 %v8035_v5, %v6665_v28  ;;  %v2601_v0 = vpop.f32.mrb[149].mxu0  ;;  %v3325_v46 = vadd.f32 %v8035_v5, %v3324_v11  ;;  %v3872_v30 = vmax.f32 %v3322_v18, 0.0  ;;  %v7107_v11 = vld [vmem:[%s9190_s0 + $0x428] sm:$0xff]  }
 0x207   :  { %v2602_v53 = vadd.f32 %v8035_v5, %v2601_v0  ;;  %v6666_v40 = vpop.f32.mrb[150].mxu0  ;;  %6232 = vmatprep.subr.bf16.mxu1 %v4072_v34  ;;  %v7106_v34 = vld [vmem:[%s9190_s0 + $0x420] sm:$0xff]  }
 0x208   :  { %v2613_v20 = vadd.f32 %v8035_v5, %v6666_v40  ;;  %v2604_v59 = vpop.f32.mrb[151].mxu0  ;;  %6233 = vmatpush3.bf16.msra.mxu1 %v8240_v62  ;;  %v3694_v63 = vmax.f32 %v2610_v9, 0.0  ;;  %v3873_v28 = vmax.f32 %v3325_v46, 0.0 }
 0x209   :  { %v2605_v2 = vadd.f32 %v8035_v5, %v2604_v59  ;;  %6234 = vmatprep.subr.bf16.mxu1 %v4073_v27  ;;  %v3692_v4 = vmax.f32 %v2602_v53, 0.0  ;;  %v3874_v27 = vmax.f32 %v3330_v15, 0.0 }
 0x20a   :  { %v3695_v22 = vmax.f32 %v2613_v20, 0.0  ;;  %6772 = vmatmul.mubr.msk.bf16.gmra.mrb[0].mxu0 %vm1398_vm0, %v7103_v37  ;;  %v6849_v37 = vpop.f32.mrb[36].mxu1  ;;  %v8398_v43 = vpack.c.bf16 %v3873_v28, %v3872_v30 }
 0x20b   :  { %v3693_v10 = vmax.f32 %v2605_v2, 0.0  ;;  %6775 = vmatprep.mubr.msk.bf16.mxu0 %vm1398_vm0, %v7104_v54  ;;  %v3337_v48 = vpop.f32.mrb[37].mxu1  ;;  %v3346_v26 = vadd.f32 %v8035_v5, %v6849_v37 }
 0x20c   :  { %v4075_v62 = vpack.c.bf16 %v3695_v22, %v3694_v63  ;;  %6235 = vmatpush3.bf16.msra.mxu1 %v8234_v25  ;;  %v3875_v25 = vmax.f32 %v3333_v16, 0.0  ;;  %v6850_v54 = vpop.f32.mrb[38].mxu1  ;;  %v3338_v2 = vadd.f32 %v8035_v5, %v3337_v48 }
 0x20d   :  { %v4074_v44 = vpack.c.bf16 %v3693_v10, %v3692_v4  ;;  %v6669_v1 = vpop.f32.mrb[152].mxu0  ;;  %v3340_v59 = vpop.f32.mrb[39].mxu1  ;;  %v3349_v17 = vadd.f32 %v8035_v5, %v6850_v54 }
 0x20e   :  { %v2626_v21 = vadd.f32 %v8035_v5, %v6669_v1  ;;  %v2617_v29 = vpop.f32.mrb[153].mxu0  ;;  %v8395_v0 = vpack.c.bf16 %v3875_v25, %v3874_v27  ;;  %v3341_v38 = vadd.f32 %v8035_v5, %v3340_v59  ;;  %v3876_v15 = vmax.f32 %v3338_v2, 0.0  ;;  %v7109_v59 = vld [vmem:[%s9190_s0 + $0x438] sm:$0xff]  }
 0x20f   :  { %v2618_v31 = vadd.f32 %v8035_v5, %v2617_v29  ;;  %v6670_v41 = vpop.f32.mrb[154].mxu0  ;;  %6236 = vmatprep.subr.bf16.mxu1 %v4074_v44  ;;  %v7108_v44 = vld [vmem:[%s9190_s0 + $0x430] sm:$0xff]  }
 0x210   :  { %v2629_v3 = vadd.f32 %v8035_v5, %v6670_v41  ;;  %v2620_v9 = vpop.f32.mrb[155].mxu0  ;;  %6237 = vmatpush3.bf16.msra.mxu1 %v8278_v35  ;;  %v3698_v53 = vmax.f32 %v2626_v21, 0.0  ;;  %v3877_v1 = vmax.f32 %v3341_v38, 0.0  ;;  %v8440_v38 = vld [vmem:[%s9192_s2] ss:$0 sm:$0xff] }
 0x211   :  { %v2621_v42 = vadd.f32 %v8035_v5, %v2620_v9  ;;  %6238 = vmatprep.subr.bf16.mxu1 %v4075_v62  ;;  %v3696_v55 = vmax.f32 %v2618_v31, 0.0  ;;  %v3878_v62 = vmax.f32 %v3346_v26, 0.0 }
 0x212   :  { %v3699_v40 = vmax.f32 %v2629_v3, 0.0  ;;  %6776 = vmatmul.mubr.msk.bf16.gmra.mrb[4].mxu0 %vm1398_vm0, %v7105_v23  ;;  %v6853_v23 = vpop.f32.mrb[40].mxu1  ;;  %v8420_v30 = vpack.c.bf16 %v3877_v1, %v3876_v15 }
 0x213   :  { %v3697_v20 = vmax.f32 %v2621_v42, 0.0  ;;  %6779 = vmatprep.mubr.msk.bf16.mxu0 %vm1398_vm0, %v7106_v34  ;;  %v3353_v25 = vpop.f32.mrb[41].mxu1  ;;  %v3362_v37 = vadd.f32 %v8035_v5, %v6853_v23  ;;  %v5829_v23 = vcombine.low %v8293_v58, %v8298_v56 }
 0x214   :  { %v4077_v35 = vpack.c.bf16 %v3699_v40, %v3698_v53  ;;  %6239 = vmatpush3.bf16.msra.mxu1 %v8273_v32  ;;  %v3879_v32 = vmax.f32 %v3349_v17, 0.0  ;;  %9200 = vst [vmem:[#allocation6_spill] sm:$0xff] %v8420_v30  ;;  %v6854_v34 = vpop.f32.mrb[42].mxu1  ;;  %v3354_v42 = vadd.f32 %v8035_v5, %v3353_v25 }
 0x215   :  { %v4076_v63 = vpack.c.bf16 %v3697_v20, %v3696_v55  ;;  %v6673_v22 = vpop.f32.mrb[156].mxu0  ;;  %v3356_v9 = vpop.f32.mrb[43].mxu1  ;;  %v3365_v48 = vadd.f32 %v8035_v5, %v6854_v34 }
 0x216   :  { %v2642_v4 = vadd.f32 %v8035_v5, %v6673_v22  ;;  %v2633_v10 = vpop.f32.mrb[157].mxu0  ;;  %v8417_v29 = vpack.c.bf16 %v3879_v32, %v3878_v62  ;;  %v3357_v54 = vadd.f32 %v8035_v5, %v3356_v9  ;;  %v3880_v26 = vmax.f32 %v3354_v42, 0.0  ;;  %v6857_v15 = vpop.f32.mrb[44].mxu1 }
 0x217   :  { %v2634_v18 = vadd.f32 %v8035_v5, %v2633_v10  ;;  %v6674_v16 = vpop.f32.mrb[158].mxu0  ;;  %6240 = vmatprep.subr.bf16.mxu1 %v4076_v63  ;;  %v7110_v63 = vld [vmem:[%s9190_s0 + $0x440] sm:$0xff]  }
 0x218   :  { %v2645_v46 = vadd.f32 %v8035_v5, %v6674_v16  ;;  %v2636_v21 = vpop.f32.mrb[159].mxu0  ;;  %6241 = vmatpush3.bf16.msra.mxu1 %v8316_v14  ;;  %9199 = vst [vmem:[#allocation5_spill] sm:$0xff] %v8417_v29  ;;  %v3702_v31 = vmax.f32 %v2642_v4, 0.0  ;;  %v3881_v22 = vmax.f32 %v3357_v54, 0.0  ;;  %v3369_v16 = vpop.f32.mrb[45].mxu1 }
 0x219   :  { %v2637_v27 = vadd.f32 %v8035_v5, %v2636_v21  ;;  %6242 = vmatprep.subr.bf16.mxu1 %v4077_v35  ;;  %v3700_v28 = vmax.f32 %v2634_v18, 0.0  ;;  %v3882_v35 = vmax.f32 %v3362_v37, 0.0  ;;  %v6858_v1 = vpop.f32.mrb[46].mxu1  ;;  %v3370_v34 = vadd.f32 %v8440_v38, %v3369_v16  ;;  %v7111_v37 = vld [vmem:[%s9190_s0 + $0x448] sm:$0xff]  }
 0x21a   :  { %v3703_v41 = vmax.f32 %v2645_v46, 0.0  ;;  %6780 = vmatmul.mubr.msk.bf16.gmra.mrb[8].mxu0 %vm1398_vm0, %v7107_v11  ;;  %v8452_v11 = vld [vmem:[%s9193_s3 + $0x140] sm:$0xff]  ;;  %v8457_v18 = vpack.c.bf16 %v3881_v22, %v3880_v26  ;;  %v3372_v25 = vpop.f32.mrb[47].mxu1 }
 0x21b   :  { %v3701_v3 = vmax.f32 %v2637_v27, 0.0  ;;  %6783 = vmatprep.mubr.msk.bf16.mxu0 %vm1398_vm0, %v7108_v44 }
 0x21c   :  { %v4079_v14 = vpack.c.bf16 %v3703_v41, %v3702_v31  ;;  %6243 = vmatpush3.bf16.msra.mxu1 %v8311_v6  ;;  %v3883_v6 = vmax.f32 %v3365_v48, 0.0  ;;  %v3378_v41 = vadd.f32 %v8440_v38, %v6857_v15 }
 0x21d   :  { %v4078_v53 = vpack.c.bf16 %v3701_v3, %v3700_v28  ;;  %v6677_v40 = vpop.f32.mrb[160].mxu0  ;;  %v3381_v28 = vadd.f32 %v8440_v38, %v6858_v1 }
 0x21e   :  { %v2658_v55 = vadd.f32 %v8035_v5, %v6677_v40  ;;  %v2649_v20 = vpop.f32.mrb[161].mxu0  ;;  %v8454_v62 = vpack.c.bf16 %v3883_v6, %v3882_v35  ;;  %v3886_v42 = vmax.f32 %v3378_v41, 0.0  ;;  %v8486_v6 = vld [vmem:[%s9193_s3 + $0x1a0] sm:$0xff] }
 0x21f   :  { %v2650_v2 = vadd.f32 %v8035_v5, %v2649_v20  ;;  %v6678_v17 = vpop.f32.mrb[162].mxu0  ;;  %6244 = vmatprep.subr.bf16.mxu1 %v4078_v53  ;;  %v8447_v5 = vld [vmem:[%s9193_s3 + $0xe0] sm:$0xff]  ;;  %v3887_v48 = vmax.f32 %v3381_v28, 0.0  ;;  %v6861_v53 = vpop.f32.mrb[48].mxu1 }
 0x220   :  { %v2661_v4 = vadd.f32 %v8440_v38, %v6678_v17  ;;  %v2652_v10 = vpop.f32.mrb[163].mxu0  ;;  %6245 = vmatpush3.bf16.msra.mxu1 %v8340_v33  ;;  %v3706_v33 = vmax.f32 %v2658_v55, 0.0  ;;  %v5854_v27 = vcombine.high %v8447_v5, %v8452_v11  ;;  %v7112_v55 = vld [vmem:[%s9190_s0 + $0x450] sm:$0xff]  }
 0x221   :  { %v2653_v32 = vadd.f32 %v8440_v38, %v2652_v10  ;;  %6246 = vmatprep.subr.bf16.mxu1 %v4079_v14  ;;  %v3704_v46 = vmax.f32 %v2650_v2, 0.0  ;;  %v3373_v14 = vadd.f32 %v8440_v38, %v3372_v25  ;;  %v8491_v2 = vld [vmem:[%s9193_s3 + $0x200] sm:$0xff]  ;;  %v8493_v17 = vpack.c.bf16 %v3887_v48, %v3886_v42  ;;  %v7113_v48 = vld [vmem:[%s9190_s0 + $0x458] sm:$0xff]  }
 0x222   :  { %v3707_v44 = vmax.f32 %v2661_v4, 0.0  ;;  %6784 = vmatmul.mubr.msk.bf16.gmra.mrb[12].mxu0 %vm1398_vm0, %v7109_v59  ;;  %v3385_v59 = vpop.f32.mrb[49].mxu1  ;;  %v3394_v10 = vadd.f32 %v8440_v38, %v6861_v53 }
 0x223   :  { %v3705_v21 = vmax.f32 %v2653_v32, 0.0  ;;  %6787 = vmatprep.mubr.msk.bf16.mxu0 %vm1398_vm0, %v7110_v63  ;;  %v3885_v20 = vmax.f32 %v3373_v14, 0.0  ;;  %v6862_v63 = vpop.f32.mrb[50].mxu1  ;;  %v3386_v41 = vadd.f32 %v8440_v38, %v3385_v59 }
 0x224   :  { %v8465_v31 = vpack.c.bf16 %v3707_v44, %v3706_v33  ;;  %6247 = vmatpush3.bf16.msra.mxu1 %v8335_v51  ;;  %v3884_v51 = vmax.f32 %v3370_v34, 0.0  ;;  %v3388_v15 = vpop.f32.mrb[51].mxu1  ;;  %v5853_v33 = vcombine.low %v8447_v5, %v8452_v11  ;;  %v3397_v34 = vadd.f32 %v8440_v38, %v6862_v63 }
 0x225   :  { %v8471_v3 = vpack.c.bf16 %v3705_v21, %v3704_v46  ;;  %v6681_v9 = vpop.f32.mrb[164].mxu0  ;;  %v6865_v44 = vpop.f32.mrb[52].mxu1  ;;  %v5878_v21 = vcombine.high %v8486_v6, %v8491_v2  ;;  %v3389_v28 = vadd.f32 %v8440_v38, %v3388_v15  ;;  %v3888_v53 = vmax.f32 %v3386_v41, 0.0 }
 0x226   :  { %v2674_v58 = vadd.f32 %v8440_v38, %v6681_v9  ;;  %v2665_v56 = vpop.f32.mrb[165].mxu0  ;;  %v8496_v4 = vpack.c.bf16 %v3885_v20, %v3884_v51  ;;  %v3410_v14 = vadd.f32 %v8440_v38, %v6865_v44 }
 0x227   :  { %v2666_v40 = vadd.f32 %v8440_v38, %v2665_v56  ;;  %v6682_v54 = vpop.f32.mrb[166].mxu0  ;;  %4813 = vmatmul.mubr.bf16.vlgmr.msra.gmra.mrb[136].mxu1 %v5829_v23  ;;  %v3890_v23 = vmax.f32 %v3394_v10, 0.0 }
 0x228   :  { %v2677_v35 = vadd.f32 %v8440_v38, %v6682_v54  ;;  %v2668_v26 = vpop.f32.mrb[167].mxu0  ;;  %4820 = vmatprep.mubr.bf16.mxu1 %v5854_v27  ;;  %v3710_v32 = vmax.f32 %v2674_v58, 0.0  ;;  %v3401_v27 = vpop.f32.mrb[53].mxu1  ;;  %v3889_v54 = vmax.f32 %v3389_v28, 0.0 }
 0x229   :  { %v2669_v22 = vadd.f32 %v8440_v38, %v2668_v26  ;;  %v3708_v1 = vmax.f32 %v2666_v40, 0.0  ;;  %v6866_v9 = vpop.f32.mrb[54].mxu1  ;;  %v3402_v58 = vadd.f32 %v8440_v38, %v3401_v27  ;;  %v3891_v40 = vmax.f32 %v3397_v34, 0.0 }
 0x22a   :  { %v3711_v16 = vmax.f32 %v2677_v35, 0.0  ;;  %6788 = vmatmul.mubr.msk.bf16.gmra.mrb[16].mxu0 %vm1398_vm0, %v7111_v37  ;;  %v3413_v56 = vadd.f32 %v8440_v38, %v6866_v9  ;;  %v3404_v37 = vpop.f32.mrb[55].mxu1  ;;  %v7114_v35 = vld [vmem:[%s9190_s0 + $0x460] sm:$0xff]   ;;  %v3894_v26 = vmax.f32 %v3410_v14, 0.0 }
 0x22b   :  { %v3709_v46 = vmax.f32 %v2669_v22, 0.0  ;;  %6791 = vmatprep.mubr.msk.bf16.mxu0 %vm1398_vm0, %v7112_v55  ;;  %v6869_v55 = vpop.f32.mrb[56].mxu1  ;;  %v3892_v27 = vmax.f32 %v3402_v58, 0.0 }
 0x22c   :  { %v8505_v25 = vpack.c.bf16 %v3711_v16, %v3710_v32  ;;  %v3895_v63 = vmax.f32 %v3413_v56, 0.0  ;;  %v3417_v22 = vpop.f32.mrb[57].mxu1  ;;  %v8524_v32 = vpack.c.bf16 %v3891_v40, %v3890_v23  ;;  %v8526_v16 = vpack.c.bf16 %v3889_v54, %v3888_v53 }
 0x22d   :  { %v8510_v5 = vpack.c.bf16 %v3709_v46, %v3708_v1  ;;  %v6685_v11 = vpop.f32.mrb[168].mxu0  ;;  %v6870_v44 = vpop.f32.mrb[58].mxu1  ;;  %v8532_v46 = vld [vmem:[%s9193_s3 + $0x28] sm:$0xff]  ;;  %v3426_v9 = vadd.f32 %v8440_v38, %v6869_v55 }
 0x22e   :  { %v2690_v42 = vadd.f32 %v8440_v38, %v6685_v11  ;;  %v2681_v51 = vpop.f32.mrb[169].mxu0  ;;  %v8539_v41 = vpack.c.bf16 %v3895_v63, %v3894_v26  ;;  %v3420_v23 = vpop.f32.mrb[59].mxu1 }
 0x22f   :  { %v2682_v20 = vadd.f32 %v8440_v38, %v2681_v51  ;;  %v6686_v59 = vpop.f32.mrb[170].mxu0  ;;  %4821 = vmatmul.mubr.bf16.gmra.mrb[140].mxu1 %v5853_v33  ;;  %v8537_v33 = vld [vmem:[%s9193_s3 + $0x88] sm:$0xff]  ;;  %v6873_v11 = vpop.f32.mrb[60].mxu1  ;;  %v5877_v51 = vcombine.low %v8486_v6, %v8491_v2  ;;  %v3421_v6 = vadd.f32 %v8440_v38, %v3420_v23 }
 0x230   :  { %v2693_v10 = vadd.f32 %v8440_v38, %v6686_v59  ;;  %v2684_v15 = vpop.f32.mrb[171].mxu0  ;;  %4828 = vmatprep.mubr.bf16.mxu1 %v5878_v21  ;;  %9201 = vst [vmem:[#allocation7_spill] sm:$0xff] %v8539_v41  ;;  %v3405_v21 = vadd.f32 %v8440_v38, %v3404_v37  ;;  %v3714_v34 = vmax.f32 %v2690_v42, 0.0  ;;  %v3433_v53 = vpop.f32.mrb[61].mxu1  ;;  %v5832_v37 = vcombine.high %v8532_v46, %v8537_v33 }
 0x231   :  { %v2685_v1 = vadd.f32 %v8440_v38, %v2684_v15  ;;  %v3712_v14 = vmax.f32 %v2682_v20, 0.0  ;;  %v3898_v42 = vmax.f32 %v3426_v9, 0.0  ;;  %v6874_v54 = vpop.f32.mrb[62].mxu1 }
 0x232   :  { %v3715_v28 = vmax.f32 %v2693_v10, 0.0  ;;  %6792 = vmatmul.mubr.msk.bf16.gmra.mrb[20].mxu0 %vm1398_vm0, %v7113_v48  ;;  %v3893_v58 = vmax.f32 %v3405_v21, 0.0  ;;  %v3418_v48 = vadd.f32 %v8440_v38, %v3417_v22  ;;  %v3436_v2 = vpop.f32.mrb[63].mxu1  ;;  %v7115_v10 = vld [vmem:[%s9190_s0 + $0x468] sm:$0xff]   ;;  %v3442_v22 = vadd.f32 %v8440_v38, %v6873_v11 }
 0x233   :  { %v3713_v56 = vmax.f32 %v2685_v1, 0.0  ;;  %6795 = vmatprep.mubr.msk.bf16.mxu0 %vm1398_vm0, %v7114_v35  ;;  %v3429_v35 = vadd.f32 %v8440_v38, %v6870_v44  ;;  %v3434_v1 = vadd.f32 %v8440_v38, %v3433_v53  ;;  %v6877_v21 = vpop.f32.mrb[64].mxu1  ;;  %v7116_v44 = vld [vmem:[%s9190_s0 + $0x470] sm:$0xff]   ;;  %v3445_v9 = vadd.f32 %v8440_v38, %v6874_v54 }
 0x234   :  { %v8547_v40 = vpack.c.bf16 %v3715_v28, %v3714_v34  ;;  %v8554_v59 = vpack.c.bf16 %v3893_v58, %v3892_v27  ;;  %v3896_v15 = vmax.f32 %v3418_v48, 0.0  ;;  %v3897_v28 = vmax.f32 %v3421_v6, 0.0 }
 0x235   :  { %v8552_v55 = vpack.c.bf16 %v3713_v56, %v3712_v14  ;;  %v6689_v20 = vpop.f32.mrb[172].mxu0  ;;  %v3899_v23 = vmax.f32 %v3429_v35, 0.0  ;;  %v3449_v14 = vpop.f32.mrb[65].mxu1  ;;  %v3902_v53 = vmax.f32 %v3442_v22, 0.0  ;;  %v3900_v41 = vmax.f32 %v3434_v1, 0.0 }
 0x236   :  { %9202 = vst [vmem:[#allocation8_spill] sm:$0xff] %v8554_v59  ;;  %v2706_v26 = vadd.f32 %v8440_v38, %v6689_v20  ;;  %v2697_v63 = vpop.f32.mrb[173].mxu0  ;;  %v6878_v48 = vpop.f32.mrb[66].mxu1  ;;  %v8573_v29 = vpack.c.bf16 %v3897_v28, %v3896_v15  ;;  %v3903_v54 = vmax.f32 %v3445_v9, 0.0  ;;  %v3437_v6 = vadd.f32 %v8440_v38, %v3436_v2 }
 0x237   :  { %v2698_v27 = vadd.f32 %v8440_v38, %v2697_v63  ;;  %v6690_v34 = vpop.f32.mrb[174].mxu0  ;;  %4829 = vmatmul.mubr.bf16.gmra.mrb[144].mxu1 %v5877_v51  ;;  %v8571_v63 = vpack.c.bf16 %v3899_v23, %v3898_v42  ;;  %v3452_v51 = vpop.f32.mrb[67].mxu1  ;;  %v3450_v2 = vadd.f32 %v8440_v38, %v3449_v14 }
 0x238   :  { %v3718_v56 = vmax.f32 %v2706_v26, 0.0  ;;  %v2709_v58 = vadd.f32 %v8440_v38, %v6690_v34  ;;  %v2700_v11 = vpop.f32.mrb[175].mxu0  ;;  %4869 = vmatprep.mubr.bf16.mxu1 %v5832_v37  ;;  %9204 = vst [vmem:[#allocation10_spill] sm:$0xff] %v8573_v29  ;;  %v3458_v26 = vadd.f32 %v8440_v38, %v6877_v21  ;;  %v6881_v34 = vpop.f32.mrb[68].mxu1  ;;  %v8581_v15 = vpack.c.bf16 %v3903_v54, %v3902_v53 }
 0x239   :  { %v2701_v20 = vadd.f32 %v8440_v38, %v2700_v11  ;;  %9203 = vst [vmem:[#allocation9_spill] sm:$0xff] %v8571_v63  ;;  %v3716_v37 = vmax.f32 %v2698_v27, 0.0  ;;  %v3465_v11 = vpop.f32.mrb[69].mxu1  ;;  %v3901_v1 = vmax.f32 %v3437_v6, 0.0  ;;  %v3461_v21 = vadd.f32 %v8440_v38, %v6878_v48 }
 0x23a   :  { %v3719_v35 = vmax.f32 %v2709_v58, 0.0  ;;  %6796 = vmatmul.mubr.msk.bf16.gmra.mrb[24].mxu0 %vm1398_vm0, %v7115_v10  ;;  %9205 = vst [vmem:[#allocation11_spill] sm:$0xff] %v8581_v15  ;;  %v3906_v23 = vmax.f32 %v3458_v26, 0.0  ;;  %v6882_v28 = vpop.f32.mrb[70].mxu1  ;;  %v3453_v27 = vadd.f32 %v8440_v38, %v3452_v51  ;;  %v3466_v54 = vadd.f32 %v8440_v38, %v3465_v11  ;;  %v7118_v51 = vld [vmem:[%s9190_s0 + $0x480] sm:$0xff]  }
 0x23b   :  { %v3717_v22 = vmax.f32 %v2701_v20, 0.0  ;;  %6799 = vmatprep.mubr.msk.bf16.mxu0 %vm1398_vm0, %v7116_v44  ;;  %v3468_v9 = vpop.f32.mrb[71].mxu1  ;;  %v8592_v53 = vpack.c.bf16 %v3901_v1, %v3900_v41  ;;  %v3904_v26 = vmax.f32 %v3450_v2, 0.0  ;;  %v3477_v2 = vadd.f32 %v8440_v38, %v6882_v28 }
 0x23c   :  { %v8579_v42 = vpack.c.bf16 %v3719_v35, %v3718_v56  ;;  %v7117_v56 = vld [vmem:[%s9190_s0 + $0x478] sm:$0xff]   ;;  %v3474_v35 = vadd.f32 %v8440_v38, %v6881_v34  ;;  %v6885_v6 = vpop.f32.mrb[72].mxu1  ;;  %v3908_v29 = vmax.f32 %v3466_v54, 0.0 }
 0x23d   :  { %v8583_v58 = vpack.c.bf16 %v3717_v22, %v3716_v37  ;;  %v6693_v10 = vpop.f32.mrb[176].mxu0  ;;  %9206 = vst [vmem:[#allocation12_spill] sm:$0xff] %v8592_v53  ;;  %v3907_v37 = vmax.f32 %v3461_v21, 0.0  ;;  %v3905_v22 = vmax.f32 %v3453_v27, 0.0  ;;  %v3469_v21 = vadd.f32 %v8440_v38, %v3468_v9 }
 0x23e   :  { %v2722_v44 = vadd.f32 %v8440_v38, %v6693_v10  ;;  %v2713_v20 = vpop.f32.mrb[177].mxu0  ;;  %v3481_v10 = vpop.f32.mrb[73].mxu1  ;;  %v3910_v53 = vmax.f32 %v3474_v35, 0.0  ;;  %v3490_v27 = vadd.f32 %v8440_v38, %v6885_v6 }
 0x23f   :  { %v2714_v14 = vadd.f32 %v8440_v38, %v2713_v20  ;;  %v6694_v48 = vpop.f32.mrb[178].mxu0  ;;  %v6886_v34 = vpop.f32.mrb[74].mxu1  ;;  %v8602_v63 = vpack.c.bf16 %v3907_v37, %v3906_v23  ;;  %v8604_v20 = vpack.c.bf16 %v3905_v22, %v3904_v26  ;;  %v3911_v26 = vmax.f32 %v3477_v2, 0.0 }
 0x240   :  { %v3722_v15 = vmax.f32 %v2722_v44, 0.0  ;;  %v2725_v41 = vadd.f32 %v8440_v38, %v6694_v48  ;;  %v2716_v1 = vpop.f32.mrb[179].mxu0  ;;  %v3484_v30 = vpop.f32.mrb[75].mxu1  ;;  %v3909_v22 = vmax.f32 %v3469_v21, 0.0  ;;  %v3914_v54 = vmax.f32 %v3490_v27, 0.0 }
 0x241   :  { %v2717_v11 = vadd.f32 %v8440_v38, %v2716_v1  ;;  %9207 = vst [vmem:[#allocation13_spill] sm:$0xff] %v8602_v63  ;;  %9208 = vst [vmem:[#allocation14_spill] sm:$0xff] %v8604_v20  ;;  %v6889_v44 = vpop.f32.mrb[76].mxu1  ;;  %v3720_v35 = vmax.f32 %v2714_v14, 0.0  ;;  %v3493_v28 = vadd.f32 %v8440_v38, %v6886_v34  ;;  %v3485_v9 = vadd.f32 %v8440_v38, %v3484_v30  ;;  %v7120_v30 = vld [vmem:[%s9190_s0 + $0x490] sm:$0xff]  }
 0x242   :  { %v3723_v59 = vmax.f32 %v2725_v41, 0.0  ;;  %6800 = vmatmul.mubr.msk.bf16.gmra.mrb[28].mxu0 %vm1398_vm0, %v7117_v56  ;;  %v3497_v23 = vpop.f32.mrb[77].mxu1  ;;  %v3482_v56 = vadd.f32 %v8440_v38, %v3481_v10  ;;  %v3506_v2 = vadd.f32 %v8440_v38, %v6889_v44 }
 0x243   :  { %v3721_v48 = vmax.f32 %v2717_v11, 0.0  ;;  %6803 = vmatprep.mubr.msk.bf16.mxu0 %vm1398_vm0, %v7118_v51  ;;  %v6890_v1 = vpop.f32.mrb[78].mxu1  ;;  %v8620_v51 = vpack.c.bf16 %v3909_v22, %v3908_v29  ;;  %v3915_v27 = vmax.f32 %v3493_v28, 0.0  ;;  %v3498_v44 = vadd.f32 %v8440_v38, %v3497_v23 }
 0x244   :  { %v4089_v37 = vpack.c.bf16 %v3723_v59, %v3722_v15  ;;  %v3500_v6 = vpop.f32.mrb[79].mxu1  ;;  %v7119_v59 = vld [vmem:[%s9190_s0 + $0x488] sm:$0xff]   ;;  %v8618_v15 = vpack.c.bf16 %v3911_v26, %v3910_v53 }
 0x245   :  { %v4088_v41 = vpack.c.bf16 %v3721_v48, %v3720_v35  ;;  %v6697_v63 = vpop.f32.mrb[180].mxu0  ;;  %9210 = vst [vmem:[#allocation16_spill] sm:$0xff] %v8620_v51  ;;  %v6893_v21 = vpop.f32.mrb[80].mxu1  ;;  %v3913_v35 = vmax.f32 %v3485_v9, 0.0 }
 0x246   :  { %v2738_v14 = vadd.f32 %v8440_v38, %v6697_v63  ;;  %v2729_v11 = vpop.f32.mrb[181].mxu0  ;;  %9209 = vst [vmem:[#allocation15_spill] sm:$0xff] %v8618_v15  ;;  %v3912_v63 = vmax.f32 %v3482_v56, 0.0  ;;  %v3513_v48 = vpop.f32.mrb[81].mxu1  ;;  %v3918_v56 = vmax.f32 %v3506_v2, 0.0 }
 0x247   :  { %v2730_v10 = vadd.f32 %v8440_v38, %v2729_v11  ;;  %v6698_v34 = vpop.f32.mrb[182].mxu0  ;;  %6266 = vmatprep.subr.bf16.mxu1 %v4088_v41  ;;  %v6894_v26 = vpop.f32.mrb[82].mxu1  ;;  %v8631_v41 = vpack.c.bf16 %v3915_v27, %v3914_v54 }
 0x248   :  { %v3726_v20 = vmax.f32 %v2738_v14, 0.0  ;;  %v2741_v53 = vadd.f32 %v8440_v38, %v6698_v34  ;;  %v2732_v29 = vpop.f32.mrb[183].mxu0  ;;  %6267 = vmatpush3.bf16.msra.mxu1 %v8471_v3  ;;  %v8633_v11 = vpack.c.bf16 %v3913_v35, %v3912_v63  ;;  %v3516_v28 = vpop.f32.mrb[83].mxu1  ;;  %v3916_v14 = vmax.f32 %v3498_v44, 0.0 }
 0x249   :  { %v2733_v22 = vadd.f32 %v8440_v38, %v2732_v29  ;;  %6268 = vmatprep.subr.bf16.mxu1 %v4089_v37  ;;  %9211 = vst [vmem:[#allocation17_spill] sm:$0xff] %v8631_v41  ;;  %v3509_v34 = vadd.f32 %v8440_v38, %v6890_v1  ;;  %v3501_v3 = vadd.f32 %v8440_v38, %v3500_v6  ;;  %v6897_v15 = vpop.f32.mrb[84].mxu1  ;;  %v3724_v23 = vmax.f32 %v2730_v10, 0.0 }
 0x24a   :  { %v3727_v9 = vmax.f32 %v2741_v53, 0.0  ;;  %6804 = vmatmul.mubr.msk.bf16.gmra.mrb[32].mxu0 %vm1398_vm0, %v7119_v59  ;;  %v3522_v37 = vadd.f32 %v8440_v38, %v6893_v21  ;;  %v3529_v54 = vpop.f32.mrb[85].mxu1  ;;  %v3514_v59 = vadd.f32 %v8440_v38, %v3513_v48  ;;  %v3525_v6 = vadd.f32 %v8440_v38, %v6894_v26 }
 0x24b   :  { %v3725_v51 = vmax.f32 %v2733_v22, 0.0  ;;  %6807 = vmatprep.mubr.msk.bf16.mxu0 %vm1398_vm0, %v7120_v30  ;;  %v3919_v2 = vmax.f32 %v3509_v34, 0.0  ;;  %v3917_v27 = vmax.f32 %v3501_v3, 0.0  ;;  %v6898_v35 = vpop.f32.mrb[86].mxu1  ;;  %v3517_v10 = vadd.f32 %v8440_v38, %v3516_v28 }
 0x24c   :  { %v4091_v63 = vpack.c.bf16 %v3727_v9, %v3726_v20  ;;  %6269 = vmatpush3.bf16.msra.mxu1 %v8465_v31  ;;  %v3922_v29 = vmax.f32 %v3522_v37, 0.0  ;;  %v3532_v44 = vpop.f32.mrb[87].mxu1  ;;  %v7121_v31 = vld [vmem:[%s9190_s0 + $0x498] sm:$0xff]   ;;  %v3920_v48 = vmax.f32 %v3514_v59, 0.0  ;;  %v3923_v26 = vmax.f32 %v3525_v6, 0.0 }
 0x24d   :  { %v4090_v53 = vpack.c.bf16 %v3725_v51, %v3724_v23  ;;  %v6701_v1 = vpop.f32.mrb[184].mxu0  ;;  %v8648_v20 = vpack.c.bf16 %v3919_v2, %v3918_v56  ;;  %v8650_v22 = vpack.c.bf16 %v3917_v27, %v3916_v14  ;;  %v6112_v51 = vpop.f32.mrb[88].mxu1  ;;  %v3921_v28 = vmax.f32 %v3517_v10, 0.0 }
 0x24e   :  { %v2754_v30 = vadd.f32 %v8440_v38, %v6701_v1  ;;  %v2745_v21 = vpop.f32.mrb[185].mxu0  ;;  %v3538_v3 = vadd.f32 %v8440_v38, %v6897_v15  ;;  %v6113_v23 = vpop.f32.mrb[89].mxu1  ;;  %v3530_v56 = vadd.f32 %v8440_v38, %v3529_v54  ;;  %v3541_v14 = vadd.f32 %v8440_v38, %v6898_v35 }
 0x24f   :  { %9212 = vst [vmem:[#allocation18_spill] sm:$0xff] %v8648_v20  ;;  %9213 = vst [vmem:[#allocation19_spill] sm:$0xff] %v8650_v22  ;;  %v2746_v9 = vadd.f32 %v8440_v38, %v2745_v21  ;;  %v6702_v34 = vpop.f32.mrb[186].mxu0  ;;  %6270 = vmatprep.subr.bf16.mxu1 %v4090_v53  ;;  %v6115_v2 = vpop.f32.mrb[90].mxu1  ;;  %v8659_v59 = vpack.c.bf16 %v3923_v26, %v3922_v29  ;;  %v8661_v53 = vpack.c.bf16 %v3921_v28, %v3920_v48 }
 0x250   :  { %v2757_v37 = vadd.f32 %v8440_v38, %v6702_v34  ;;  %v2748_v1 = vpop.f32.mrb[187].mxu0  ;;  %6271 = vmatpush3.bf16.msra.mxu1 %v8510_v5  ;;  %v6116_v6 = vpop.f32.mrb[91].mxu1  ;;  %v3730_v15 = vmax.f32 %v2754_v30, 0.0  ;;  %v3926_v21 = vmax.f32 %v3538_v3, 0.0  ;;  %v3927_v34 = vmax.f32 %v3541_v14, 0.0 }
 0x251   :  { %v2749_v27 = vadd.f32 %v8440_v38, %v2748_v1  ;;  %6272 = vmatprep.subr.bf16.mxu1 %v4091_v63  ;;  %9214 = vst [vmem:[#allocation20_spill] sm:$0xff] %v8659_v59  ;;  %v6118_v5 = vpop.f32.mrb[92].mxu1  ;;  %v3728_v20 = vmax.f32 %v2746_v9, 0.0  ;;  %v3924_v22 = vmax.f32 %v3530_v56, 0.0  ;;  %v3533_v35 = vadd.f32 %v8440_v38, %v3532_v44 }
 0x252   :  { %v3731_v10 = vmax.f32 %v2757_v37, 0.0  ;;  %6808 = vmatmul.mubr.msk.bf16.gmra.mrb[36].mxu0 %vm1398_vm0, %v7121_v31  ;;  %v6119_v41 = vpop.f32.mrb[93].mxu1  ;;  %v8666_v63 = vpack.c.bf16 %v3927_v34, %v3926_v21  ;;  %v6114_v29 = vadd.f32 %v6113_v23, %v6112_v51  ;;  %v6117_v31 = vadd.f32 %v6116_v6, %v6115_v2 }
 0x253   :  { %v3729_v54 = vmax.f32 %v2749_v27, 0.0  ;;  %v6121_v48 = vpop.f32.mrb[94].mxu1  ;;  %v3925_v28 = vmax.f32 %v3533_v35, 0.0  ;;  %v8668_v3 = vadd.f32 %v6119_v41, %v6118_v5 }
 0x254   :  { %v4093_v1 = vpack.c.bf16 %v3731_v10, %v3730_v15  ;;  %6273 = vmatpush3.bf16.msra.mxu1 %v8505_v25  ;;  %9215 = vst [vmem:[#allocation21_spill] sm:$0xff] %v8666_v63  ;;  %v6122_v37 = vpop.f32.mrb[95].mxu1 }
 0x255   :  { %v4092_v30 = vpack.c.bf16 %v3729_v54, %v3728_v20  ;;  %v6705_v26 = vpop.f32.mrb[188].mxu0  ;;  %v6124_v14 = vpop.f32.mrb[96].mxu1  ;;  %v8672_v25 = vpack.c.bf16 %v3925_v28, %v3924_v22  ;;  %v6123_v23 = vadd.f32 %v6122_v37, %v6121_v48 }
 0x256   :  { %v2770_v9 = vadd.f32 %v8440_v38, %v6705_v26  ;;  %v2761_v56 = vpop.f32.mrb[189].mxu0  ;;  %v6125_v15 = vpop.f32.mrb[97].mxu1 }
 0x257   :  { %v2762_v44 = vadd.f32 %v8440_v38, %v2761_v56  ;;  %v6706_v27 = vpop.f32.mrb[190].mxu0  ;;  %6274 = vmatprep.subr.bf16.mxu1 %v4092_v30  ;;  %9216 = vst [vmem:[#allocation22_spill] sm:$0xff] %v8672_v25  ;;  %v6127_v41 = vpop.f32.mrb[98].mxu1  ;;  %v6126_v30 = vadd.f32 %v6125_v15, %v6124_v14 }
 0x258   :  { %v2773_v51 = vadd.f32 %v8440_v38, %v6706_v27  ;;  %v2764_v20 = vpop.f32.mrb[191].mxu0  ;;  %6275 = vmatpush3.bf16.msra.mxu1 %v8552_v55  ;;  %v6128_v6 = vpop.f32.mrb[99].mxu1  ;;  %v3734_v10 = vmax.f32 %v2770_v9, 0.0 }
 0x259   :  { %v2765_v2 = vadd.f32 %v8440_v38, %v2764_v20  ;;  %6276 = vmatprep.subr.bf16.mxu1 %v4093_v1  ;;  %v6146_v34 = vpop.f32.mrb[100].mxu1  ;;  %v3732_v5 = vmax.f32 %v2762_v44, 0.0  ;;  %v6129_v55 = vadd.f32 %v6128_v6, %v6127_v41 }
 0x25a   :  { %v3735_v21 = vmax.f32 %v2773_v51, 0.0  ;;  %v6147_v35 = vpop.f32.mrb[101].mxu1 }
 0x25b   :  { %v3733_v54 = vmax.f32 %v2765_v2, 0.0  ;;  %v6149_v26 = vpop.f32.mrb[102].mxu1  ;;  %v6148_v48 = vadd.f32 %v6147_v35, %v6146_v34 }
 0x25c   :  { %v4095_v22 = vpack.c.bf16 %v3735_v21, %v3734_v10  ;;  %6277 = vmatpush3.bf16.msra.mxu1 %v8547_v40  ;;  %v6150_v37 = vpop.f32.mrb[103].mxu1  ;;  %v3957_v10 = vld [vmem:[%s9193_s3 + $0xe8] sm:$0xff] }
 0x25d   :  { %v4094_v28 = vpack.c.bf16 %v3733_v54, %v3732_v5  ;;  %v6709_v56 = vpop.f32.mrb[192].mxu0  ;;  %v6152_v20 = vpop.f32.mrb[104].mxu1  ;;  %v8680_v44 = vadd.f32 %v6148_v48, %v6114_v29  ;;  %v6151_v15 = vadd.f32 %v6150_v37, %v6149_v26  ;;  %v3969_v29 = vld [vmem:[%s9193_s3 + $0x148] sm:$0xff] }
 0x25e   :  { %v2786_v27 = vadd.f32 %v8440_v38, %v6709_v56  ;;  %v2777_v1 = vpop.f32.mrb[193].mxu0  ;;  %v6153_v2 = vpop.f32.mrb[105].mxu1  ;;  %v5856_v48 = vcombine.high %v3957_v10, %v3969_v29 }
 0x25f   :  { %v2778_v9 = vadd.f32 %v8440_v38, %v2777_v1  ;;  %v6710_v51 = vpop.f32.mrb[194].mxu0  ;;  %6278 = vmatprep.subr.bf16.mxu1 %v4094_v28  ;;  %v6155_v41 = vpop.f32.mrb[106].mxu1  ;;  %v8691_v54 = vadd.f32 %v6151_v15, %v6117_v31  ;;  %v5831_v28 = vcombine.low %v8532_v46, %v8537_v33  ;;  %v6154_v37 = vadd.f32 %v6153_v2, %v6152_v20 }
 0x260   :  { %v2789_v40 = vadd.f32 %v8440_v38, %v6710_v51  ;;  %v2780_v14 = vpop.f32.mrb[195].mxu0  ;;  %6279 = vmatpush3.bf16.msra.mxu1 %v8583_v58  ;;  %v6156_v21 = vpop.f32.mrb[107].mxu1  ;;  %v3738_v34 = vmax.f32 %v2786_v27, 0.0 }
 0x261   :  { %v2781_v6 = vadd.f32 %v8440_v38, %v2780_v14  ;;  %6280 = vmatprep.subr.bf16.mxu1 %v4095_v22  ;;  %v6158_v35 = vpop.f32.mrb[108].mxu1  ;;  %v3736_v58 = vmax.f32 %v2778_v9, 0.0 }
 0x262   :  { %v3739_v5 = vmax.f32 %v2789_v40, 0.0  ;;  %v6159_v22 = vpop.f32.mrb[109].mxu1  ;;  %v6157_v40 = vadd.f32 %v6156_v21, %v6155_v41 }
 0x263   :  { %v3737_v26 = vmax.f32 %v2781_v6, 0.0  ;;  %v6161_v1 = vpop.f32.mrb[110].mxu1  ;;  %v6160_v31 = vadd.f32 %v6159_v22, %v6158_v35  ;;  %v8702_v6 = vadd.f32 %v6154_v37, %v8668_v3  ;;  %v3981_v3 = vld [vmem:[%s9193_s3 + $0x1a8] sm:$0xff] }
 0x264   :  { %v8695_v56 = vpack.c.bf16 %v3739_v5, %v3738_v34  ;;  %6281 = vmatpush3.bf16.msra.mxu1 %v8579_v42  ;;  %v6162_v14 = vpop.f32.mrb[111].mxu1  ;;  %v8705_v42 = vadd.f32 %v6157_v40, %v6123_v23  ;;  %v3993_v5 = vld [vmem:[%s9193_s3 + $0x208] sm:$0xff] }
 0x265   :  { %v8698_v51 = vpack.c.bf16 %v3737_v26, %v3736_v58  ;;  %v6713_v27 = vpop.f32.mrb[196].mxu0  ;;  %v8707_v20 = vadd.f32 %v6160_v31, %v6126_v30  ;;  %v6163_v41 = vadd.f32 %v6162_v14, %v6161_v1 }
 0x266   :  { %v2802_v9 = vadd.f32 %v8440_v38, %v6713_v27  ;;  %v2793_v15 = vpop.f32.mrb[197].mxu0 }
 0x267   :  { %v2794_v46 = vadd.f32 %v8440_v38, %v2793_v15  ;;  %v6714_v33 = vpop.f32.mrb[198].mxu0  ;;  %4870 = vmatmul.mubr.bf16.vlgmr.msra.gmra.mrb[148].mxu1 %v5831_v28  ;;  %v8717_v58 = vadd.f32 %v6163_v41, %v6129_v55  ;;  %v5855_v28 = vcombine.low %v3957_v10, %v3969_v29  ;;  %v8730_v10 = vld [vmem:[%s9193_s3 + $0x30] sm:$0xff]  ;;  %v5879_v41 = vcombine.low %v3981_v3, %v3993_v5 }
 0x268   :  { %v2805_v2 = vadd.f32 %v8440_v38, %v6714_v33  ;;  %v2796_v34 = vpop.f32.mrb[199].mxu0  ;;  %4877 = vmatprep.mubr.bf16.mxu1 %v5856_v48  ;;  %v3742_v35 = vmax.f32 %v2802_v9, 0.0  ;;  %v5880_v48 = vcombine.high %v3981_v3, %v3993_v5  ;;  %v8735_v29 = vld [vmem:[%s9193_s3 + $0x90] sm:$0xff] }
 0x269   :  { %v2797_v21 = vadd.f32 %v8440_v38, %v2796_v34  ;;  %v3740_v30 = vmax.f32 %v2794_v46, 0.0 }
 0x26a   :  { %v3743_v23 = vmax.f32 %v2805_v2, 0.0 }
 0x26b   :  { %v3741_v26 = vmax.f32 %v2797_v21, 0.0 }
 0x26c   :  { %v8719_v22 = vpack.c.bf16 %v3743_v23, %v3742_v35  ;;  %v5834_v35 = vcombine.high %v8730_v10, %v8735_v29 }
 0x26d   :  { %v8721_v37 = vpack.c.bf16 %v3741_v26, %v3740_v30  ;;  %v6717_v1 = vpop.f32.mrb[200].mxu0 }
 0x26e   :  { %v2818_v27 = vadd.f32 %v8440_v38, %v6717_v1  ;;  %v2809_v40 = vpop.f32.mrb[201].mxu0 }
 0x26f   :  { %v2810_v31 = vadd.f32 %v8440_v38, %v2809_v40  ;;  %v6718_v14 = vpop.f32.mrb[202].mxu0  ;;  %4878 = vmatmul.mubr.bf16.gmra.mrb[152].mxu1 %v5855_v28 }
 0x270   :  { %v2821_v9 = vadd.f32 %v8440_v38, %v6718_v14  ;;  %v2812_v55 = vpop.f32.mrb[203].mxu0  ;;  %4885 = vmatprep.mubr.bf16.mxu1 %v5880_v48  ;;  %v3746_v46 = vmax.f32 %v2818_v27, 0.0 }
 0x271   :  { %v2813_v15 = vadd.f32 %v8440_v38, %v2812_v55  ;;  %v3744_v2 = vmax.f32 %v2810_v31, 0.0 }
 0x272   :  { %v3747_v33 = vmax.f32 %v2821_v9, 0.0 }
 0x273   :  { %v3745_v34 = vmax.f32 %v2813_v15, 0.0 }
 0x274   :  { %v8737_v21 = vpack.c.bf16 %v3747_v33, %v3746_v46 }
 0x275   :  { %v8741_v23 = vpack.c.bf16 %v3745_v34, %v3744_v2  ;;  %v6721_v30 = vpop.f32.mrb[204].mxu0 }
 0x276   :  { %v2834_v26 = vadd.f32 %v8440_v38, %v6721_v30  ;;  %v2825_v28 = vpop.f32.mrb[205].mxu0 }
 0x277   :  { %v2826_v48 = vadd.f32 %v8440_v38, %v2825_v28  ;;  %v6722_v1 = vpop.f32.mrb[206].mxu0  ;;  %4886 = vmatmul.mubr.bf16.gmra.mrb[156].mxu1 %v5879_v41 }
 0x278   :  { %v2837_v27 = vadd.f32 %v8440_v38, %v6722_v1  ;;  %v2828_v40 = vpop.f32.mrb[207].mxu0  ;;  %4926 = vmatprep.mubr.bf16.mxu1 %v5834_v35  ;;  %v3750_v5 = vmax.f32 %v2834_v26, 0.0 }
 0x279   :  { %v2829_v3 = vadd.f32 %v8440_v38, %v2828_v40  ;;  %v3748_v9 = vmax.f32 %v2826_v48, 0.0 }
 0x27a   :  { %v3751_v31 = vmax.f32 %v2837_v27, 0.0  ;;  %v6180_v14 = vpop.f32.mrb[112].mxu1 }
 0x27b   :  { %v3749_v55 = vmax.f32 %v2829_v3, 0.0  ;;  %v6181_v15 = vpop.f32.mrb[113].mxu1 }
 0x27c   :  { %v8747_v46 = vpack.c.bf16 %v3751_v31, %v3750_v5  ;;  %v6182_v33 = vadd.f32 %v6181_v15, %v6180_v14  ;;  %v6183_v2 = vpop.f32.mrb[114].mxu1 }
 0x27d   :  { %v8749_v34 = vpack.c.bf16 %v3749_v55, %v3748_v9  ;;  %v6725_v30 = vpop.f32.mrb[208].mxu0  ;;  %v6184_v41 = vpop.f32.mrb[115].mxu1 }
 0x27e   :  { %v2850_v28 = vadd.f32 %v8440_v38, %v6725_v30  ;;  %v2841_v1 = vpop.f32.mrb[209].mxu0  ;;  %v8753_v35 = vadd.f32 %v6182_v33, %v8680_v44  ;;  %v6185_v26 = vadd.f32 %v6184_v41, %v6183_v2 }
 0x27f   :  { %v2842_v27 = vadd.f32 %v8440_v38, %v2841_v1  ;;  %v6726_v48 = vpop.f32.mrb[210].mxu0 }
 0x280   :  { %v2853_v40 = vadd.f32 %v8440_v38, %v6726_v48  ;;  %v2844_v3 = vpop.f32.mrb[211].mxu0  ;;  %v8758_v5 = vadd.f32 %v6185_v26, %v8691_v54  ;;  %v3754_v14 = vmax.f32 %v2850_v28, 0.0 }
 0x281   :  { %v2845_v31 = vadd.f32 %v8440_v38, %v2844_v3  ;;  %v3752_v15 = vmax.f32 %v2842_v27, 0.0 }
 0x282   :  { %v3755_v9 = vmax.f32 %v2853_v40, 0.0  ;;  %v6186_v55 = vpop.f32.mrb[116].mxu1 }
 0x283   :  { %v3753_v30 = vmax.f32 %v2845_v31, 0.0  ;;  %v6187_v63 = vpop.f32.mrb[117].mxu1 }
 0x284   :  { %v4105_v44 = vpack.c.bf16 %v3755_v9, %v3754_v14  ;;  %v6188_v33 = vadd.f32 %v6187_v63, %v6186_v55  ;;  %v6189_v2 = vpop.f32.mrb[118].mxu1 }
 0x285   :  { %v4104_v41 = vpack.c.bf16 %v3753_v30, %v3752_v15  ;;  %v6729_v1 = vpop.f32.mrb[212].mxu0  ;;  %v6190_v25 = vpop.f32.mrb[119].mxu1 }
 0x286   :  { %v2866_v48 = vadd.f32 %v8440_v38, %v6729_v1  ;;  %v2857_v59 = vpop.f32.mrb[213].mxu0  ;;  %v8763_v54 = vadd.f32 %v6188_v33, %v8702_v6  ;;  %v6191_v26 = vadd.f32 %v6190_v25, %v6189_v2 }
 0x287   :  { %v2858_v28 = vadd.f32 %v8440_v38, %v2857_v59  ;;  %v6730_v40 = vpop.f32.mrb[214].mxu0  ;;  %6300 = vmatprep.subr.bf16.mxu1 %v4104_v41 }
 0x288   :  { %v2869_v27 = vadd.f32 %v8440_v38, %v6730_v40  ;;  %v2860_v3 = vpop.f32.mrb[215].mxu0  ;;  %6301 = vmatpush3.bf16.msra.mxu1 %v8698_v51  ;;  %v8769_v63 = vadd.f32 %v6191_v26, %v8705_v42  ;;  %v3758_v14 = vmax.f32 %v2866_v48, 0.0 }
 0x289   :  { %v2861_v31 = vadd.f32 %v8440_v38, %v2860_v3  ;;  %6302 = vmatprep.subr.bf16.mxu1 %v4105_v44  ;;  %v3756_v55 = vmax.f32 %v2858_v28, 0.0 }
 0x28a   :  { %v3759_v9 = vmax.f32 %v2869_v27, 0.0  ;;  %v6192_v6 = vpop.f32.mrb[120].mxu1 }
 0x28b   :  { %v3757_v25 = vmax.f32 %v2861_v31, 0.0  ;;  %v6193_v15 = vpop.f32.mrb[121].mxu1 }
 0x28c   :  { %v4107_v59 = vpack.c.bf16 %v3759_v9, %v3758_v14  ;;  %6303 = vmatpush3.bf16.msra.mxu1 %v8695_v56  ;;  %v6194_v30 = vadd.f32 %v6193_v15, %v6192_v6  ;;  %v6195_v33 = vpop.f32.mrb[122].mxu1  ;;  %v8788_v15 = vld [vmem:[%s9192_s2] ss:$0 sm:$0xff]  ;;  %s5426_s2 = sshll.u32 %s7154_s14, 4  ;;  %s5427_s2 = int_to_ptr.vmem [resolvable:$true] %s5426_s2 }
 0x28d   :  { %v4106_v2 = vpack.c.bf16 %v3757_v25, %v3756_v55  ;;  %v6733_v41 = vpop.f32.mrb[216].mxu0  ;;  %v6196_v51 = vpop.f32.mrb[123].mxu1  ;;  %s7128_s15 = scalar_lea.vmem %s5427_s2, 32  ;;  %p7133_p1 = scmp.lt.s32.totalorder %s5427_s2, %s5427_s2 }
 0x28e   :  { %v2882_v42 = vadd.f32 %v8440_v38, %v6733_v41  ;;  %v2873_v1 = vpop.f32.mrb[217].mxu0  ;;  %v8775_v26 = vadd.f32 %v6194_v30, %v8707_v20  ;;  %v6197_v44 = vadd.f32 %v6196_v51, %v6195_v33  ;;  %p7129_p0 = scmp.ne.s32.totalorder %s5427_s2, %s7128_s15  ;;  %p7134_p2 = scmp.lt.s32.totalorder %s7128_s15, %s7128_s15 }
 0x28f   :  { %v2874_v48 = vadd.f32 %v8440_v38, %v2873_v1  ;;  %v6734_v28 = vpop.f32.mrb[218].mxu0  ;;  %6304 = vmatprep.subr.bf16.mxu1 %v4106_v2 }
 0x290   :  { %v2885_v40 = vadd.f32 %v8440_v38, %v6734_v28  ;;  %v2876_v27 = vpop.f32.mrb[219].mxu0  ;;  %6305 = vmatpush3.bf16.msra.mxu1 %v8721_v37  ;;  %v8781_v56 = vadd.f32 %v6197_v44, %v8717_v58  ;;  %v3762_v31 = vmax.f32 %v2882_v42, 0.0  ;;  %p7135_p3 = por %p7134_p2, %p7133_p1 }
 0x291   :  { %v2877_v3 = vadd.f32 %v8440_v38, %v2876_v27  ;;  %6306 = vmatprep.subr.bf16.mxu1 %v4107_v59  ;;  %v3760_v20 = vmax.f32 %v2874_v48, 0.0 }
 0x292   :  { %v3763_v14 = vmax.f32 %v2885_v40, 0.0  ;;  %p7136_p4 = pnand %p7135_p3, %p7129_p0 }
 0x293   :  { %v3761_v9 = vmax.f32 %v2877_v3, 0.0 }
 0x294   :  { %v4109_v6 = vpack.c.bf16 %v3763_v14, %v3762_v31  ;;  %6307 = vmatpush3.bf16.msra.mxu1 %v8719_v22 }
 0x295   :  { %v4108_v55 = vpack.c.bf16 %v3761_v9, %v3760_v20  ;;  %v6737_v25 = vpop.f32.mrb[220].mxu0  ;;  %v3970_v20 = vld [vmem:[%s9193_s3 + $0x150] sm:$0xff] }
 0x296   :  { %v2898_v58 = vadd.f32 %v8788_v15, %v6737_v25  ;;  %v2889_v37 = vpop.f32.mrb[221].mxu0 }
 0x297   :  { %v2890_v38 = vadd.f32 %v8788_v15, %v2889_v37  ;;  %v6738_v59 = vpop.f32.mrb[222].mxu0  ;;  %6308 = vmatprep.subr.bf16.mxu1 %v4108_v55 }
 0x298   :  { %v2901_v30 = vadd.f32 %v8788_v15, %v6738_v59  ;;  %v2892_v33 = vpop.f32.mrb[223].mxu0  ;;  %6309 = vmatpush3.bf16.msra.mxu1 %v8741_v23  ;;  %v3766_v2 = vmax.f32 %v2898_v58, 0.0  ;;  %v5833_v58 = vcombine.low %v8730_v10, %v8735_v29  ;;  %v3982_v29 = vld [vmem:[%s9193_s3 + $0x1b0] sm:$0xff] }
 0x299   :  { %v2893_v22 = vadd.f32 %v8788_v15, %v2892_v33  ;;  %6310 = vmatprep.subr.bf16.mxu1 %v4109_v6  ;;  %v3764_v51 = vmax.f32 %v2890_v38, 0.0 }
 0x29a   :  { %v3767_v41 = vmax.f32 %v2901_v30, 0.0 }
 0x29b   :  { %v3765_v42 = vmax.f32 %v2893_v22, 0.0 }
 0x29c   :  { %v4111_v1 = vpack.c.bf16 %v3767_v41, %v3766_v2  ;;  %6311 = vmatpush3.bf16.msra.mxu1 %v8737_v21  ;;  %v3958_v21 = vld [vmem:[%s9193_s3 + $0xf0] sm:$0xff] }
 0x29d   :  { %v4110_v44 = vpack.c.bf16 %v3765_v42, %v3764_v51  ;;  %v6741_v48 = vpop.f32.mrb[224].mxu0 }
 0x29e   :  { %v2914_v28 = vadd.f32 %v8788_v15, %v6741_v48  ;;  %v2905_v40 = vpop.f32.mrb[225].mxu0 }
 0x29f   :  { %v2906_v27 = vadd.f32 %v8788_v15, %v2905_v40  ;;  %v6742_v3 = vpop.f32.mrb[226].mxu0  ;;  %6312 = vmatprep.subr.bf16.mxu1 %v4110_v44 }
 0x2a0   :  { %v2917_v23 = vadd.f32 %v8788_v15, %v6742_v3  ;;  %v2908_v31 = vpop.f32.mrb[227].mxu0  ;;  %6313 = vmatpush3.bf16.msra.mxu1 %v8749_v34  ;;  %v3770_v9 = vmax.f32 %v2914_v28, 0.0  ;;  %v5858_v34 = vcombine.high %v3958_v21, %v3970_v20  ;;  %v5857_v28 = vcombine.low %v3958_v21, %v3970_v20  ;;  %v8835_v21 = vld [vmem:[%s9193_s3 + $0x38] sm:$0xff] }
 0x2a1   :  { %v2909_v14 = vadd.f32 %v8788_v15, %v2908_v31  ;;  %6314 = vmatprep.subr.bf16.mxu1 %v4111_v1  ;;  %v3768_v55 = vmax.f32 %v2906_v27, 0.0  ;;  %v8840_v20 = vld [vmem:[%s9193_s3 + $0x98] sm:$0xff] }
 0x2a2   :  { %v3771_v6 = vmax.f32 %v2917_v23, 0.0 }
 0x2a3   :  { %v3769_v25 = vmax.f32 %v2909_v14, 0.0 }
 0x2a4   :  { %v8809_v37 = vpack.c.bf16 %v3771_v6, %v3770_v9  ;;  %6315 = vmatpush3.bf16.msra.mxu1 %v8747_v46  ;;  %v3994_v46 = vld [vmem:[%s9193_s3 + $0x210] sm:$0xff] }
 0x2a5   :  { %v8812_v38 = vpack.c.bf16 %v3769_v25, %v3768_v55  ;;  %v6745_v59 = vpop.f32.mrb[228].mxu0  ;;  %v5882_v27 = vcombine.high %v3982_v29, %v3994_v46 }
 0x2a6   :  { %v2930_v30 = vadd.f32 %v8788_v15, %v6745_v59  ;;  %v2921_v33 = vpop.f32.mrb[229].mxu0 }
 0x2a7   :  { %v2922_v22 = vadd.f32 %v8788_v15, %v2921_v33  ;;  %v6746_v2 = vpop.f32.mrb[230].mxu0  ;;  %4927 = vmatmul.mubr.bf16.vlgmr.msra.gmra.mrb[160].mxu1 %v5833_v58 }
 0x2a8   :  { %v2933_v41 = vadd.f32 %v8788_v15, %v6746_v2  ;;  %v2924_v51 = vpop.f32.mrb[231].mxu0  ;;  %4934 = vmatprep.mubr.bf16.mxu1 %v5858_v34  ;;  %v3774_v42 = vmax.f32 %v2930_v30, 0.0 }
 0x2a9   :  { %v2925_v10 = vadd.f32 %v8788_v15, %v2924_v51  ;;  %v3772_v44 = vmax.f32 %v2922_v22, 0.0  ;;  %v5881_v22 = vcombine.low %v3982_v29, %v3994_v46 }
 0x2aa   :  { %v3775_v1 = vmax.f32 %v2933_v41, 0.0  ;;  %v5836_v41 = vcombine.high %v8835_v21, %v8840_v20 }
 0x2ab   :  { %v3773_v48 = vmax.f32 %v2925_v10, 0.0 }
 0x2ac   :  { %v8824_v40 = vpack.c.bf16 %v3775_v1, %v3774_v42 }
 0x2ad   :  { %v8826_v3 = vpack.c.bf16 %v3773_v48, %v3772_v44  ;;  %v6749_v23 = vpop.f32.mrb[232].mxu0 }
 0x2ae   :  { %v2946_v31 = vadd.f32 %v8788_v15, %v6749_v23  ;;  %v2937_v14 = vpop.f32.mrb[233].mxu0 }
 0x2af   :  { %v2938_v9 = vadd.f32 %v8788_v15, %v2937_v14  ;;  %v6750_v6 = vpop.f32.mrb[234].mxu0  ;;  %4935 = vmatmul.mubr.bf16.gmra.mrb[164].mxu1 %v5857_v28 }
 0x2b0   :  { %v2949_v55 = vadd.f32 %v8788_v15, %v6750_v6  ;;  %v2940_v25 = vpop.f32.mrb[235].mxu0  ;;  %4942 = vmatprep.mubr.bf16.mxu1 %v5882_v27  ;;  %v3778_v34 = vmax.f32 %v2946_v31, 0.0 }
 0x2b1   :  { %v2941_v58 = vadd.f32 %v8788_v15, %v2940_v25  ;;  %v3776_v30 = vmax.f32 %v2938_v9, 0.0 }
 0x2b2   :  { %v3779_v59 = vmax.f32 %v2949_v55, 0.0 }
 0x2b3   :  { %v3777_v33 = vmax.f32 %v2941_v58, 0.0 }
 0x2b4   :  { %v8842_v2 = vpack.c.bf16 %v3779_v59, %v3778_v34 }
 0x2b5   :  { %v8846_v51 = vpack.c.bf16 %v3777_v33, %v3776_v30  ;;  %v6753_v10 = vpop.f32.mrb[236].mxu0 }
 0x2b6   :  { %v2962_v42 = vadd.f32 %v8788_v15, %v6753_v10  ;;  %v2953_v1 = vpop.f32.mrb[237].mxu0 }
 0x2b7   :  { %v2954_v44 = vadd.f32 %v8788_v15, %v2953_v1  ;;  %v6754_v48 = vpop.f32.mrb[238].mxu0  ;;  %4943 = vmatmul.mubr.bf16.gmra.mrb[168].mxu1 %v5881_v22 }
 0x2b8   :  { %v2965_v28 = vadd.f32 %v8788_v15, %v6754_v48  ;;  %v2956_v27 = vpop.f32.mrb[239].mxu0  ;;  %4983 = vmatprep.mubr.bf16.mxu1 %v5836_v41  ;;  %v3782_v46 = vmax.f32 %v2962_v42, 0.0 }
 0x2b9   :  { %v2957_v29 = vadd.f32 %v8788_v15, %v2956_v27  ;;  %v3780_v14 = vmax.f32 %v2954_v44, 0.0 }
 0x2ba   :  { %v3783_v23 = vmax.f32 %v2965_v28, 0.0  ;;  %v6214_v31 = vpop.f32.mrb[124].mxu1 }
 0x2bb   :  { %v3781_v9 = vmax.f32 %v2957_v29, 0.0  ;;  %v6215_v6 = vpop.f32.mrb[125].mxu1 }
 0x2bc   :  { %v8852_v55 = vpack.c.bf16 %v3783_v23, %v3782_v46  ;;  %v6216_v25 = vadd.f32 %v6215_v6, %v6214_v31  ;;  %v6217_v58 = vpop.f32.mrb[126].mxu1 }
 0x2bd   :  { %v8854_v34 = vpack.c.bf16 %v3781_v9, %v3780_v14  ;;  %v6757_v59 = vpop.f32.mrb[240].mxu0  ;;  %v6218_v30 = vpop.f32.mrb[127].mxu1 }
 0x2be   :  { %v2978_v33 = vadd.f32 %v8788_v15, %v6757_v59  ;;  %v2969_v22 = vpop.f32.mrb[241].mxu0  ;;  %v8858_v41 = vadd.f32 %v6216_v25, %v8753_v35  ;;  %v6219_v10 = vadd.f32 %v6218_v30, %v6217_v58 }
 0x2bf   :  { %v2970_v42 = vadd.f32 %v8788_v15, %v2969_v22  ;;  %v6758_v1 = vpop.f32.mrb[242].mxu0 }
 0x2c0   :  { %v2981_v44 = vadd.f32 %v8788_v15, %v6758_v1  ;;  %v2972_v48 = vpop.f32.mrb[243].mxu0  ;;  %v8863_v28 = vadd.f32 %v6219_v10, %v8758_v5  ;;  %v3786_v29 = vmax.f32 %v2978_v33, 0.0 }
 0x2c1   :  { %v2973_v27 = vadd.f32 %v8788_v15, %v2972_v48  ;;  %v3784_v31 = vmax.f32 %v2970_v42, 0.0 }
 0x2c2   :  { %v3787_v46 = vmax.f32 %v2981_v44, 0.0  ;;  %v6220_v23 = vpop.f32.mrb[128].mxu1 }
 0x2c3   :  { %v3785_v14 = vmax.f32 %v2973_v27, 0.0  ;;  %v6221_v9 = vpop.f32.mrb[129].mxu1 }
 0x2c4   :  { %v4121_v35 = vpack.c.bf16 %v3787_v46, %v3786_v29  ;;  %v6222_v6 = vadd.f32 %v6221_v9, %v6220_v23  ;;  %v6223_v25 = vpop.f32.mrb[130].mxu1 }
 0x2c5   :  { %v4120_v58 = vpack.c.bf16 %v3785_v14, %v3784_v31  ;;  %v6761_v59 = vpop.f32.mrb[244].mxu0  ;;  %v6224_v30 = vpop.f32.mrb[131].mxu1 }
 0x2c6   :  { %v2994_v22 = vadd.f32 %v8788_v15, %v6761_v59  ;;  %v2985_v1 = vpop.f32.mrb[245].mxu0  ;;  %v8868_v5 = vadd.f32 %v6222_v6, %v8763_v54  ;;  %v6225_v10 = vadd.f32 %v6224_v30, %v6223_v25 }
 0x2c7   :  { %v2986_v33 = vadd.f32 %v8788_v15, %v2985_v1  ;;  %v6762_v44 = vpop.f32.mrb[246].mxu0  ;;  %6334 = vmatprep.subr.bf16.mxu1 %v4120_v58 }
 0x2c8   :  { %v2997_v42 = vadd.f32 %v8788_v15, %v6762_v44  ;;  %v2988_v48 = vpop.f32.mrb[247].mxu0  ;;  %6335 = vmatpush3.bf16.msra.mxu1 %v8812_v38  ;;  %v8874_v27 = vadd.f32 %v6225_v10, %v8769_v63  ;;  %v3790_v46 = vmax.f32 %v2994_v22, 0.0 }
 0x2c9   :  { %v2989_v29 = vadd.f32 %v8788_v15, %v2988_v48  ;;  %6336 = vmatprep.subr.bf16.mxu1 %v4121_v35  ;;  %v3788_v31 = vmax.f32 %v2986_v33, 0.0 }
 0x2ca   :  { %v3791_v23 = vmax.f32 %v2997_v42, 0.0  ;;  %v6226_v54 = vpop.f32.mrb[132].mxu1 }
 0x2cb   :  { %v3789_v14 = vmax.f32 %v2989_v29, 0.0  ;;  %v6227_v9 = vpop.f32.mrb[133].mxu1 }
 0x2cc   :  { %v4123_v6 = vpack.c.bf16 %v3791_v23, %v3790_v46  ;;  %6337 = vmatpush3.bf16.msra.mxu1 %v8809_v37  ;;  %v6228_v25 = vadd.f32 %v6227_v9, %v6226_v54  ;;  %v6229_v58 = vpop.f32.mrb[134].mxu1 }
 0x2cd   :  { %v4122_v59 = vpack.c.bf16 %v3789_v14, %v3788_v31  ;;  %v6765_v30 = vpop.f32.mrb[248].mxu0  ;;  %v6230_v38 = vpop.f32.mrb[135].mxu1 }
 0x2ce   :  { %v3010_v63 = vadd.f32 %v8788_v15, %v6765_v30  ;;  %v3001_v1 = vpop.f32.mrb[249].mxu0  ;;  %v8880_v10 = vadd.f32 %v6228_v25, %v8775_v26  ;;  %v6231_v35 = vadd.f32 %v6230_v38, %v6229_v58 }
 0x2cf   :  { %v3002_v22 = vadd.f32 %v8788_v15, %v3001_v1  ;;  %v6766_v33 = vpop.f32.mrb[250].mxu0  ;;  %6338 = vmatprep.subr.bf16.mxu1 %v4122_v59 }
 0x2d0   :  { %v3013_v44 = vadd.f32 %v8788_v15, %v6766_v33  ;;  %v3004_v42 = vpop.f32.mrb[251].mxu0  ;;  %6339 = vmatpush3.bf16.msra.mxu1 %v8826_v3  ;;  %v8886_v37 = vadd.f32 %v6231_v35, %v8781_v56  ;;  %v3794_v29 = vmax.f32 %v3010_v63, 0.0 }
 0x2d1   :  { %v3005_v48 = vadd.f32 %v8788_v15, %v3004_v42  ;;  %6340 = vmatprep.subr.bf16.mxu1 %v4123_v6  ;;  %v3792_v26 = vmax.f32 %v3002_v22, 0.0 }
 0x2d2   :  { %v3795_v46 = vmax.f32 %v3013_v44, 0.0 }
 0x2d3   :  { %v3793_v23 = vmax.f32 %v3005_v48, 0.0 }
 0x2d4   :  { %v4125_v54 = vpack.c.bf16 %v3795_v46, %v3794_v29  ;;  %6341 = vmatpush3.bf16.msra.mxu1 %v8824_v40 }
 0x2d5   :  { %v4124_v31 = vpack.c.bf16 %v3793_v23, %v3792_v26  ;;  %v6769_v14 = vpop.f32.mrb[252].mxu0  ;;  %v3971_v26 = vld [vmem:[%s9193_s3 + $0x158] sm:$0xff] }
 0x2d6   :  { %v3026_v9 = vadd.f32 %v8788_v15, %v6769_v14  ;;  %v3017_v25 = vpop.f32.mrb[253].mxu0 }
 0x2d7   :  { %v3018_v3 = vadd.f32 %v8788_v15, %v3017_v25  ;;  %v6770_v58 = vpop.f32.mrb[254].mxu0  ;;  %6342 = vmatprep.subr.bf16.mxu1 %v4124_v31 }
 0x2d8   :  { %v3029_v56 = vadd.f32 %v8788_v15, %v6770_v58  ;;  %v3020_v59 = vpop.f32.mrb[255].mxu0  ;;  %6343 = vmatpush3.bf16.msra.mxu1 %v8846_v51  ;;  %v3798_v30 = vmax.f32 %v3026_v9, 0.0  ;;  %v5835_v9 = vcombine.low %v8835_v21, %v8840_v20  ;;  %v3983_v20 = vld [vmem:[%s9193_s3 + $0x1b8] sm:$0xff] }
 0x2d9   :  { %v3021_v6 = vadd.f32 %v8788_v15, %v3020_v59  ;;  %6344 = vmatprep.subr.bf16.mxu1 %v4125_v54  ;;  %v3796_v40 = vmax.f32 %v3018_v3, 0.0 }
 0x2da   :  { %v3799_v38 = vmax.f32 %v3029_v56, 0.0 }
 0x2db   :  { %v3797_v63 = vmax.f32 %v3021_v6, 0.0 }
 0x2dc   :  { %v4127_v1 = vpack.c.bf16 %v3799_v38, %v3798_v30  ;;  %6345 = vmatpush3.bf16.msra.mxu1 %v8842_v2  ;;  %v3959_v2 = vld [vmem:[%s9193_s3 + $0xf8] sm:$0xff] }
 0x2dd   :  { %v4126_v35 = vpack.c.bf16 %v3797_v63, %v3796_v40  ;;  %v6773_v22 = vpop.f32.mrb[0].mxu0 }
 0x2de   :  { %v3042_v33 = vadd.f32 %v8788_v15, %v6773_v22  ;;  %v3033_v44 = vpop.f32.mrb[1].mxu0 }
 0x2df   :  { %v3034_v42 = vadd.f32 %v8788_v15, %v3033_v44  ;;  %v6774_v48 = vpop.f32.mrb[2].mxu0  ;;  %6346 = vmatprep.subr.bf16.mxu1 %v4126_v35 }
 0x2e0   :  { %v3045_v51 = vadd.f32 %v8788_v15, %v6774_v48  ;;  %v3036_v29 = vpop.f32.mrb[3].mxu0  ;;  %6347 = vmatpush3.bf16.msra.mxu1 %v8854_v34  ;;  %v3802_v23 = vmax.f32 %v3042_v33, 0.0  ;;  %v5860_v34 = vcombine.high %v3959_v2, %v3971_v26  ;;  %v5859_v33 = vcombine.low %v3959_v2, %v3971_v26  ;;  %v8935_v2 = vld [vmem:[%s9193_s3 + $0x40] sm:$0xff] }
 0x2e1   :  { %v3037_v46 = vadd.f32 %v8788_v15, %v3036_v29  ;;  %6348 = vmatprep.subr.bf16.mxu1 %v4127_v1  ;;  %v3800_v31 = vmax.f32 %v3034_v42, 0.0  ;;  %v8940_v26 = vld [vmem:[%s9193_s3 + $0xa0] sm:$0xff] }
 0x2e2   :  { %v3803_v54 = vmax.f32 %v3045_v51, 0.0 }
 0x2e3   :  { %v3801_v14 = vmax.f32 %v3037_v46, 0.0 }
 0x2e4   :  { %v8909_v25 = vpack.c.bf16 %v3803_v54, %v3802_v23  ;;  %6349 = vmatpush3.bf16.msra.mxu1 %v8852_v55  ;;  %v3995_v55 = vld [vmem:[%s9193_s3 + $0x218] sm:$0xff] }
 0x2e5   :  { %v8912_v3 = vpack.c.bf16 %v3801_v14, %v3800_v31  ;;  %v6777_v58 = vpop.f32.mrb[4].mxu0  ;;  %v5884_v42 = vcombine.high %v3983_v20, %v3995_v55 }
 0x2e6   :  { %v3058_v56 = vadd.f32 %v8788_v15, %v6777_v58  ;;  %v3049_v59 = vpop.f32.mrb[5].mxu0 }
 0x2e7   :  { %v3050_v6 = vadd.f32 %v8788_v15, %v3049_v59  ;;  %v6778_v30 = vpop.f32.mrb[6].mxu0  ;;  %4984 = vmatmul.mubr.bf16.vlgmr.msra.gmra.mrb[172].mxu1 %v5835_v9 }
 0x2e8   :  { %v3061_v38 = vadd.f32 %v8788_v15, %v6778_v30  ;;  %v3052_v40 = vpop.f32.mrb[7].mxu0  ;;  %4991 = vmatprep.mubr.bf16.mxu1 %v5860_v34  ;;  %v3806_v63 = vmax.f32 %v3058_v56, 0.0 }
 0x2e9   :  { %v3053_v21 = vadd.f32 %v8788_v15, %v3052_v40  ;;  %v3804_v35 = vmax.f32 %v3050_v6, 0.0  ;;  %v5883_v6 = vcombine.low %v3983_v20, %v3995_v55 }
 0x2ea   :  { %v3807_v1 = vmax.f32 %v3061_v38, 0.0  ;;  %v5838_v38 = vcombine.high %v8935_v2, %v8940_v26 }
 0x2eb   :  { %v3805_v22 = vmax.f32 %v3053_v21, 0.0 }
 0x2ec   :  { %v8924_v44 = vpack.c.bf16 %v3807_v1, %v3806_v63 }
 0x2ed   :  { %v8926_v48 = vpack.c.bf16 %v3805_v22, %v3804_v35  ;;  %v6781_v51 = vpop.f32.mrb[8].mxu0 }
 0x2ee   :  { %v3074_v29 = vadd.f32 %v8788_v15, %v6781_v51  ;;  %v3065_v46 = vpop.f32.mrb[9].mxu0 }
 0x2ef   :  { %v3066_v23 = vadd.f32 %v8788_v15, %v3065_v46  ;;  %v6782_v54 = vpop.f32.mrb[10].mxu0  ;;  %4992 = vmatmul.mubr.bf16.gmra.mrb[176].mxu1 %v5859_v33 }
 0x2f0   :  { %v3077_v31 = vadd.f32 %v8788_v15, %v6782_v54  ;;  %v3068_v14 = vpop.f32.mrb[11].mxu0  ;;  %4999 = vmatprep.mubr.bf16.mxu1 %v5884_v42  ;;  %v3810_v34 = vmax.f32 %v3074_v29, 0.0 }
 0x2f1   :  { %v3069_v9 = vadd.f32 %v8788_v15, %v3068_v14  ;;  %v3808_v56 = vmax.f32 %v3066_v23, 0.0 }
 0x2f2   :  { %v3811_v58 = vmax.f32 %v3077_v31, 0.0 }
 0x2f3   :  { %v3809_v59 = vmax.f32 %v3069_v9, 0.0 }
 0x2f4   :  { %v8942_v30 = vpack.c.bf16 %v3811_v58, %v3810_v34 }
 0x2f5   :  { %v8946_v40 = vpack.c.bf16 %v3809_v59, %v3808_v56  ;;  %v6785_v21 = vpop.f32.mrb[12].mxu0 }
 0x2f6   :  { %v3090_v63 = vadd.f32 %v8788_v15, %v6785_v21  ;;  %v3081_v1 = vpop.f32.mrb[13].mxu0 }
 0x2f7   :  { %v3082_v35 = vadd.f32 %v8788_v15, %v3081_v1  ;;  %v6786_v22 = vpop.f32.mrb[14].mxu0  ;;  %5000 = vmatmul.mubr.bf16.gmra.mrb[180].mxu1 %v5883_v6 }
 0x2f8   :  { %v3093_v33 = vadd.f32 %v8788_v15, %v6786_v22  ;;  %v3084_v42 = vpop.f32.mrb[15].mxu0  ;;  %5040 = vmatprep.mubr.bf16.mxu1 %v5838_v38  ;;  %v3814_v55 = vmax.f32 %v3090_v63, 0.0 }
 0x2f9   :  { %v3085_v20 = vadd.f32 %v8788_v15, %v3084_v42  ;;  %v3812_v46 = vmax.f32 %v3082_v35, 0.0 }
 0x2fa   :  { %v3815_v51 = vmax.f32 %v3093_v33, 0.0  ;;  %v6248_v29 = vpop.f32.mrb[136].mxu1 }
 0x2fb   :  { %v3813_v23 = vmax.f32 %v3085_v20, 0.0  ;;  %v6249_v54 = vpop.f32.mrb[137].mxu1 }
 0x2fc   :  { %v8952_v31 = vpack.c.bf16 %v3815_v51, %v3814_v55  ;;  %v6250_v14 = vadd.f32 %v6249_v54, %v6248_v29  ;;  %v6251_v9 = vpop.f32.mrb[138].mxu1 }
 0x2fd   :  { %v8954_v34 = vpack.c.bf16 %v3813_v23, %v3812_v46  ;;  %v6789_v58 = vpop.f32.mrb[16].mxu0  ;;  %v6252_v56 = vpop.f32.mrb[139].mxu1 }
 0x2fe   :  { %v3106_v59 = vadd.f32 %v8788_v15, %v6789_v58  ;;  %v3097_v6 = vpop.f32.mrb[17].mxu0  ;;  %v8958_v38 = vadd.f32 %v6250_v14, %v8858_v41  ;;  %v6253_v21 = vadd.f32 %v6252_v56, %v6251_v9 }
 0x2ff   :  { %v3098_v63 = vadd.f32 %v8788_v15, %v3097_v6  ;;  %v6790_v1 = vpop.f32.mrb[18].mxu0 }
 0x300   :  { %v3109_v35 = vadd.f32 %v8788_v15, %v6790_v1  ;;  %v3100_v22 = vpop.f32.mrb[19].mxu0  ;;  %v8963_v33 = vadd.f32 %v6253_v21, %v8863_v28  ;;  %v3818_v20 = vmax.f32 %v3106_v59, 0.0 }
 0x301   :  { %v3101_v42 = vadd.f32 %v8788_v15, %v3100_v22  ;;  %v3816_v29 = vmax.f32 %v3098_v63, 0.0 }
 0x302   :  { %v3819_v55 = vmax.f32 %v3109_v35, 0.0  ;;  %v6254_v51 = vpop.f32.mrb[140].mxu1 }
 0x303   :  { %v3817_v46 = vmax.f32 %v3101_v42, 0.0  ;;  %v6255_v23 = vpop.f32.mrb[141].mxu1 }
 0x304   :  { %v4137_v41 = vpack.c.bf16 %v3819_v55, %v3818_v20  ;;  %v6256_v54 = vadd.f32 %v6255_v23, %v6254_v51  ;;  %v6257_v14 = vpop.f32.mrb[142].mxu1 }
 0x305   :  { %v4136_v9 = vpack.c.bf16 %v3817_v46, %v3816_v29  ;;  %v6793_v58 = vpop.f32.mrb[20].mxu0  ;;  %v6258_v56 = vpop.f32.mrb[143].mxu1 }
 0x306   :  { %v3122_v6 = vadd.f32 %v8788_v15, %v6793_v58  ;;  %v3113_v1 = vpop.f32.mrb[21].mxu0  ;;  %v8968_v28 = vadd.f32 %v6256_v54, %v8868_v5  ;;  %v6259_v21 = vadd.f32 %v6258_v56, %v6257_v14 }
 0x307   :  { %v3114_v59 = vadd.f32 %v8788_v15, %v3113_v1  ;;  %v6794_v35 = vpop.f32.mrb[22].mxu0  ;;  %6368 = vmatprep.subr.bf16.mxu1 %v4136_v9 }
 0x308   :  { %v3125_v63 = vadd.f32 %v8788_v15, %v6794_v35  ;;  %v3116_v22 = vpop.f32.mrb[23].mxu0  ;;  %6369 = vmatpush3.bf16.msra.mxu1 %v8912_v3  ;;  %v8974_v42 = vadd.f32 %v6259_v21, %v8874_v27  ;;  %v3822_v55 = vmax.f32 %v3122_v6, 0.0 }
 0x309   :  { %v3117_v20 = vadd.f32 %v8788_v15, %v3116_v22  ;;  %6370 = vmatprep.subr.bf16.mxu1 %v4137_v41  ;;  %v3820_v29 = vmax.f32 %v3114_v59, 0.0 }
 0x30a   :  { %v3823_v51 = vmax.f32 %v3125_v63, 0.0  ;;  %v6260_v5 = vpop.f32.mrb[144].mxu1 }
 0x30b   :  { %v3821_v46 = vmax.f32 %v3117_v20, 0.0  ;;  %v6261_v23 = vpop.f32.mrb[145].mxu1 }
 0x30c   :  { %v4139_v54 = vpack.c.bf16 %v3823_v51, %v3822_v55  ;;  %6371 = vmatpush3.bf16.msra.mxu1 %v8909_v25  ;;  %v6262_v14 = vadd.f32 %v6261_v23, %v6260_v5  ;;  %v6263_v9 = vpop.f32.mrb[146].mxu1 }
 0x30d   :  { %v4138_v58 = vpack.c.bf16 %v3821_v46, %v3820_v29  ;;  %v6797_v56 = vpop.f32.mrb[24].mxu0  ;;  %v6264_v3 = vpop.f32.mrb[147].mxu1 }
 0x30e   :  { %v3138_v27 = vadd.f32 %v8788_v15, %v6797_v56  ;;  %v3129_v1 = vpop.f32.mrb[25].mxu0  ;;  %v8980_v21 = vadd.f32 %v6262_v14, %v8880_v10  ;;  %v6265_v41 = vadd.f32 %v6264_v3, %v6263_v9 }
 0x30f   :  { %v3130_v6 = vadd.f32 %v8788_v15, %v3129_v1  ;;  %v6798_v59 = vpop.f32.mrb[26].mxu0  ;;  %6372 = vmatprep.subr.bf16.mxu1 %v4138_v58 }
 0x310   :  { %v3141_v35 = vadd.f32 %v8788_v15, %v6798_v59  ;;  %v3132_v63 = vpop.f32.mrb[27].mxu0  ;;  %6373 = vmatpush3.bf16.msra.mxu1 %v8926_v48  ;;  %v8986_v25 = vadd.f32 %v6265_v41, %v8886_v37  ;;  %v3826_v20 = vmax.f32 %v3138_v27, 0.0 }
 0x311   :  { %v3133_v22 = vadd.f32 %v8788_v15, %v3132_v63  ;;  %6374 = vmatprep.subr.bf16.mxu1 %v4139_v54  ;;  %v3824_v10 = vmax.f32 %v3130_v6, 0.0 }
 0x312   :  { %v3827_v55 = vmax.f32 %v3141_v35, 0.0 }
 0x313   :  { %v3825_v51 = vmax.f32 %v3133_v22, 0.0 }
 0x314   :  { %v4141_v5 = vpack.c.bf16 %v3827_v55, %v3826_v20  ;;  %6375 = vmatpush3.bf16.msra.mxu1 %v8924_v44 }
 0x315   :  { %v4140_v29 = vpack.c.bf16 %v3825_v51, %v3824_v10  ;;  %v6801_v46 = vpop.f32.mrb[28].mxu0  ;;  %v3972_v51 = vld [vmem:[%s9193_s3 + $0x160] sm:$0xff] }
 0x316   :  { %v3154_v23 = vadd.f32 %v8788_v15, %v6801_v46  ;;  %v3145_v14 = vpop.f32.mrb[29].mxu0 }
 0x317   :  { %v3146_v48 = vadd.f32 %v8788_v15, %v3145_v14  ;;  %v6802_v9 = vpop.f32.mrb[30].mxu0  ;;  %6376 = vmatprep.subr.bf16.mxu1 %v4140_v29 }
 0x318   :  { %v3157_v37 = vadd.f32 %v8788_v15, %v6802_v9  ;;  %v3148_v58 = vpop.f32.mrb[31].mxu0  ;;  %6377 = vmatpush3.bf16.msra.mxu1 %v8946_v40  ;;  %v3830_v56 = vmax.f32 %v3154_v23, 0.0  ;;  %v5837_v23 = vcombine.low %v8935_v2, %v8940_v26  ;;  %v3996_v26 = vld [vmem:[%s9193_s3 + $0x220] sm:$0xff] }
 0x319   :  { %v3149_v54 = vadd.f32 %v8788_v15, %v3148_v58  ;;  %6378 = vmatprep.subr.bf16.mxu1 %v4141_v5  ;;  %v3828_v44 = vmax.f32 %v3146_v48, 0.0 }
 0x31a   :  { %v3831_v3 = vmax.f32 %v3157_v37, 0.0 }
 0x31b   :  { %v3829_v27 = vmax.f32 %v3149_v54, 0.0 }
 0x31c   :  { %v4143_v1 = vpack.c.bf16 %v3831_v3, %v3830_v56  ;;  %6379 = vmatpush3.bf16.msra.mxu1 %v8942_v30  ;;  %v3960_v30 = vld [vmem:[%s9193_s3 + $0x100] sm:$0xff] }
 0x31d   :  { %v4142_v41 = vpack.c.bf16 %v3829_v27, %v3828_v44  ;;  %v6805_v6 = vpop.f32.mrb[32].mxu0 }
 0x31e   :  { %v3170_v59 = vadd.f32 %v8788_v15, %v6805_v6  ;;  %v3161_v35 = vpop.f32.mrb[33].mxu0  ;;  %v5861_v6 = vcombine.low %v3960_v30, %v3972_v51 }
 0x31f   :  { %v3162_v63 = vadd.f32 %v8788_v15, %v3161_v35  ;;  %v6806_v22 = vpop.f32.mrb[34].mxu0  ;;  %6380 = vmatprep.subr.bf16.mxu1 %v4142_v41 }
 0x320   :  { %v3834_v40 = vmax.f32 %v3170_v59, 0.0  ;;  %v3173_v20 = vadd.f32 %v8788_v15, %v6806_v22  ;;  %v3164_v55 = vpop.f32.mrb[35].mxu0  ;;  %6381 = vmatpush3.bf16.msra.mxu1 %v8954_v34  ;;  %v5862_v34 = vcombine.high %v3960_v30, %v3972_v51 }
 0x321   :  { %v3165_v10 = vadd.f32 %v8788_v15, %v3164_v55  ;;  %6382 = vmatprep.subr.bf16.mxu1 %v4143_v1  ;;  %v3832_v29 = vmax.f32 %v3162_v63, 0.0 }
 0x322   :  { %v3835_v5 = vmax.f32 %v3173_v20, 0.0 }
 0x323   :  { %v3833_v46 = vmax.f32 %v3165_v10, 0.0 }
 0x324   :  { %v4145_v14 = vpack.c.bf16 %v3835_v5, %v3834_v40  ;;  %6383 = vmatpush3.bf16.msra.mxu1 %v8952_v31 }
 0x325   :  { %v4144_v48 = vpack.c.bf16 %v3833_v46, %v3832_v29  ;;  %v6809_v9 = vpop.f32.mrb[36].mxu0  ;;  %6402 = vmatprep.subr.bf16.mxu1 %v8226_v52  ;;  %v3984_v52 = vld [vmem:[%s9193_s3 + $0x1c0] sm:$0xff] }
 0x326   :  { %v3186_v37 = vadd.f32 %v8788_v15, %v6809_v9  ;;  %v3177_v58 = vpop.f32.mrb[37].mxu0  ;;  %v5886_v35 = vcombine.high %v3984_v52, %v3996_v26  ;;  %v5885_v22 = vcombine.low %v3984_v52, %v3996_v26  ;;  %v9223_v52 = vld [vmem:[#allocation9_spill] sm:$0xff] }
 0x327   :  { %v3178_v54 = vadd.f32 %v8788_v15, %v3177_v58  ;;  %v6810_v56 = vpop.f32.mrb[38].mxu0  ;;  %5041 = vmatmul.mubr.bf16.vlgmr.msra.gmra.mrb[184].mxu1 %v5837_v23 }
 0x328   :  { %v3838_v3 = vmax.f32 %v3186_v37, 0.0  ;;  %v3189_v44 = vadd.f32 %v8788_v15, %v6810_v56  ;;  %v3180_v27 = vpop.f32.mrb[39].mxu0  ;;  %6403 = vmatpush3.bf16.msra.mxu1 %v4144_v48  ;;  %5048 = vmatprep.mubr.bf16.mxu1 %v5862_v34  ;;  %v9220_v56 = vld [vmem:[#allocation5_spill] sm:$0xff] }
 0x329   :  { %v3181_v2 = vadd.f32 %v8788_v15, %v3180_v27  ;;  %6404 = vmatprep.subr.bf16.mxu1 %v8223_v57  ;;  %v3836_v1 = vmax.f32 %v3178_v54, 0.0  ;;  %v3937_v57 = vld [vmem:[%s9193_s3 + $0x48] sm:$0xff]  ;;  %v3998_v27 = vld [vmem:[%s9193_s3 + $0x230] sm:$0xff] }
 0x32a   :  { %v3839_v31 = vmax.f32 %v3189_v44, 0.0  ;;  %v3949_v15 = vld [vmem:[%s9193_s3 + $0xa8] sm:$0xff]  ;;  %v3986_v44 = vld [vmem:[%s9193_s3 + $0x1d0] sm:$0xff] }
 0x32b   :  { %v3837_v41 = vmax.f32 %v3181_v2, 0.0  ;;  %v5840_v40 = vcombine.high %v3937_v57, %v3949_v15  ;;  %v5890_v26 = vcombine.high %v3986_v44, %v3998_v27 }
 0x32c   :  { %v4147_v59 = vpack.c.bf16 %v3839_v31, %v3838_v3  ;;  %6405 = vmatpush3.bf16.msra.mxu1 %v4145_v14  ;;  %v9222_v3 = vld [vmem:[#allocation17_spill] sm:$0xff]  ;;  %v9224_v31 = vld [vmem:[#allocation19_spill] sm:$0xff] }
 0x32d   :  { %v4146_v63 = vpack.c.bf16 %v3837_v41, %v3836_v1  ;;  %6406 = vmatprep.subr.bf16.mxu1 %v8265_v19  ;;  %v9226_v1 = vld [vmem:[#allocation18_spill] sm:$0xff]  ;;  %v3939_v41 = vld [vmem:[%s9193_s3 + $0x58] sm:$0xff] }
 0x32f   :  { %5049 = vmatmul.mubr.bf16.gmra.mrb[188].mxu1 %v5861_v6  ;;  %v3951_v6 = vld [vmem:[%s9193_s3 + $0xb8] sm:$0xff] }
 0x330   :  { %6407 = vmatpush3.bf16.msra.mxu1 %v4146_v63  ;;  %5056 = vmatprep.mubr.bf16.mxu1 %v5886_v35  ;;  %v9227_v35 = vld [vmem:[#allocation11_spill] sm:$0xff]  ;;  %v5844_v63 = vcombine.high %v3939_v41, %v3951_v6 }
 0x331   :  { %6408 = vmatprep.subr.bf16.mxu1 %v8262_v47 }
 0x334   :  { %6409 = vmatpush3.bf16.msra.mxu1 %v4147_v59  ;;  %v5889_v59 = vcombine.low %v3986_v44, %v3998_v27 }
 0x335   :  { %6410 = vmatprep.subr.bf16.mxu1 %v8303_v60 }
 0x337   :  { %5057 = vmatmul.mubr.bf16.gmra.mrb[192].mxu1 %v5885_v22 }
 0x338   :  { %6411 = vmatpush3.bf16.msra.mxu1 %v8172_v7  ;;  %5097 = vmatprep.mubr.bf16.mxu1 %v5840_v40  ;;  %v3961_v7 = vld [vmem:[%s9193_s3 + $0x108] sm:$0xff] }
 0x339   :  { %6412 = vmatprep.subr.bf16.mxu1 %v8300_v61 }
 0x33a   :  { %v6282_v47 = vpop.f32.mrb[148].mxu1 }
 0x33b   :  { %v6283_v19 = vpop.f32.mrb[149].mxu1 }
 0x33c   :  { %v6284_v20 = vadd.f32 %v6283_v19, %v6282_v47  ;;  %v6285_v55 = vpop.f32.mrb[150].mxu1  ;;  %6413 = vmatpush3.bf16.msra.mxu1 %v8169_v36  ;;  %v3973_v36 = vld [vmem:[%s9193_s3 + $0x168] sm:$0xff] }
 0x33d   :  { %v6286_v10 = vpop.f32.mrb[151].mxu1  ;;  %6414 = vmatprep.subr.bf16.mxu1 %v8331_v39  ;;  %v5863_v34 = vcombine.low %v3961_v7, %v3973_v36 }
 0x33e   :  { %v9036_v30 = vadd.f32 %v6284_v20, %v8958_v38  ;;  %v6287_v51 = vadd.f32 %v6286_v10, %v6285_v55  ;;  %v5839_v38 = vcombine.low %v3937_v57, %v3949_v15  ;;  %v9228_v57 = vld [vmem:[#allocation14_spill] sm:$0xff]  ;;  %v9229_v15 = vld [vmem:[#allocation20_spill] sm:$0xff]  ;;  %v9230_v20 = vld [vmem:[#allocation13_spill] sm:$0xff] }
 0x33f   :  { %v9231_v10 = vld [vmem:[#allocation22_spill] sm:$0xff] }
 0x340   :  { %v9039_v60 = vadd.f32 %v6287_v51, %v8963_v33  ;;  %6415 = vmatpush3.bf16.msra.mxu1 %v8194_v49  ;;  %v5864_v33 = vcombine.high %v3961_v7, %v3973_v36  ;;  %v9232_v36 = vld [vmem:[#allocation16_spill] sm:$0xff] }
 0x341   :  { %6416 = vmatprep.subr.bf16.mxu1 %v8328_v8 }
 0x342   :  { %v6288_v61 = vpop.f32.mrb[152].mxu1 }
 0x343   :  { %v6289_v39 = vpop.f32.mrb[153].mxu1 }
 0x344   :  { %v6290_v5 = vadd.f32 %v6289_v39, %v6288_v61  ;;  %v6291_v29 = vpop.f32.mrb[154].mxu1  ;;  %6417 = vmatpush3.bf16.msra.mxu1 %v8191_v12  ;;  %v3985_v12 = vld [vmem:[%s9193_s3 + $0x1c8] sm:$0xff]  ;;  %v3963_v39 = vld [vmem:[%s9193_s3 + $0x118] sm:$0xff] }
 0x345   :  { %v6292_v46 = vpop.f32.mrb[155].mxu1  ;;  %6436 = vmatprep.subr.bf16.mxu1 %v8457_v18  ;;  %v3997_v18 = vld [vmem:[%s9193_s3 + $0x228] sm:$0xff] }
 0x346   :  { %v9052_v49 = vadd.f32 %v6290_v5, %v8968_v28  ;;  %v6293_v8 = vadd.f32 %v6292_v46, %v6291_v29  ;;  %v9233_v61 = vld [vmem:[#allocation21_spill] sm:$0xff] }
 0x347   :  { %5098 = vmatmul.mubr.bf16.vlgmr.msra.gmra.mrb[196].mxu1 %v5839_v38  ;;  %v3975_v38 = vld [vmem:[%s9193_s3 + $0x178] sm:$0xff] }
 0x348   :  { %v9055_v23 = vadd.f32 %v6293_v8, %v8974_v42  ;;  %6437 = vmatpush3.bf16.msra.mxu1 %v8355_v50  ;;  %5105 = vmatprep.mubr.bf16.mxu1 %v5864_v33  ;;  %v5888_v42 = vcombine.high %v3985_v12, %v3997_v18  ;;  %v5843_v33 = vcombine.low %v3939_v41, %v3951_v6  ;;  %v9234_v8 = vld [vmem:[#allocation15_spill] sm:$0xff] }
 0x349   :  { %6438 = vmatprep.subr.bf16.mxu1 %v8454_v62 }
 0x34a   :  { %v6294_v28 = vpop.f32.mrb[156].mxu1 }
 0x34b   :  { %v6295_v14 = vpop.f32.mrb[157].mxu1 }
 0x34c   :  { %v6296_v48 = vadd.f32 %v6295_v14, %v6294_v28  ;;  %v6297_v9 = vpop.f32.mrb[158].mxu1  ;;  %6439 = vmatpush3.bf16.msra.mxu1 %v8352_v13  ;;  %v3938_v13 = vld [vmem:[%s9193_s3 + $0x50] sm:$0xff] }
 0x34d   :  { %v6298_v50 = vpop.f32.mrb[159].mxu1  ;;  %6440 = vmatprep.subr.bf16.mxu1 %v8496_v4  ;;  %v3950_v4 = vld [vmem:[%s9193_s3 + $0xb0] sm:$0xff] }
 0x34e   :  { %v9068_v62 = vadd.f32 %v6296_v48, %v8980_v21  ;;  %v6299_v37 = vadd.f32 %v6298_v50, %v6297_v9  ;;  %v5887_v21 = vcombine.low %v3985_v12, %v3997_v18  ;;  %v5842_v54 = vcombine.high %v3938_v13, %v3950_v4  ;;  %v3999_v48 = vld [vmem:[%s9193_s3 + $0x238] sm:$0xff] }
 0x34f   :  { %5106 = vmatmul.mubr.bf16.gmra.mrb[200].mxu1 %v5863_v34  ;;  %v3987_v34 = vld [vmem:[%s9193_s3 + $0x1d8] sm:$0xff]  ;;  %v5867_v50 = vcombine.low %v3963_v39, %v3975_v38 }
 0x350   :  { %v9071_v58 = vadd.f32 %v6299_v37, %v8986_v25  ;;  %6441 = vmatpush3.bf16.msra.mxu1 %v8376_v45  ;;  %5113 = vmatprep.mubr.bf16.mxu1 %v5888_v42  ;;  %v9217_v45 = vld [vmem:[#allocation8_spill] sm:$0xff]  ;;  %v9219_v25 = vld [vmem:[#allocation7_spill] sm:$0xff] }
 0x351   :  { %6442 = vmatprep.subr.bf16.mxu1 %v8493_v17  ;;  %v9218_v17 = vld [vmem:[#allocation6_spill] sm:$0xff] }
 0x354   :  { %6443 = vmatpush3.bf16.msra.mxu1 %v8373_v24  ;;  %v3962_v24 = vld [vmem:[%s9193_s3 + $0x110] sm:$0xff] }
 0x355   :  { %6444 = vmatprep.subr.bf16.mxu1 %v8526_v16  ;;  %v3974_v16 = vld [vmem:[%s9193_s3 + $0x170] sm:$0xff] }
 0x356   :  { %v5865_v2 = vcombine.low %v3962_v24, %v3974_v16 }
 0x357   :  { %5114 = vmatmul.mubr.bf16.gmra.mrb[204].mxu1 %v5887_v21 }
 0x358   :  { %6445 = vmatpush3.bf16.msra.mxu1 %v8398_v43  ;;  %5154 = vmatprep.mubr.bf16.mxu1 %v5842_v54  ;;  %v5841_v43 = vcombine.low %v3938_v13, %v3950_v4  ;;  %v5892_v4 = vcombine.high %v3987_v34, %v3999_v48 }
 0x359   :  { %6446 = vmatprep.subr.bf16.mxu1 %v8524_v32  ;;  %v5866_v32 = vcombine.high %v3962_v24, %v3974_v16 }
 0x35c   :  { %6447 = vmatpush3.bf16.msra.mxu1 %v8395_v0  ;;  %v9221_v0 = vld [vmem:[#allocation10_spill] sm:$0xff] }
 0x35d   :  { %6448 = vmatprep.subr.bf16.mxu1 %v9217_v45  ;;  %v5891_v45 = vcombine.low %v3987_v34, %v3999_v48 }
 0x360   :  { %6449 = vmatpush3.bf16.msra.mxu1 %v9218_v17 }
 0x361   :  { %6450 = vmatprep.subr.bf16.mxu1 %v9219_v25 }
 0x364   :  { %6451 = vmatpush3.bf16.msra.mxu1 %v9220_v56 }
 0x365   :  { %6470 = vmatprep.subr.bf16.mxu1 %v8633_v11  ;;  %v9225_v11 = vld [vmem:[#allocation12_spill] sm:$0xff] }
 0x367   :  { %5155 = vmatmul.mubr.bf16.vlgmr.msra.gmra.mrb[208].mxu1 %v5841_v43 }
 0x368   :  { %6471 = vmatpush3.bf16.msra.mxu1 %v9221_v0  ;;  %5162 = vmatprep.mubr.bf16.mxu1 %v5866_v32 }
 0x369   :  { %6472 = vmatprep.subr.bf16.mxu1 %v9222_v3 }
 0x36c   :  { %6473 = vmatpush3.bf16.msra.mxu1 %v9223_v52 }
 0x36d   :  { %6474 = vmatprep.subr.bf16.mxu1 %v9224_v31 }
 0x36f   :  { %5163 = vmatmul.mubr.bf16.gmra.mrb[212].mxu1 %v5865_v2 }
 0x370   :  { %6475 = vmatpush3.bf16.msra.mxu1 %v9225_v11  ;;  %5170 = vmatprep.mubr.bf16.mxu1 %v5890_v26 }
 0x371   :  { %6476 = vmatprep.subr.bf16.mxu1 %v9226_v1 }
 0x374   :  { %6477 = vmatpush3.bf16.msra.mxu1 %v9227_v35 }
 0x375   :  { %6478 = vmatprep.subr.bf16.mxu1 %v8661_v53 }
 0x377   :  { %5171 = vmatmul.mubr.bf16.gmra.mrb[216].mxu1 %v5889_v59 }
 0x378   :  { %6479 = vmatpush3.bf16.msra.mxu1 %v9228_v57  ;;  %5211 = vmatprep.mubr.bf16.mxu1 %v5844_v63  ;;  %v7122_v63 = vld [vmem:[%s9194_s4] sm:$0xff]   ;;  %v7152_v57 = vmov 0.0  }
 0x379   :  { %6480 = vmatprep.subr.bf16.mxu1 %v9229_v15 }
 0x37a   :  { %v6316_v22 = vpop.f32.mrb[160].mxu1 }
 0x37b   :  { %v6317_v40 = vpop.f32.mrb[161].mxu1 }
 0x37c   :  { %v6318_v47 = vadd.f32 %v6317_v40, %v6316_v22  ;;  %v6319_v19 = vpop.f32.mrb[162].mxu1  ;;  %6481 = vmatpush3.bf16.msra.mxu1 %v9230_v20 }
 0x37d   :  { %v6320_v55 = vpop.f32.mrb[163].mxu1  ;;  %6482 = vmatprep.subr.bf16.mxu1 %v9231_v10 }
 0x37e   :  { %v4929_v51 = vadd.f32 %v6318_v47, %v9036_v30  ;;  %v6321_v7 = vadd.f32 %v6320_v55, %v6319_v19 }
 0x380   :  { %v4932_v53 = vadd.f32 %v6321_v7, %v9039_v60  ;;  %6483 = vmatpush3.bf16.msra.mxu1 %v9232_v36  ;;  %v5868_v60 = vcombine.high %v3963_v39, %v3975_v38 }
 0x381   :  { %6484 = vmatprep.subr.bf16.mxu1 %v9233_v61 }
 0x382   :  { %v6322_v5 = vpop.f32.mrb[164].mxu1 }
 0x383   :  { %v6323_v29 = vpop.f32.mrb[165].mxu1 }
 0x384   :  { %v6324_v46 = vadd.f32 %v6323_v29, %v6322_v5  ;;  %v6325_v30 = vpop.f32.mrb[166].mxu1  ;;  %6485 = vmatpush3.bf16.msra.mxu1 %v9234_v8 }
 0x385   :  { %v6326_v12 = vpop.f32.mrb[167].mxu1  ;;  %6899 = vmatprep.subr.bf16.mxu1 %v7152_v57 }
 0x386   :  { %v4937_v18 = vadd.f32 %v6324_v46, %v9052_v49  ;;  %v6327_v28 = vadd.f32 %v6326_v12, %v6325_v30 }
 0x387   :  { %5212 = vmatmul.mubr.bf16.vlgmr.msra.gmra.mrb[220].mxu1 %v5843_v33 }
 0x388   :  { %v4940_v14 = vadd.f32 %v6327_v28, %v9055_v23  ;;  %5219 = vmatprep.mubr.bf16.mxu1 %v5868_v60  ;;  %6900 = vmatpush3.bf16.msra.mxu1 %v7122_v63 }
 0x389   :  { %6913 = vmatprep.subr.bf16.mxu1 %v7152_v57 }
 0x38a   :  { %v6328_v9 = vpop.f32.mrb[168].mxu1 }
 0x38b   :  { %v6329_v42 = vpop.f32.mrb[169].mxu1 }
 0x38c   :  { %v6330_v37 = vadd.f32 %v6329_v42, %v6328_v9  ;;  %v6331_v13 = vpop.f32.mrb[170].mxu1 }
 0x38d   :  { %v6332_v49 = vpop.f32.mrb[171].mxu1 }
 0x38e   :  { %v4945_v21 = vadd.f32 %v6330_v37, %v9068_v62  ;;  %v6333_v54 = vadd.f32 %v6332_v49, %v6331_v13 }
 0x38f   :  { %5220 = vmatmul.mubr.bf16.gmra.mrb[224].mxu1 %v5867_v50 }
 0x390   :  { %v4948_v23 = vadd.f32 %v6333_v54, %v9071_v58  ;;  %5227 = vmatprep.mubr.bf16.mxu1 %v5892_v4 }
 0x397   :  { %5228 = vmatmul.mubr.bf16.gmra.mrb[228].mxu1 %v5891_v45 }
 0x398   :  { %6901 = vmatprep.mubr.msk.bf16.mxu1 %vm7153_vm1, %v7152_v57 }
 0x3ba   :  { %v6350_v17 = vpop.f32.mrb[172].mxu1 }
 0x3bb   :  { %v6351_v25 = vpop.f32.mrb[173].mxu1 }
 0x3bc   :  { %v6352_v24 = vadd.f32 %v6351_v25, %v6350_v17  ;;  %v6353_v16 = vpop.f32.mrb[174].mxu1 }
 0x3bd   :  { %v6354_v43 = vpop.f32.mrb[175].mxu1 }
 0x3be   :  { %v4986_v56 = vadd.f32 %v6352_v24, %v4929_v51  ;;  %v6355_v32 = vadd.f32 %v6354_v43, %v6353_v16 }
 0x3c0   :  { %v4989_v0 = vadd.f32 %v6355_v32, %v4932_v53 }
 0x3c2   :  { %v6356_v3 = vpop.f32.mrb[176].mxu1 }
 0x3c3   :  { %v6357_v44 = vpop.f32.mrb[177].mxu1 }
 0x3c4   :  { %v6358_v27 = vadd.f32 %v6357_v44, %v6356_v3  ;;  %v6359_v2 = vpop.f32.mrb[178].mxu1 }
 0x3c5   :  { %v6360_v62 = vpop.f32.mrb[179].mxu1 }
 0x3c6   :  { %v4994_v52 = vadd.f32 %v6358_v27, %v4937_v18  ;;  %v6361_v26 = vadd.f32 %v6360_v62, %v6359_v2 }
 0x3c8   :  { %v4997_v31 = vadd.f32 %v6361_v26, %v4940_v14 }
 0x3ca   :  { %v6362_v58 = vpop.f32.mrb[180].mxu1 }
 0x3cb   :  { %v6363_v11 = vpop.f32.mrb[181].mxu1 }
 0x3cc   :  { %v6364_v1 = vadd.f32 %v6363_v11, %v6362_v58  ;;  %v6365_v41 = vpop.f32.mrb[182].mxu1 }
 0x3cd   :  { %v6366_v6 = vpop.f32.mrb[183].mxu1 }
 0x3ce   :  { %v5002_v59 = vadd.f32 %v6364_v1, %v4945_v21  ;;  %v6367_v35 = vadd.f32 %v6366_v6, %v6365_v41 }
 0x3d0   :  { %v5005_v15 = vadd.f32 %v6367_v35, %v4948_v23 }
 0x3fa   :  { %v6384_v22 = vpop.f32.mrb[184].mxu1 }
 0x3fb   :  { %v6385_v40 = vpop.f32.mrb[185].mxu1 }
 0x3fc   :  { %v6386_v47 = vadd.f32 %v6385_v40, %v6384_v22  ;;  %v6387_v19 = vpop.f32.mrb[186].mxu1 }
 0x3fd   :  { %v6388_v20 = vpop.f32.mrb[187].mxu1 }
 0x3fe   :  { %v5043_v55 = vadd.f32 %v6386_v47, %v4986_v56  ;;  %v6389_v10 = vadd.f32 %v6388_v20, %v6387_v19 }
 0x400   :  { %v5046_v51 = vadd.f32 %v6389_v10, %v4989_v0 }
 0x402   :  { %v6390_v7 = vpop.f32.mrb[188].mxu1 }
 0x403   :  { %v6391_v53 = vpop.f32.mrb[189].mxu1 }
 0x404   :  { %v6392_v36 = vadd.f32 %v6391_v53, %v6390_v7  ;;  %v6393_v61 = vpop.f32.mrb[190].mxu1 }
 0x405   :  { %v6394_v39 = vpop.f32.mrb[191].mxu1 }
 0x406   :  { %v5051_v38 = vadd.f32 %v6392_v36, %v4994_v52  ;;  %v6395_v5 = vadd.f32 %v6394_v39, %v6393_v61 }
 0x408   :  { %v5054_v29 = vadd.f32 %v6395_v5, %v4997_v31 }
 0x40a   :  { %v6396_v33 = vpop.f32.mrb[192].mxu1 }
 0x40b   :  { %v6397_v46 = vpop.f32.mrb[193].mxu1 }
 0x40c   :  { %v6398_v30 = vadd.f32 %v6397_v46, %v6396_v33  ;;  %v6399_v8 = vpop.f32.mrb[194].mxu1 }
 0x40d   :  { %v6400_v60 = vpop.f32.mrb[195].mxu1 }
 0x40e   :  { %v5059_v12 = vadd.f32 %v6398_v30, %v5002_v59  ;;  %v6401_v18 = vadd.f32 %v6400_v60, %v6399_v8 }
 0x410   :  { %v5062_v28 = vadd.f32 %v6401_v18, %v5005_v15 }
 0x41a   :  { %v6418_v14 = vpop.f32.mrb[196].mxu1 }
 0x41b   :  { %v6419_v34 = vpop.f32.mrb[197].mxu1 }
 0x41c   :  { %v6420_v48 = vadd.f32 %v6419_v34, %v6418_v14  ;;  %v6421_v9 = vpop.f32.mrb[198].mxu1 }
 0x41d   :  { %v6422_v42 = vpop.f32.mrb[199].mxu1 }
 0x41e   :  { %v5100_v50 = vadd.f32 %v6420_v48, %v5043_v55  ;;  %v6423_v37 = vadd.f32 %v6422_v42, %v6421_v9 }
 0x420   :  { %v5103_v13 = vadd.f32 %v6423_v37, %v5046_v51 }
 0x422   :  { %v6424_v4 = vpop.f32.mrb[200].mxu1 }
 0x423   :  { %v6425_v49 = vpop.f32.mrb[201].mxu1 }
 0x424   :  { %v6426_v21 = vadd.f32 %v6425_v49, %v6424_v4  ;;  %v6427_v54 = vpop.f32.mrb[202].mxu1 }
 0x425   :  { %v6428_v23 = vpop.f32.mrb[203].mxu1 }
 0x426   :  { %v5108_v45 = vadd.f32 %v6426_v21, %v5051_v38  ;;  %v6429_v17 = vadd.f32 %v6428_v23, %v6427_v54  ;;  %v7123_v23 = vld [vmem:[%s9196_s6] sm:$0xff]  }
 0x428   :  { %v5111_v25 = vadd.f32 %v6429_v17, %v5054_v29  ;;  %v5893_v17 = vld [vmem:[%s9195_s5] ss:$0 sm:$0xff] }
 0x42a   :  { %v6430_v24 = vpop.f32.mrb[204].mxu1 }
 0x42b   :  { %v6431_v16 = vpop.f32.mrb[205].mxu1 }
 0x42c   :  { %v6432_v43 = vadd.f32 %v6431_v16, %v6430_v24  ;;  %v6433_v56 = vpop.f32.mrb[206].mxu1 }
 0x42d   :  { %v6434_v32 = vpop.f32.mrb[207].mxu1 }
 0x42e   :  { %v5116_v0 = vadd.f32 %v6432_v43, %v5059_v12  ;;  %v6435_v3 = vadd.f32 %v6434_v32, %v6433_v56 }
 0x430   :  { %v5119_v44 = vadd.f32 %v6435_v3, %v5062_v28 }
 0x43a   :  { %v6452_v27 = vpop.f32.mrb[208].mxu1 }
 0x43b   :  { %v6453_v2 = vpop.f32.mrb[209].mxu1 }
 0x43c   :  { %v6454_v62 = vadd.f32 %v6453_v2, %v6452_v27  ;;  %v6455_v52 = vpop.f32.mrb[210].mxu1 }
 0x43d   :  { %v6456_v26 = vpop.f32.mrb[211].mxu1 }
 0x43e   :  { %v5157_v31 = vadd.f32 %v6454_v62, %v5100_v50  ;;  %v6457_v58 = vadd.f32 %v6456_v26, %v6455_v52 }
 0x440   :  { %v5160_v11 = vadd.f32 %v6457_v58, %v5103_v13 }
 0x442   :  { %v6458_v1 = vpop.f32.mrb[212].mxu1 }
 0x443   :  { %v6459_v41 = vpop.f32.mrb[213].mxu1 }
 0x444   :  { %v6460_v6 = vadd.f32 %v6459_v41, %v6458_v1  ;;  %v6461_v59 = vpop.f32.mrb[214].mxu1 }
 0x445   :  { %v6462_v35 = vpop.f32.mrb[215].mxu1 }
 0x446   :  { %v5165_v63 = vadd.f32 %v6460_v6, %v5108_v45  ;;  %v6463_v15 = vadd.f32 %v6462_v35, %v6461_v59  ;;  %v7124_v45 = vld [vmem:[%s9196_s6 + $0x8] sm:$0xff]  }
 0x448   :  { %v5168_v22 = vadd.f32 %v6463_v15, %v5111_v25 }
 0x44a   :  { %v6464_v40 = vpop.f32.mrb[216].mxu1 }
 0x44b   :  { %v6465_v47 = vpop.f32.mrb[217].mxu1 }
 0x44c   :  { %v6466_v19 = vadd.f32 %v6465_v47, %v6464_v40  ;;  %v6467_v20 = vpop.f32.mrb[218].mxu1 }
 0x44d   :  { %v6468_v55 = vpop.f32.mrb[219].mxu1 }
 0x44e   :  { %v5173_v10 = vadd.f32 %v6466_v19, %v5116_v0  ;;  %v6469_v51 = vadd.f32 %v6468_v55, %v6467_v20 }
 0x450   :  { %v5176_v7 = vadd.f32 %v6469_v51, %v5119_v44 }
 0x45a   :  { %v6486_v53 = vpop.f32.mrb[220].mxu1 }
 0x45b   :  { %v6487_v36 = vpop.f32.mrb[221].mxu1 }
 0x45c   :  { %v6488_v61 = vadd.f32 %v6487_v36, %v6486_v53  ;;  %v6489_v39 = vpop.f32.mrb[222].mxu1 }
 0x45d   :  { %v6490_v38 = vpop.f32.mrb[223].mxu1 }
 0x45e   :  { %v5214_v5 = vadd.f32 %v6488_v61, %v5157_v31  ;;  %v6491_v29 = vadd.f32 %v6490_v38, %v6489_v39 }
 0x460   :  { %v5217_v33 = vadd.f32 %v6491_v29, %v5160_v11 }
 0x462   :  { %v5236_v46 = vpack.c.bf16 %v5217_v33, %v5214_v5  ;;  %v6492_v30 = vpop.f32.mrb[224].mxu1 }
 0x463   :  { %v6493_v8 = vpop.f32.mrb[225].mxu1 }
 0x464   :  { %v6494_v60 = vadd.f32 %v6493_v8, %v6492_v30  ;;  %v6495_v12 = vpop.f32.mrb[226].mxu1  ;;  %6902 = vmatmul.mubr.msk.bf16.vlgmr.msra.gmra.mrb[232].mxu1 %vm5254_vm2, %v5236_v46 }
 0x465   :  { %v6496_v18 = vpop.f32.mrb[227].mxu1  ;;  %6905 = vmatprep.mubr.msk.bf16.mxu1 %vm7153_vm1, %v7152_v57  ;;  %6914 = vmatpush3.bf16.msra.mxu1 %v7123_v23 }
 0x466   :  { %v5222_v28 = vadd.f32 %v6494_v60, %v5165_v63  ;;  %v6497_v14 = vadd.f32 %v6496_v18, %v6495_v12  ;;  %6915 = vmatprep.subr.bf16.mxu1 %v7152_v57 }
 0x468   :  { %v5225_v34 = vadd.f32 %v6497_v14, %v5168_v22 }
 0x469   :  { %6916 = vmatpush3.bf16.msra.mxu1 %v7124_v45 }
 0x46a   :  { %v5237_v48 = vpack.c.bf16 %v5225_v34, %v5222_v28  ;;  %v6498_v9 = vpop.f32.mrb[228].mxu1  ;;  %v5898_v28 = vld [vmem:[%s9197_s7] ss:$0 sm:$0xff] }
 0x46b   :  { %v6499_v42 = vpop.f32.mrb[229].mxu1 }
 0x46c   :  { %v6500_v50 = vadd.f32 %v6499_v42, %v6498_v9  ;;  %v6501_v37 = vpop.f32.mrb[230].mxu1  ;;  %6906 = vmatmul.mubr.msk.bf16.gmra.mrb[236].mxu1 %vm5254_vm2, %v5237_v48 }
 0x46d   :  { %v6502_v13 = vpop.f32.mrb[231].mxu1  ;;  %6909 = vmatprep.mubr.msk.bf16.mxu1 %vm7153_vm1, %v7152_v57 }
 0x46e   :  { %v5230_v4 = vadd.f32 %v6500_v50, %v5173_v10  ;;  %v6503_v49 = vadd.f32 %v6502_v13, %v6501_v37 }
 0x470   :  { %v5233_v21 = vadd.f32 %v6503_v49, %v5176_v7 }
 0x472   :  { %v5238_v54 = vpack.c.bf16 %v5233_v21, %v5230_v4 }
 0x474   :  { %6910 = vmatmul.mubr.msk.bf16.gmra.mrb[240].mxu1 %vm5254_vm2, %v5238_v54 }
 0x475   :  { %6917 = vmatprep.mubr.msk.bf16.mxu1 %vm7153_vm1, %v7152_v57 }
 0x537   :  { %v5298_v25 = vpop.f32.mrb[232].mxu1 }
 0x538   :  { %v5299_v24 = vadd.f32 %v5893_v17, %v5298_v25  ;;  %v6903_v16 = vpop.f32.mrb[233].mxu1 }
 0x539   :  { %v5301_v43 = vpop.f32.mrb[234].mxu1 }
 0x53a   :  { %v5321_v56 = vmax.f32 %v5299_v24, 0.0  ;;  %v5302_v32 = vadd.f32 %v5893_v17, %v5301_v43  ;;  %v6904_v0 = vpop.f32.mrb[235].mxu1 }
 0x53c   :  { %v5322_v3 = vmax.f32 %v5302_v32, 0.0  ;;  %v5327_v44 = vsel %vm1398_vm0, %v5321_v56, -inf }
 0x53e   :  { %v5328_v57 = vsel %vm1398_vm0, %v5322_v3, -inf }
 0x53f   :  { %v5330_v27 = vmax.f32 %v5327_v44, %v5328_v57  ;;  %v5306_v2 = vpop.f32.mrb[236].mxu1 }
 0x540   :  { %v5307_v62 = vadd.f32 %v5893_v17, %v5306_v2  ;;  %v6907_v52 = vpop.f32.mrb[237].mxu1 }
 0x541   :  { %v5309_v26 = vpop.f32.mrb[238].mxu1 }
 0x542   :  { %v5323_v31 = vmax.f32 %v5307_v62, 0.0  ;;  %v6908_v58 = vpop.f32.mrb[239].mxu1  ;;  %v5310_v1 = vadd.f32 %v5893_v17, %v5309_v26 }
 0x544   :  { %v5329_v11 = vsel %vm1398_vm0, %v5323_v31, -inf  ;;  %v5324_v35 = vmax.f32 %v5310_v1, 0.0 }
 0x545   :  { %v5331_v41 = vmax.f32 %v5330_v27, %v5329_v11 }
 0x546   :  { %v5338_v55 = vsel %vm1398_vm0, %v5324_v35, -inf }
 0x547   :  { %v5332_v6 = vrot.slane %v5331_v41, 4  ;;  %v5314_v59 = vpop.f32.mrb[240].mxu1 }
 0x548   :  { %v5315_v63 = vadd.f32 %v5893_v17, %v5314_v59  ;;  %v6911_v15 = vpop.f32.mrb[241].mxu1 }
 0x549   :  { %v5317_v22 = vpop.f32.mrb[242].mxu1  ;;  %v5333_v20 = vmax.f32 %v5331_v41, %v5332_v6 }
 0x54a   :  { %v5325_v40 = vmax.f32 %v5315_v63, 0.0  ;;  %v5318_v47 = vadd.f32 %v5893_v17, %v5317_v22  ;;  %v6912_v19 = vpop.f32.mrb[243].mxu1 }
 0x54b   :  { %v5334_v36 = vrot.slane %v5333_v20, 2 }
 0x54c   :  { %v5339_v10 = vsel %vm1398_vm0, %v5325_v40, -inf  ;;  %v5326_v51 = vmax.f32 %v5318_v47, 0.0 }
 0x54d   :  { %v5341_v7 = vmax.f32 %v5338_v55, %v5339_v10  ;;  %v5335_v38 = vmax.f32 %v5333_v20, %v5334_v36 }
 0x54e   :  { %v5340_v53 = vsel %vm1398_vm0, %v5326_v51, -inf }
 0x54f   :  { %v5342_v61 = vmax.f32 %v5341_v7, %v5340_v53  ;;  %v5336_v33 = vrot.slane %v5335_v38, 1 }
 0x551   :  { %v5343_v39 = vrot.slane %v5342_v61, 4  ;;  %v5337_v8 = vmax.f32 %v5335_v38, %v5336_v33 }
 0x553   :  { %v5344_v5 = vmax.f32 %v5342_v61, %v5343_v39 }
 0x555   :  { %v5345_v29 = vrot.slane %v5344_v5, 2 }
 0x557   :  { %v5346_v46 = vmax.f32 %v5344_v5, %v5345_v29 }
 0x559   :  { %v5347_v30 = vrot.slane %v5346_v46, 1 }
 0x55b   :  { %v5348_v60 = vmax.f32 %v5346_v46, %v5347_v30 }
 0x55d   :  { %v5350_v12 = vsel %vm5349_vm3, %v5337_v8, %v5348_v60 }
 0x55e   :  { %v5351_v18 = vpack.c.bf16 %v5350_v12, %v5350_v12 }
 0x560   :  { %6918 = vmatmul.mubr.msk.bf16.vlgmr.msra.gmra.mrb[244].mxu1 %vm1398_vm0, %v5351_v18 }
 0x633   :  { %v5412_v14 = vpop.f32.mrb[244].mxu1 }
 0x634   :  { %v5413_v34 = vadd.f32 %v5898_v28, %v5412_v14  ;;  %v6919_v48 = vpop.f32.mrb[245].mxu1 }
 0x635   :  { %v5415_v9 = vpop.f32.mrb[246].mxu1 }
 0x636   :  { %v6920_v42 = vpop.f32.mrb[247].mxu1  ;;  %5419 = vst.msk [vmem:[#allocation2] sm:$0x3] %vm5418_vm4, %v5413_v34 }
 0x637   :  { %7139 = shalt.err (!%p7136_p4)
}
 0x638   :  { %s7140_s7 = scalar_lea.hbm %s9198_s8, 32 }
 0x639   :  { %p7141_p5 = scmp.ne.s32.totalorder %s9198_s8, %s7140_s7  ;;  %p7144_p6 = scmp.lt.u32.totalorder %s7140_s7, %s9198_s8 }
 0x63b   :  { %p7146_p7 = pnand %p7144_p6, %p7141_p5 }
 0x63d   :  { %7149 = shalt.err (!%p7146_p7)
}
 0x63e   :  { %5429 = dma.vmem_to_hbm [thread:$0]  %s5427_s2, 32, %s9198_s8, [#allocation3]  }
 0x63f   :  { %7150 = dma.done.wait [#allocation3], 32  }
 0x640   :  { %7151 = vsyncadd [#allocation3], 4294967264 }
 0x641   :  { %5433 = vsyncpa [#allocation3], 1 }

</bundles_post_ra>
